<compile_context>
chip_gen: v7x
topology: tpu7x:2x2x1
jax: 0.10.0
libtpu: 0.0.40
codegen_flags: <defaults>
</compile_context>

<pallas_src>
import jax
import jax.numpy as jnp
from jax.experimental import pallas as pl
from jax.experimental.pallas import tpu as pltpu

_EPS = 1e-5
_LANE = 128


# --------------------------------- kernel -----------------------------------

def _down_kernel(x_ref, w1_ref, s1_ref, b1_ref, w2_ref, s2_ref, b2_ref,
                 o_ref, pad1_ref, pad2_ref):
    B, Hq, Wq, Cp = pad1_ref.shape           # scratch: (B, Hp+2, Wp+2, 128)
    Hp, Wp = Hq - 2, Wq - 2
    Cin = x_ref.shape[-1] // 2               # x block: (B, Hp, 2, Wp, 2*Cin)
    M = B * Hp * Wp

    # ---- refresh the 1-pixel zero halo of both scratches (kept per-step so
    #      the kernel stays correct if the parallel axis is split across cores).
    def zero_halo(pad_ref):
        zr = jnp.zeros((B, 1, Wq, Cp), pad_ref.dtype)
        zc = jnp.zeros((B, Hq, 1, Cp), pad_ref.dtype)
        pad_ref[:, 0:1, :, :] = zr
        pad_ref[:, Hq - 1:Hq, :, :] = zr
        pad_ref[:, :, 0:1, :] = zc
        pad_ref[:, :, Wq - 1:Wq, :] = zc

    zero_halo(pad1_ref)
    zero_halo(pad2_ref)

    # ---- 2x2 max pool, in-kernel --------------------------------------------
    x = x_ref[...]                                     # (B, Hp, 2, Wp, 2*Cin) f32
    rmax = jnp.maximum(x[:, :, 0], x[:, :, 1])         # (B, Hp, Wp, 2*Cin)
    pooled = jnp.maximum(rmax[..., :Cin], rmax[..., Cin:])     # (B, Hp, Wp, Cin)

    # Zero-pad the channels to the full 128 lanes IN REGISTER, then write the
    # whole interior with a single lane-dense bf16 store.  Padded lanes become
    # explicit zeros, so no per-tap masking is needed before the matmuls.
    pooled = pooled.astype(pad1_ref.dtype)
    if Cin < Cp:
        pooled = jnp.concatenate(
            [pooled, jnp.zeros((B, Hp, Wp, Cp - Cin), pad1_ref.dtype)], axis=-1)
    pad1_ref[:, 1:Hp + 1, 1:Wp + 1, :] = pooled

    # ---- shared 3x3 conv + folded BN + ReLU ----------------------------------
    def conv_bn_relu(pad_ref, w_ref, s_ref, b_ref):
        # 9 accumulated MXU matmuls (bf16 operands, f32 accumulation).  Each tap
        # operand is only (M, 128), so nothing spills to VMEM — unlike a single
        # (M, 9*128) im2col slab.
        acc = jnp.zeros((M, Cp), jnp.float32)
        t = 0
        for ky in range(3):
            for kx in range(3):
                tap = pad_ref[:, ky:ky + Hp, kx:kx + Wp, :].reshape(M, Cp)
                acc = acc + jnp.dot(tap, w_ref[t * Cp:(t + 1) * Cp, :],
                                    preferred_element_type=jnp.float32)
                t += 1
        return jnp.maximum(acc * s_ref[...] + b_ref[...], 0.0)    # (M, Cp) f32

    # conv1 (+BN+ReLU).  Its padded output lanes are exactly zero because the
    # padded lanes of w1/s1/b1 are zero (ReLU(0*0+0)=0), so conv2's K padding is
    # guaranteed NaN-free.
    h1 = conv_bn_relu(pad1_ref, w1_ref, s1_ref, b1_ref)
    pad2_ref[:, 1:Hp + 1, 1:Wp + 1, :] = (
        h1.reshape(B, Hp, Wp, Cp).astype(pad2_ref.dtype))

    # conv2 (+BN+ReLU), lane-dense f32 output store.
    o_ref[...] = conv_bn_relu(pad2_ref, w2_ref, s2_ref, b2_ref)


# --------------------------------- wrapper ----------------------------------

def down_forward(x_nchw, params, out_channels):
    """Down.forward: (N, Cin, H, W) f32 -> (N, Cout, H//2, W//2) f32."""
    w1p, s1, b1, w2p, s2, b2 = params
    N, Cin, H, W = x_nchw.shape
    assert H % 2 == 0 and W % 2 == 0, "Down expects even spatial dims"
    Hp, Wp = H // 2, W // 2
    Cp = w1p.shape[-1]
    assert Cin <= Cp and out_channels <= Cp

    # Batch tile: as many images per grid step as fit a ~512-row matmul M, but
    # keep >= 2 grid programs whenever N >= 2 so both v7x TensorCores get work
    # (harmless on the single-core v5e / v6e).
    # TODO(synk): very large H*W additionally needs spatial (row-block) tiling
    # with a 1-row halo to stay inside the 64 MiB v7x VMEM.
    min_progs = 2 if N >= 2 else 1
    b_tile = 1
    for d in range(1, N + 1):
        if N % d == 0 and d * Hp * Wp <= 512 and N // d >= min_progs:
            b_tile = d
    grid = (N // b_tile,)
    m_blk = b_tile * Hp * Wp

    # NCHW -> NHWC (one HBM pass), then a free metadata-only reshape exposing
    # the 2x2 pooling window: (N, Hp, 2, Wp, 2*Cin).
    x = jnp.transpose(x_nchw, (0, 2, 3, 1)).reshape(N, Hp, 2, Wp, 2 * Cin)

    out2d = pl.pallas_call(
        _down_kernel,
        out_shape=jax.ShapeDtypeStruct((N * Hp * Wp, Cp), jnp.float32),
        grid_spec=pltpu.PrefetchScalarGridSpec(
            num_scalar_prefetch=0,
            grid=grid,
            in_specs=[
                pl.BlockSpec((b_tile, Hp, 2, Wp, 2 * Cin),
                             lambda n: (n, 0, 0, 0, 0)),
                # Weights / folded BN scale+bias: constant index maps (DMA'd
                # once).  pl.Buffered(1) would also drop the second buffer but
                # is left at the default for lowering safety.
                pl.BlockSpec(w1p.shape, lambda n: (0, 0)),
                pl.BlockSpec(s1.shape, lambda n: (0, 0)),
                pl.BlockSpec(b1.shape, lambda n: (0, 0)),
                pl.BlockSpec(w2p.shape, lambda n: (0, 0)),
                pl.BlockSpec(s2.shape, lambda n: (0, 0)),
                pl.BlockSpec(b2.shape, lambda n: (0, 0)),
            ],
            out_specs=pl.BlockSpec((m_blk, Cp), lambda n: (n, 0)),
            scratch_shapes=[
                pltpu.VMEM((b_tile, Hp + 2, Wp + 2, Cp), jnp.bfloat16),  # conv1 pad
                pltpu.VMEM((b_tile, Hp + 2, Wp + 2, Cp), jnp.bfloat16),  # conv2 pad
            ],
        ),
        compiler_params=pltpu.CompilerParams(
            dimension_semantics=("parallel",),
            vmem_limit_bytes=32 * 1024 * 1024,
        ),
    )(x, w1p, s1, b1, w2p, s2, b2)

    out = out2d.reshape(N, Hp, Wp, Cp)[..., :out_channels]
    return jnp.transpose(out, (0, 3, 1, 2))


# ----------------------- parameter setup & reference ------------------------

def init_raw_params(key, cin, cout):
    """Deterministic synthetic parameters (Conv weight/bias + BN stats/affine), HWIO."""
    ks = jax.random.split(key, 12)

    def conv_block(k0, k1, k2, k3, k4, k5, ci, co):
        w = jax.random.normal(k0, (3, 3, ci, co), jnp.float32) / jnp.sqrt(9.0 * ci)
        cb = 0.05 * jax.random.normal(k1, (co,), jnp.float32)
        gamma = 1.0 + 0.1 * jax.random.normal(k2, (co,), jnp.float32)
        beta = 0.1 * jax.random.normal(k3, (co,), jnp.float32)
        mean = 0.1 * jax.random.normal(k4, (co,), jnp.float32)
        var = 0.9 + 0.1 * jnp.abs(jax.random.normal(k5, (co,), jnp.float32))
        return (w, cb, gamma, beta, mean, var)

    return conv_block(*ks[:6], cin, cout) + conv_block(*ks[6:], cout, cout)


def prep_params(raw):
    """Fold conv bias + inference BN into scale/bias, lay weights out for the
    per-tap matmuls, zero-pad channels to the 128-lane width, cast to bf16.

    NOTE: the padded lanes of every weight / scale / bias MUST stay exactly
    zero — the kernel relies on ReLU(0*s + b) == 0 so that the padded lanes of
    conv1's output (== conv2's K padding) are exact zeros.
    """
    (w1, cb1, g1, be1, m1, v1, w2, cb2, g2, be2, m2, v2) = raw
    cin, cout = w1.shape[2], w1.shape[3]
    cp = ((cout + _LANE - 1) // _LANE) * _LANE
    assert cin <= cp

    def fold_bn(cb, g, be, m, v):
        scale = g / jnp.sqrt(v + _EPS)
        bias = scale * (cb - m) + be
        return (jnp.zeros((1, cp), jnp.float32).at[0, :cout].set(scale),
                jnp.zeros((1, cp), jnp.float32).at[0, :cout].set(bias))

    s1, b1 = fold_bn(cb1, g1, be1, m1, v1)
    s2, b2 = fold_bn(cb2, g2, be2, m2, v2)

    # Per-tap weight layout: rows [t*128, (t+1)*128) hold tap t (t = ky*3 + kx),
    # row index within a tap = input channel, column = output channel.
    w1p = jnp.zeros((9, cp, cp), jnp.float32).at[:, :cin, :cout].set(
        w1.reshape(9, cin, cout)).reshape(9 * cp, cp).astype(jnp.bfloat16)
    w2p = jnp.zeros((9, cp, cp), jnp.float32).at[:, :cout, :cout].set(
        w2.reshape(9, cout, cout)).reshape(9 * cp, cp).astype(jnp.bfloat16)

    return (w1p, s1, b1, w2p, s2, b2)


def ref_down(x_nchw, raw):
    """Pure-JAX reference (PyTorch Down in eval mode).  Conv operands are cast
    to bf16 with f32 accumulation, mirroring the kernel's MXU precision."""
    (w1, cb1, g1, be1, m1, v1, w2, cb2, g2, be2, m2, v2) = raw
    x = jnp.transpose(x_nchw, (0, 2, 3, 1))
    n, h, w, c = x.shape
    pooled = x.reshape(n, h // 2, 2, w // 2, 2, c).max(axis=(2, 4))

    def block(inp, wt, cb, g, be, m, v):
        scale = g / jnp.sqrt(v + _EPS)
        bias = scale * (cb - m) + be
        y = jax.lax.conv_general_dilated(
            inp.astype(jnp.bfloat16), wt.astype(jnp.bfloat16), (1, 1), "SAME",
            dimension_numbers=("NHWC", "HWIO", "NHWC"),
            preferred_element_type=jnp.float32)
        return jnp.maximum(y * scale + bias, 0.0)

    h1 = block(pooled, w1, cb1, g1, be1, m1, v1)
    h2 = block(h1, w2, cb2, g2, be2, m2, v2)
    return jnp.transpose(h2, (0, 3, 1, 2))


if __name__ == "__main__":
    # TODO(synk): BatchNorm is implemented in inference mode (folded running
    # stats); PyTorch training-mode batch statistics are not computed.
    key = jax.random.PRNGKey(0)
    kx, kp = jax.random.split(key)

    N, CIN, H, W = 2, 4, 16, 16
    COUT = 8
    x = jax.random.normal(kx, (N, CIN, H, W), jnp.float32)

    raw = init_raw_params(kp, CIN, COUT)
    params = prep_params(raw)

    out = jax.block_until_ready(down_forward(x, params, COUT))
    ref = jax.block_until_ready(ref_down(x, raw))

    assert out.shape == (N, COUT, H // 2, W // 2), out.shape
    assert jnp.allclose(out, ref, atol=1e-2, rtol=1e-2), float(
        jnp.max(jnp.abs(out - ref)))

    print("KERNEL_OK")
</pallas_src>

<mosaic_0001>
module attributes {stable_mosaic.version = 11 : i64} {
  func.func @_down_kernel(%arg0: i32, %arg1: memref<1x8x2x8x8xf32, #tpu.memory_space<vmem>>, %arg2: memref<1152x128xbf16, #tpu.memory_space<vmem>>, %arg3: memref<1x128xf32, #tpu.memory_space<vmem>>, %arg4: memref<1x128xf32, #tpu.memory_space<vmem>>, %arg5: memref<1152x128xbf16, #tpu.memory_space<vmem>>, %arg6: memref<1x128xf32, #tpu.memory_space<vmem>>, %arg7: memref<1x128xf32, #tpu.memory_space<vmem>>, %arg8: memref<64x128xf32, #tpu.memory_space<vmem>>, %arg9: memref<1x10x10x128xbf16, #tpu.memory_space<vmem>>, %arg10: memref<1x10x10x128xbf16, #tpu.memory_space<vmem>>) attributes {dimension_semantics = [#tpu.dimension_semantics<parallel>], iteration_bounds = array<i64: 2>, scalar_prefetch = 0 : i64, scratch_operands = 2 : i64, tpu.core_type = #tpu.core_type<tc>, window_params = [{transform_indices = @transform_0, window_bounds = array<i64: 1, 8, 2, 8, 8>}, {pipeline_mode = #tpu.pipeline_mode<synchronous>, transform_indices = @transform_1, window_bounds = array<i64: 1152, 128>}, {pipeline_mode = #tpu.pipeline_mode<synchronous>, transform_indices = @transform_2, window_bounds = array<i64: 1, 128>}, {pipeline_mode = #tpu.pipeline_mode<synchronous>, transform_indices = @transform_3, window_bounds = array<i64: 1, 128>}, {pipeline_mode = #tpu.pipeline_mode<synchronous>, transform_indices = @transform_4, window_bounds = array<i64: 1152, 128>}, {pipeline_mode = #tpu.pipeline_mode<synchronous>, transform_indices = @transform_5, window_bounds = array<i64: 1, 128>}, {pipeline_mode = #tpu.pipeline_mode<synchronous>, transform_indices = @transform_6, window_bounds = array<i64: 1, 128>}, {transform_indices = @transform_7, window_bounds = array<i64: 64, 128>}]} {
    %cst = arith.constant 0.000000e+00 : bf16
    %0 = vector.broadcast %cst : bf16 to vector<1x1x10x128xbf16>
    %cst_0 = arith.constant 0.000000e+00 : bf16
    %1 = vector.broadcast %cst_0 : bf16 to vector<1x10x1x128xbf16>
    %c0 = arith.constant 0 : index
    %c0_1 = arith.constant 0 : index
    %c0_2 = arith.constant 0 : index
    %c0_3 = arith.constant 0 : index
    %2 = vector.load %arg9[%c0, %c0_1, %c0_2, %c0_3] : memref<1x10x10x128xbf16, #tpu.memory_space<vmem>>, vector<1x1x10x128xbf16>
    tpu.vector_store %arg9[%c0, %c0_1, %c0_2, %c0_3], %0 {strides = array<i32>} : memref<1x10x10x128xbf16, #tpu.memory_space<vmem>>, vector<1x1x10x128xbf16>,
    %c0_4 = arith.constant 0 : index
    %c9 = arith.constant 9 : index
    %c0_5 = arith.constant 0 : index
    %c0_6 = arith.constant 0 : index
    %3 = vector.load %arg9[%c0_4, %c9, %c0_5, %c0_6] : memref<1x10x10x128xbf16, #tpu.memory_space<vmem>>, vector<1x1x10x128xbf16>
    tpu.vector_store %arg9[%c0_4, %c9, %c0_5, %c0_6], %0 {strides = array<i32>} : memref<1x10x10x128xbf16, #tpu.memory_space<vmem>>, vector<1x1x10x128xbf16>,
    %c0_7 = arith.constant 0 : index
    %c0_8 = arith.constant 0 : index
    %c0_9 = arith.constant 0 : index
    %c0_10 = arith.constant 0 : index
    %4 = vector.load %arg9[%c0_7, %c0_8, %c0_9, %c0_10] : memref<1x10x10x128xbf16, #tpu.memory_space<vmem>>, vector<1x10x1x128xbf16>
    tpu.vector_store %arg9[%c0_7, %c0_8, %c0_9, %c0_10], %1 {strides = array<i32>} : memref<1x10x10x128xbf16, #tpu.memory_space<vmem>>, vector<1x10x1x128xbf16>,
    %c0_11 = arith.constant 0 : index
    %c0_12 = arith.constant 0 : index
    %c9_13 = arith.constant 9 : index
    %c0_14 = arith.constant 0 : index
    %5 = vector.load %arg9[%c0_11, %c0_12, %c9_13, %c0_14] : memref<1x10x10x128xbf16, #tpu.memory_space<vmem>>, vector<1x10x1x128xbf16>
    tpu.vector_store %arg9[%c0_11, %c0_12, %c9_13, %c0_14], %1 {strides = array<i32>} : memref<1x10x10x128xbf16, #tpu.memory_space<vmem>>, vector<1x10x1x128xbf16>,
    %cst_15 = arith.constant 0.000000e+00 : bf16
    %6 = vector.broadcast %cst_15 : bf16 to vector<1x1x10x128xbf16>
    %cst_16 = arith.constant 0.000000e+00 : bf16
    %7 = vector.broadcast %cst_16 : bf16 to vector<1x10x1x128xbf16>
    %c0_17 = arith.constant 0 : index
    %c0_18 = arith.constant 0 : index
    %c0_19 = arith.constant 0 : index
    %c0_20 = arith.constant 0 : index
    %8 = vector.load %arg10[%c0_17, %c0_18, %c0_19, %c0_20] : memref<1x10x10x128xbf16, #tpu.memory_space<vmem>>, vector<1x1x10x128xbf16>
    tpu.vector_store %arg10[%c0_17, %c0_18, %c0_19, %c0_20], %6 {strides = array<i32>} : memref<1x10x10x128xbf16, #tpu.memory_space<vmem>>, vector<1x1x10x128xbf16>,
    %c0_21 = arith.constant 0 : index
    %c9_22 = arith.constant 9 : index
    %c0_23 = arith.constant 0 : index
    %c0_24 = arith.constant 0 : index
    %9 = vector.load %arg10[%c0_21, %c9_22, %c0_23, %c0_24] : memref<1x10x10x128xbf16, #tpu.memory_space<vmem>>, vector<1x1x10x128xbf16>
    tpu.vector_store %arg10[%c0_21, %c9_22, %c0_23, %c0_24], %6 {strides = array<i32>} : memref<1x10x10x128xbf16, #tpu.memory_space<vmem>>, vector<1x1x10x128xbf16>,
    %c0_25 = arith.constant 0 : index
    %c0_26 = arith.constant 0 : index
    %c0_27 = arith.constant 0 : index
    %c0_28 = arith.constant 0 : index
    %10 = vector.load %arg10[%c0_25, %c0_26, %c0_27, %c0_28] : memref<1x10x10x128xbf16, #tpu.memory_space<vmem>>, vector<1x10x1x128xbf16>
    tpu.vector_store %arg10[%c0_25, %c0_26, %c0_27, %c0_28], %7 {strides = array<i32>} : memref<1x10x10x128xbf16, #tpu.memory_space<vmem>>, vector<1x10x1x128xbf16>,
    %c0_29 = arith.constant 0 : index
    %c0_30 = arith.constant 0 : index
    %c9_31 = arith.constant 9 : index
    %c0_32 = arith.constant 0 : index
    %11 = vector.load %arg10[%c0_29, %c0_30, %c9_31, %c0_32] : memref<1x10x10x128xbf16, #tpu.memory_space<vmem>>, vector<1x10x1x128xbf16>
    tpu.vector_store %arg10[%c0_29, %c0_30, %c9_31, %c0_32], %7 {strides = array<i32>} : memref<1x10x10x128xbf16, #tpu.memory_space<vmem>>, vector<1x10x1x128xbf16>,
    %c0_33 = arith.constant 0 : index
    %c0_34 = arith.constant 0 : index
    %c0_35 = arith.constant 0 : index
    %c0_36 = arith.constant 0 : index
    %c0_37 = arith.constant 0 : index
    %12 = vector.load %arg1[%c0_33, %c0_34, %c0_35, %c0_36, %c0_37] : memref<1x8x2x8x8xf32, #tpu.memory_space<vmem>>, vector<1x8x2x8x8xf32>
    %13 = vector.extract_strided_slice %12 {offsets = [0, 0, 0, 0, 0], sizes = [1, 8, 1, 8, 8], strides = [1, 1, 1, 1, 1]} : vector<1x8x2x8x8xf32> to vector<1x8x1x8x8xf32>
    %14 = vector.shape_cast %13 : vector<1x8x1x8x8xf32> to vector<1x8x8x8xf32>
    %15 = vector.extract_strided_slice %12 {offsets = [0, 0, 1, 0, 0], sizes = [1, 8, 1, 8, 8], strides = [1, 1, 1, 1, 1]} : vector<1x8x2x8x8xf32> to vector<1x8x1x8x8xf32>
    %16 = vector.shape_cast %15 : vector<1x8x1x8x8xf32> to vector<1x8x8x8xf32>
    %17 = arith.maximumf %14, %16 : vector<1x8x8x8xf32>
    %18 = vector.extract_strided_slice %17 {offsets = [0, 0, 0, 0], sizes = [1, 8, 8, 4], strides = [1, 1, 1, 1]} : vector<1x8x8x8xf32> to vector<1x8x8x4xf32>
    %19 = vector.extract_strided_slice %17 {offsets = [0, 0, 0, 4], sizes = [1, 8, 8, 4], strides = [1, 1, 1, 1]} : vector<1x8x8x8xf32> to vector<1x8x8x4xf32>
    %20 = arith.maximumf %18, %19 : vector<1x8x8x4xf32>
    %21 = arith.truncf %20 : vector<1x8x8x4xf32> to vector<1x8x8x4xbf16>
    %cst_38 = arith.constant 0.000000e+00 : bf16
    %22 = vector.broadcast %cst_38 : bf16 to vector<1x8x8x124xbf16>
    %23 = tpu.concatenate %21, %22 in 3 : vector<1x8x8x4xbf16>, vector<1x8x8x124xbf16> -> vector<1x8x8x128xbf16>
    %c0_39 = arith.constant 0 : index
    %c1 = arith.constant 1 : index
    %c1_40 = arith.constant 1 : index
    %c0_41 = arith.constant 0 : index
    %24 = vector.load %arg9[%c0_39, %c1, %c1_40, %c0_41] : memref<1x10x10x128xbf16, #tpu.memory_space<vmem>>, vector<1x8x8x128xbf16>
    tpu.vector_store %arg9[%c0_39, %c1, %c1_40, %c0_41], %23 {strides = array<i32>} : memref<1x10x10x128xbf16, #tpu.memory_space<vmem>>, vector<1x8x8x128xbf16>,
    %cst_42 = arith.constant 0.000000e+00 : f32
    %25 = vector.broadcast %cst_42 : f32 to vector<64x128xf32>
    %c0_43 = arith.constant 0 : index
    %c0_44 = arith.constant 0 : index
    %c0_45 = arith.constant 0 : index
    %c0_46 = arith.constant 0 : index
    %26 = vector.load %arg9[%c0_43, %c0_44, %c0_45, %c0_46] : memref<1x10x10x128xbf16, #tpu.memory_space<vmem>>, vector<1x8x8x128xbf16>
    %27 = vector.shape_cast %26 : vector<1x8x8x128xbf16> to vector<64x128xbf16>
    %c0_47 = arith.constant 0 : index
    %c0_48 = arith.constant 0 : index
    %28 = vector.load %arg2[%c0_47, %c0_48] : memref<1152x128xbf16, #tpu.memory_space<vmem>>, vector<128x128xbf16>
    %cst_49 = arith.constant dense<0.000000e+00> : vector<64x128xf32>
    %29 = tpu.matmul %27, %28, %cst_49 {dimension_numbers = #tpu.dot_dimension_numbers<[1], [0], [0], [1], [0, 0, 1, 1], [], []>} : vector<64x128xbf16>, vector<128x128xbf16>, vector<64x128xf32> -> vector<64x128xf32>
    %30 = arith.addf %25, %29 : vector<64x128xf32>
    %c0_50 = arith.constant 0 : index
    %c0_51 = arith.constant 0 : index
    %c1_52 = arith.constant 1 : index
    %c0_53 = arith.constant 0 : index
    %31 = vector.load %arg9[%c0_50, %c0_51, %c1_52, %c0_53] : memref<1x10x10x128xbf16, #tpu.memory_space<vmem>>, vector<1x8x8x128xbf16>
    %32 = vector.shape_cast %31 : vector<1x8x8x128xbf16> to vector<64x128xbf16>
    %c128 = arith.constant 128 : index
    %c0_54 = arith.constant 0 : index
    %33 = vector.load %arg2[%c128, %c0_54] : memref<1152x128xbf16, #tpu.memory_space<vmem>>, vector<128x128xbf16>
    %cst_55 = arith.constant dense<0.000000e+00> : vector<64x128xf32>
    %34 = tpu.matmul %32, %33, %cst_55 {dimension_numbers = #tpu.dot_dimension_numbers<[1], [0], [0], [1], [0, 0, 1, 1], [], []>} : vector<64x128xbf16>, vector<128x128xbf16>, vector<64x128xf32> -> vector<64x128xf32>
    %35 = arith.addf %30, %34 : vector<64x128xf32>
    %c0_56 = arith.constant 0 : index
    %c0_57 = arith.constant 0 : index
    %c2 = arith.constant 2 : index
    %c0_58 = arith.constant 0 : index
    %36 = vector.load %arg9[%c0_56, %c0_57, %c2, %c0_58] : memref<1x10x10x128xbf16, #tpu.memory_space<vmem>>, vector<1x8x8x128xbf16>
    %37 = vector.shape_cast %36 : vector<1x8x8x128xbf16> to vector<64x128xbf16>
    %c256 = arith.constant 256 : index
    %c0_59 = arith.constant 0 : index
    %38 = vector.load %arg2[%c256, %c0_59] : memref<1152x128xbf16, #tpu.memory_space<vmem>>, vector<128x128xbf16>
    %cst_60 = arith.constant dense<0.000000e+00> : vector<64x128xf32>
    %39 = tpu.matmul %37, %38, %cst_60 {dimension_numbers = #tpu.dot_dimension_numbers<[1], [0], [0], [1], [0, 0, 1, 1], [], []>} : vector<64x128xbf16>, vector<128x128xbf16>, vector<64x128xf32> -> vector<64x128xf32>
    %40 = arith.addf %35, %39 : vector<64x128xf32>
    %c0_61 = arith.constant 0 : index
    %c1_62 = arith.constant 1 : index
    %c0_63 = arith.constant 0 : index
    %c0_64 = arith.constant 0 : index
    %41 = vector.load %arg9[%c0_61, %c1_62, %c0_63, %c0_64] : memref<1x10x10x128xbf16, #tpu.memory_space<vmem>>, vector<1x8x8x128xbf16>
    %42 = vector.shape_cast %41 : vector<1x8x8x128xbf16> to vector<64x128xbf16>
    %c384 = arith.constant 384 : index
    %c0_65 = arith.constant 0 : index
    %43 = vector.load %arg2[%c384, %c0_65] : memref<1152x128xbf16, #tpu.memory_space<vmem>>, vector<128x128xbf16>
    %cst_66 = arith.constant dense<0.000000e+00> : vector<64x128xf32>
    %44 = tpu.matmul %42, %43, %cst_66 {dimension_numbers = #tpu.dot_dimension_numbers<[1], [0], [0], [1], [0, 0, 1, 1], [], []>} : vector<64x128xbf16>, vector<128x128xbf16>, vector<64x128xf32> -> vector<64x128xf32>
    %45 = arith.addf %40, %44 : vector<64x128xf32>
    %c0_67 = arith.constant 0 : index
    %c1_68 = arith.constant 1 : index
    %c1_69 = arith.constant 1 : index
    %c0_70 = arith.constant 0 : index
    %46 = vector.load %arg9[%c0_67, %c1_68, %c1_69, %c0_70] : memref<1x10x10x128xbf16, #tpu.memory_space<vmem>>, vector<1x8x8x128xbf16>
    %47 = vector.shape_cast %46 : vector<1x8x8x128xbf16> to vector<64x128xbf16>
    %c512 = arith.constant 512 : index
    %c0_71 = arith.constant 0 : index
    %48 = vector.load %arg2[%c512, %c0_71] : memref<1152x128xbf16, #tpu.memory_space<vmem>>, vector<128x128xbf16>
    %cst_72 = arith.constant dense<0.000000e+00> : vector<64x128xf32>
    %49 = tpu.matmul %47, %48, %cst_72 {dimension_numbers = #tpu.dot_dimension_numbers<[1], [0], [0], [1], [0, 0, 1, 1], [], []>} : vector<64x128xbf16>, vector<128x128xbf16>, vector<64x128xf32> -> vector<64x128xf32>
    %50 = arith.addf %45, %49 : vector<64x128xf32>
    %c0_73 = arith.constant 0 : index
    %c1_74 = arith.constant 1 : index
    %c2_75 = arith.constant 2 : index
    %c0_76 = arith.constant 0 : index
    %51 = vector.load %arg9[%c0_73, %c1_74, %c2_75, %c0_76] : memref<1x10x10x128xbf16, #tpu.memory_space<vmem>>, vector<1x8x8x128xbf16>
    %52 = vector.shape_cast %51 : vector<1x8x8x128xbf16> to vector<64x128xbf16>
    %c640 = arith.constant 640 : index
    %c0_77 = arith.constant 0 : index
    %53 = vector.load %arg2[%c640, %c0_77] : memref<1152x128xbf16, #tpu.memory_space<vmem>>, vector<128x128xbf16>
    %cst_78 = arith.constant dense<0.000000e+00> : vector<64x128xf32>
    %54 = tpu.matmul %52, %53, %cst_78 {dimension_numbers = #tpu.dot_dimension_numbers<[1], [0], [0], [1], [0, 0, 1, 1], [], []>} : vector<64x128xbf16>, vector<128x128xbf16>, vector<64x128xf32> -> vector<64x128xf32>
    %55 = arith.addf %50, %54 : vector<64x128xf32>
    %c0_79 = arith.constant 0 : index
    %c2_80 = arith.constant 2 : index
    %c0_81 = arith.constant 0 : index
    %c0_82 = arith.constant 0 : index
    %56 = vector.load %arg9[%c0_79, %c2_80, %c0_81, %c0_82] : memref<1x10x10x128xbf16, #tpu.memory_space<vmem>>, vector<1x8x8x128xbf16>
    %57 = vector.shape_cast %56 : vector<1x8x8x128xbf16> to vector<64x128xbf16>
    %c768 = arith.constant 768 : index
    %c0_83 = arith.constant 0 : index
    %58 = vector.load %arg2[%c768, %c0_83] : memref<1152x128xbf16, #tpu.memory_space<vmem>>, vector<128x128xbf16>
    %cst_84 = arith.constant dense<0.000000e+00> : vector<64x128xf32>
    %59 = tpu.matmul %57, %58, %cst_84 {dimension_numbers = #tpu.dot_dimension_numbers<[1], [0], [0], [1], [0, 0, 1, 1], [], []>} : vector<64x128xbf16>, vector<128x128xbf16>, vector<64x128xf32> -> vector<64x128xf32>
    %60 = arith.addf %55, %59 : vector<64x128xf32>
    %c0_85 = arith.constant 0 : index
    %c2_86 = arith.constant 2 : index
    %c1_87 = arith.constant 1 : index
    %c0_88 = arith.constant 0 : index
    %61 = vector.load %arg9[%c0_85, %c2_86, %c1_87, %c0_88] : memref<1x10x10x128xbf16, #tpu.memory_space<vmem>>, vector<1x8x8x128xbf16>
    %62 = vector.shape_cast %61 : vector<1x8x8x128xbf16> to vector<64x128xbf16>
    %c896 = arith.constant 896 : index
    %c0_89 = arith.constant 0 : index
    %63 = vector.load %arg2[%c896, %c0_89] : memref<1152x128xbf16, #tpu.memory_space<vmem>>, vector<128x128xbf16>
    %cst_90 = arith.constant dense<0.000000e+00> : vector<64x128xf32>
    %64 = tpu.matmul %62, %63, %cst_90 {dimension_numbers = #tpu.dot_dimension_numbers<[1], [0], [0], [1], [0, 0, 1, 1], [], []>} : vector<64x128xbf16>, vector<128x128xbf16>, vector<64x128xf32> -> vector<64x128xf32>
    %65 = arith.addf %60, %64 : vector<64x128xf32>
    %c0_91 = arith.constant 0 : index
    %c2_92 = arith.constant 2 : index
    %c2_93 = arith.constant 2 : index
    %c0_94 = arith.constant 0 : index
    %66 = vector.load %arg9[%c0_91, %c2_92, %c2_93, %c0_94] : memref<1x10x10x128xbf16, #tpu.memory_space<vmem>>, vector<1x8x8x128xbf16>
    %67 = vector.shape_cast %66 : vector<1x8x8x128xbf16> to vector<64x128xbf16>
    %c1024 = arith.constant 1024 : index
    %c0_95 = arith.constant 0 : index
    %68 = vector.load %arg2[%c1024, %c0_95] : memref<1152x128xbf16, #tpu.memory_space<vmem>>, vector<128x128xbf16>
    %cst_96 = arith.constant dense<0.000000e+00> : vector<64x128xf32>
    %69 = tpu.matmul %67, %68, %cst_96 {dimension_numbers = #tpu.dot_dimension_numbers<[1], [0], [0], [1], [0, 0, 1, 1], [], []>} : vector<64x128xbf16>, vector<128x128xbf16>, vector<64x128xf32> -> vector<64x128xf32>
    %70 = arith.addf %65, %69 : vector<64x128xf32>
    %c0_97 = arith.constant 0 : index
    %c0_98 = arith.constant 0 : index
    %71 = vector.load %arg3[%c0_97, %c0_98] : memref<1x128xf32, #tpu.memory_space<vmem>>, vector<1x128xf32>
    %72 = vector.broadcast %71 : vector<1x128xf32> to vector<64x128xf32>
    %73 = arith.mulf %70, %72 : vector<64x128xf32>
    %c0_99 = arith.constant 0 : index
    %c0_100 = arith.constant 0 : index
    %74 = vector.load %arg4[%c0_99, %c0_100] : memref<1x128xf32, #tpu.memory_space<vmem>>, vector<1x128xf32>
    %75 = vector.broadcast %74 : vector<1x128xf32> to vector<64x128xf32>
    %76 = arith.addf %73, %75 : vector<64x128xf32>
    %cst_101 = arith.constant 0.000000e+00 : f32
    %77 = vector.broadcast %cst_101 : f32 to vector<64x128xf32>
    %78 = arith.maximumf %76, %77 : vector<64x128xf32>
    %79 = vector.shape_cast %78 : vector<64x128xf32> to vector<1x8x8x128xf32>
    %80 = arith.truncf %79 : vector<1x8x8x128xf32> to vector<1x8x8x128xbf16>
    %c0_102 = arith.constant 0 : index
    %c1_103 = arith.constant 1 : index
    %c1_104 = arith.constant 1 : index
    %c0_105 = arith.constant 0 : index
    %81 = vector.load %arg10[%c0_102, %c1_103, %c1_104, %c0_105] : memref<1x10x10x128xbf16, #tpu.memory_space<vmem>>, vector<1x8x8x128xbf16>
    tpu.vector_store %arg10[%c0_102, %c1_103, %c1_104, %c0_105], %80 {strides = array<i32>} : memref<1x10x10x128xbf16, #tpu.memory_space<vmem>>, vector<1x8x8x128xbf16>,
    %cst_106 = arith.constant 0.000000e+00 : f32
    %82 = vector.broadcast %cst_106 : f32 to vector<64x128xf32>
    %c0_107 = arith.constant 0 : index
    %c0_108 = arith.constant 0 : index
    %c0_109 = arith.constant 0 : index
    %c0_110 = arith.constant 0 : index
    %83 = vector.load %arg10[%c0_107, %c0_108, %c0_109, %c0_110] : memref<1x10x10x128xbf16, #tpu.memory_space<vmem>>, vector<1x8x8x128xbf16>
    %84 = vector.shape_cast %83 : vector<1x8x8x128xbf16> to vector<64x128xbf16>
    %c0_111 = arith.constant 0 : index
    %c0_112 = arith.constant 0 : index
    %85 = vector.load %arg5[%c0_111, %c0_112] : memref<1152x128xbf16, #tpu.memory_space<vmem>>, vector<128x128xbf16>
    %cst_113 = arith.constant dense<0.000000e+00> : vector<64x128xf32>
    %86 = tpu.matmul %84, %85, %cst_113 {dimension_numbers = #tpu.dot_dimension_numbers<[1], [0], [0], [1], [0, 0, 1, 1], [], []>} : vector<64x128xbf16>, vector<128x128xbf16>, vector<64x128xf32> -> vector<64x128xf32>
    %87 = arith.addf %82, %86 : vector<64x128xf32>
    %c0_114 = arith.constant 0 : index
    %c0_115 = arith.constant 0 : index
    %c1_116 = arith.constant 1 : index
    %c0_117 = arith.constant 0 : index
    %88 = vector.load %arg10[%c0_114, %c0_115, %c1_116, %c0_117] : memref<1x10x10x128xbf16, #tpu.memory_space<vmem>>, vector<1x8x8x128xbf16>
    %89 = vector.shape_cast %88 : vector<1x8x8x128xbf16> to vector<64x128xbf16>
    %c128_118 = arith.constant 128 : index
    %c0_119 = arith.constant 0 : index
    %90 = vector.load %arg5[%c128_118, %c0_119] : memref<1152x128xbf16, #tpu.memory_space<vmem>>, vector<128x128xbf16>
    %cst_120 = arith.constant dense<0.000000e+00> : vector<64x128xf32>
    %91 = tpu.matmul %89, %90, %cst_120 {dimension_numbers = #tpu.dot_dimension_numbers<[1], [0], [0], [1], [0, 0, 1, 1], [], []>} : vector<64x128xbf16>, vector<128x128xbf16>, vector<64x128xf32> -> vector<64x128xf32>
    %92 = arith.addf %87, %91 : vector<64x128xf32>
    %c0_121 = arith.constant 0 : index
    %c0_122 = arith.constant 0 : index
    %c2_123 = arith.constant 2 : index
    %c0_124 = arith.constant 0 : index
    %93 = vector.load %arg10[%c0_121, %c0_122, %c2_123, %c0_124] : memref<1x10x10x128xbf16, #tpu.memory_space<vmem>>, vector<1x8x8x128xbf16>
    %94 = vector.shape_cast %93 : vector<1x8x8x128xbf16> to vector<64x128xbf16>
    %c256_125 = arith.constant 256 : index
    %c0_126 = arith.constant 0 : index
    %95 = vector.load %arg5[%c256_125, %c0_126] : memref<1152x128xbf16, #tpu.memory_space<vmem>>, vector<128x128xbf16>
    %cst_127 = arith.constant dense<0.000000e+00> : vector<64x128xf32>
    %96 = tpu.matmul %94, %95, %cst_127 {dimension_numbers = #tpu.dot_dimension_numbers<[1], [0], [0], [1], [0, 0, 1, 1], [], []>} : vector<64x128xbf16>, vector<128x128xbf16>, vector<64x128xf32> -> vector<64x128xf32>
    %97 = arith.addf %92, %96 : vector<64x128xf32>
    %c0_128 = arith.constant 0 : index
    %c1_129 = arith.constant 1 : index
    %c0_130 = arith.constant 0 : index
    %c0_131 = arith.constant 0 : index
    %98 = vector.load %arg10[%c0_128, %c1_129, %c0_130, %c0_131] : memref<1x10x10x128xbf16, #tpu.memory_space<vmem>>, vector<1x8x8x128xbf16>
    %99 = vector.shape_cast %98 : vector<1x8x8x128xbf16> to vector<64x128xbf16>
    %c384_132 = arith.constant 384 : index
    %c0_133 = arith.constant 0 : index
    %100 = vector.load %arg5[%c384_132, %c0_133] : memref<1152x128xbf16, #tpu.memory_space<vmem>>, vector<128x128xbf16>
    %cst_134 = arith.constant dense<0.000000e+00> : vector<64x128xf32>
    %101 = tpu.matmul %99, %100, %cst_134 {dimension_numbers = #tpu.dot_dimension_numbers<[1], [0], [0], [1], [0, 0, 1, 1], [], []>} : vector<64x128xbf16>, vector<128x128xbf16>, vector<64x128xf32> -> vector<64x128xf32>
    %102 = arith.addf %97, %101 : vector<64x128xf32>
    %c0_135 = arith.constant 0 : index
    %c1_136 = arith.constant 1 : index
    %c1_137 = arith.constant 1 : index
    %c0_138 = arith.constant 0 : index
    %103 = vector.load %arg10[%c0_135, %c1_136, %c1_137, %c0_138] : memref<1x10x10x128xbf16, #tpu.memory_space<vmem>>, vector<1x8x8x128xbf16>
    %104 = vector.shape_cast %103 : vector<1x8x8x128xbf16> to vector<64x128xbf16>
    %c512_139 = arith.constant 512 : index
    %c0_140 = arith.constant 0 : index
    %105 = vector.load %arg5[%c512_139, %c0_140] : memref<1152x128xbf16, #tpu.memory_space<vmem>>, vector<128x128xbf16>
    %cst_141 = arith.constant dense<0.000000e+00> : vector<64x128xf32>
    %106 = tpu.matmul %104, %105, %cst_141 {dimension_numbers = #tpu.dot_dimension_numbers<[1], [0], [0], [1], [0, 0, 1, 1], [], []>} : vector<64x128xbf16>, vector<128x128xbf16>, vector<64x128xf32> -> vector<64x128xf32>
    %107 = arith.addf %102, %106 : vector<64x128xf32>
    %c0_142 = arith.constant 0 : index
    %c1_143 = arith.constant 1 : index
    %c2_144 = arith.constant 2 : index
    %c0_145 = arith.constant 0 : index
    %108 = vector.load %arg10[%c0_142, %c1_143, %c2_144, %c0_145] : memref<1x10x10x128xbf16, #tpu.memory_space<vmem>>, vector<1x8x8x128xbf16>
    %109 = vector.shape_cast %108 : vector<1x8x8x128xbf16> to vector<64x128xbf16>
    %c640_146 = arith.constant 640 : index
    %c0_147 = arith.constant 0 : index
    %110 = vector.load %arg5[%c640_146, %c0_147] : memref<1152x128xbf16, #tpu.memory_space<vmem>>, vector<128x128xbf16>
    %cst_148 = arith.constant dense<0.000000e+00> : vector<64x128xf32>
    %111 = tpu.matmul %109, %110, %cst_148 {dimension_numbers = #tpu.dot_dimension_numbers<[1], [0], [0], [1], [0, 0, 1, 1], [], []>} : vector<64x128xbf16>, vector<128x128xbf16>, vector<64x128xf32> -> vector<64x128xf32>
    %112 = arith.addf %107, %111 : vector<64x128xf32>
    %c0_149 = arith.constant 0 : index
    %c2_150 = arith.constant 2 : index
    %c0_151 = arith.constant 0 : index
    %c0_152 = arith.constant 0 : index
    %113 = vector.load %arg10[%c0_149, %c2_150, %c0_151, %c0_152] : memref<1x10x10x128xbf16, #tpu.memory_space<vmem>>, vector<1x8x8x128xbf16>
    %114 = vector.shape_cast %113 : vector<1x8x8x128xbf16> to vector<64x128xbf16>
    %c768_153 = arith.constant 768 : index
    %c0_154 = arith.constant 0 : index
    %115 = vector.load %arg5[%c768_153, %c0_154] : memref<1152x128xbf16, #tpu.memory_space<vmem>>, vector<128x128xbf16>
    %cst_155 = arith.constant dense<0.000000e+00> : vector<64x128xf32>
    %116 = tpu.matmul %114, %115, %cst_155 {dimension_numbers = #tpu.dot_dimension_numbers<[1], [0], [0], [1], [0, 0, 1, 1], [], []>} : vector<64x128xbf16>, vector<128x128xbf16>, vector<64x128xf32> -> vector<64x128xf32>
    %117 = arith.addf %112, %116 : vector<64x128xf32>
    %c0_156 = arith.constant 0 : index
    %c2_157 = arith.constant 2 : index
    %c1_158 = arith.constant 1 : index
    %c0_159 = arith.constant 0 : index
    %118 = vector.load %arg10[%c0_156, %c2_157, %c1_158, %c0_159] : memref<1x10x10x128xbf16, #tpu.memory_space<vmem>>, vector<1x8x8x128xbf16>
    %119 = vector.shape_cast %118 : vector<1x8x8x128xbf16> to vector<64x128xbf16>
    %c896_160 = arith.constant 896 : index
    %c0_161 = arith.constant 0 : index
    %120 = vector.load %arg5[%c896_160, %c0_161] : memref<1152x128xbf16, #tpu.memory_space<vmem>>, vector<128x128xbf16>
    %cst_162 = arith.constant dense<0.000000e+00> : vector<64x128xf32>
    %121 = tpu.matmul %119, %120, %cst_162 {dimension_numbers = #tpu.dot_dimension_numbers<[1], [0], [0], [1], [0, 0, 1, 1], [], []>} : vector<64x128xbf16>, vector<128x128xbf16>, vector<64x128xf32> -> vector<64x128xf32>
    %122 = arith.addf %117, %121 : vector<64x128xf32>
    %c0_163 = arith.constant 0 : index
    %c2_164 = arith.constant 2 : index
    %c2_165 = arith.constant 2 : index
    %c0_166 = arith.constant 0 : index
    %123 = vector.load %arg10[%c0_163, %c2_164, %c2_165, %c0_166] : memref<1x10x10x128xbf16, #tpu.memory_space<vmem>>, vector<1x8x8x128xbf16>
    %124 = vector.shape_cast %123 : vector<1x8x8x128xbf16> to vector<64x128xbf16>
    %c1024_167 = arith.constant 1024 : index
    %c0_168 = arith.constant 0 : index
    %125 = vector.load %arg5[%c1024_167, %c0_168] : memref<1152x128xbf16, #tpu.memory_space<vmem>>, vector<128x128xbf16>
    %cst_169 = arith.constant dense<0.000000e+00> : vector<64x128xf32>
    %126 = tpu.matmul %124, %125, %cst_169 {dimension_numbers = #tpu.dot_dimension_numbers<[1], [0], [0], [1], [0, 0, 1, 1], [], []>} : vector<64x128xbf16>, vector<128x128xbf16>, vector<64x128xf32> -> vector<64x128xf32>
    %127 = arith.addf %122, %126 : vector<64x128xf32>
    %c0_170 = arith.constant 0 : index
    %c0_171 = arith.constant 0 : index
    %128 = vector.load %arg6[%c0_170, %c0_171] : memref<1x128xf32, #tpu.memory_space<vmem>>, vector<1x128xf32>
    %129 = vector.broadcast %128 : vector<1x128xf32> to vector<64x128xf32>
    %130 = arith.mulf %127, %129 : vector<64x128xf32>
    %c0_172 = arith.constant 0 : index
    %c0_173 = arith.constant 0 : index
    %131 = vector.load %arg7[%c0_172, %c0_173] : memref<1x128xf32, #tpu.memory_space<vmem>>, vector<1x128xf32>
    %132 = vector.broadcast %131 : vector<1x128xf32> to vector<64x128xf32>
    %133 = arith.addf %130, %132 : vector<64x128xf32>
    %cst_174 = arith.constant 0.000000e+00 : f32
    %134 = vector.broadcast %cst_174 : f32 to vector<64x128xf32>
    %135 = arith.maximumf %133, %134 : vector<64x128xf32>
    %c0_175 = arith.constant 0 : index
    %c0_176 = arith.constant 0 : index
    %136 = vector.load %arg8[%c0_175, %c0_176] : memref<64x128xf32, #tpu.memory_space<vmem>>, vector<64x128xf32>
    tpu.vector_store %arg8[%c0_175, %c0_176], %135 {strides = array<i32>} : memref<64x128xf32, #tpu.memory_space<vmem>>, vector<64x128xf32>,
    return
  }
  func.func @transform_0(%arg0: i32) -> (i32, i32, i32, i32, i32) {
    %c0_i32 = arith.constant 0 : i32
    %c0_i32_0 = arith.constant 0 : i32
    %c0_i32_1 = arith.constant 0 : i32
    %c0_i32_2 = arith.constant 0 : i32
    %c0_i32_3 = arith.constant 0 : i32
    return %arg0, %c0_i32, %c0_i32_0, %c0_i32_1, %c0_i32_2 : i32, i32, i32, i32, i32
  }
  func.func @transform_1(%arg0: i32) -> (i32, i32) {
    %c0_i32 = arith.constant 0 : i32
    %c0_i32_0 = arith.constant 0 : i32
    %c0_i32_1 = arith.constant 0 : i32
    return %c0_i32, %c0_i32_0 : i32, i32
  }
  func.func @transform_2(%arg0: i32) -> (i32, i32) {
    %c0_i32 = arith.constant 0 : i32
    %c0_i32_0 = arith.constant 0 : i32
    %c0_i32_1 = arith.constant 0 : i32
    return %c0_i32, %c0_i32_0 : i32, i32
  }
  func.func @transform_3(%arg0: i32) -> (i32, i32) {
    %c0_i32 = arith.constant 0 : i32
    %c0_i32_0 = arith.constant 0 : i32
    %c0_i32_1 = arith.constant 0 : i32
    return %c0_i32, %c0_i32_0 : i32, i32
  }
  func.func @transform_4(%arg0: i32) -> (i32, i32) {
    %c0_i32 = arith.constant 0 : i32
    %c0_i32_0 = arith.constant 0 : i32
    %c0_i32_1 = arith.constant 0 : i32
    return %c0_i32, %c0_i32_0 : i32, i32
  }
  func.func @transform_5(%arg0: i32) -> (i32, i32) {
    %c0_i32 = arith.constant 0 : i32
    %c0_i32_0 = arith.constant 0 : i32
    %c0_i32_1 = arith.constant 0 : i32
    return %c0_i32, %c0_i32_0 : i32, i32
  }
  func.func @transform_6(%arg0: i32) -> (i32, i32) {
    %c0_i32 = arith.constant 0 : i32
    %c0_i32_0 = arith.constant 0 : i32
    %c0_i32_1 = arith.constant 0 : i32
    return %c0_i32, %c0_i32_0 : i32, i32
  }
  func.func @transform_7(%arg0: i32) -> (i32, i32) {
    %c0_i32 = arith.constant 0 : i32
    %c0_i32_0 = arith.constant 0 : i32
    return %arg0, %c0_i32 : i32, i32
  }
}

</mosaic_0001>

<bundles_post_ra>
// kernel: tpu_custom_call.1
= control target key start
LH: loop header
LB: loop body
LE: loop exit
PB: predicated region body
PF: predicated region fallthrough
CT: control target
= control target key end

     0   :  { %12 = vsyncpa [#allocation5], 0  ;;  %s7562_s0 = inlined_call_operand.hbm [shape: f32[2,8,2,8,8], index: 0, kind: input, shape index: {}]   ;;  %s7563_s1 = inlined_call_operand.hbm [shape: bf16[1152,128], index: 1, kind: input, shape index: {}]   ;;  %s7564_s2 = inlined_call_operand.vmem [shape: f32[1,128], index: 2, kind: input, shape index: {}]   ;;  %s7565_s3 = inlined_call_operand.vmem [shape: f32[1,128], index: 3, kind: input, shape index: {}]   ;;  %s7566_s4 = inlined_call_operand.hbm [shape: bf16[1152,128], index: 4, kind: input, shape index: {}]   ;;  %s7567_s5 = inlined_call_operand.vmem [shape: f32[1,128], index: 5, kind: input, shape index: {}]   ;;  %s7568_s6 = inlined_call_operand.vmem [shape: f32[1,128], index: 6, kind: input, shape index: {}]   ;;  %s7569_s7 = inlined_call_operand.hbm [shape: f32[128,128], index: 7, kind: output, shape index: {}]  }
   0x1   :  { %14 = vsyncpa [#allocation5 + $0x1], 0 }
   0x2   :  { %15 = vsyncpa [#allocation8], 0 }
   0x3   :  { %16 = vsyncpa [#allocation6], 0 }
   0x4   :  { %18 = vsyncpa [#allocation6 + $0x1], 0  ;;  %s6529_s24 = smov 0   ;;  %s6531_s25 = smov 0  }
   0x5   :  { %s6533_s26 = smov 0   ;;  %s6535_s27 = smov 0  }
   0x6 LB: > { %s6550_s28 = sadd.s32 4294967295, %s6475_s27   ;;  %s4973_s29 = sadd.s32 4294967294, %s6475_s27   ;;  %s6475_s27 = sphi %s6535_s27, %s7599_s27   ;;  %s6471_s26 = sphi %s6533_s26, %s7598_s26   ;;  %s6467_s25 = sphi %s6531_s25, %s7597_s25   ;;  %s6463_s24 = sphi %s6529_s24, %s7596_s24  }
   0x7   : > { %p44_p0 = scmp.ne.s32.totalorder %s6467_s25, %s6463_s24  ;;  %p7570_p1 = scmp.eq.s32.totalorder %s6550_s28, 0 }
   0x8   : > { %p200_p3 = scmp.eq.s32.totalorder %s4973_s29, 1  ;;  %p4974_p5 = scmp.ge.s32.totalorder %s6475_s27, 1 }
   0x9   : > { %p6559_p4 = por %p7570_p1, %p44_p0  ;;  %p207_p7 = scmp.lt.s32.totalorder %s6475_s27, 3 }
   0xa   : > { %p6564_p6 = por %p200_p3, %p44_p0  ;;  %s6477_s10 = smov [#allocation7]  }
   0xb   : > { %s7573_s30 = scalar_select %p6559_p4, 1, 0 }
   0xc   : > { %s7574_s8 = scalar_select %p6564_p6, 1, 0 }
   0xd   : > { %p6569_p8 = pnand %p4974_p5, %p207_p7  ;;  %s219_s11 = sshll.u32 %s6477_s10, 4  ;;  %s6573_s11 = int_to_ptr.vmem [resolvable:$true] %s219_s11 }
   0xe   : > { %s6478_s13 = smov [#allocation9]   ;;  %s6319_s17 = scalar_lea.hbm %s7563_s1, 9216 }
   0xf   : > { %p6073_p9 = pneg %p6569_p8  ;;  %s238_s14 = sshll.u32 %s6478_s13, 4  ;;  %s6584_s14 = int_to_ptr.vmem [resolvable:$true] %s238_s14 }
  0x10   : > { %p6320_p12 = scmp.ne.s32.totalorder %s7563_s1, %s6319_s17  ;;  %p6326_p5 = scmp.lt.u32.totalorder %s6319_s17, %s7563_s1 }
  0x11   : > { %p6580_p11 = pnand %p6073_p9, %p7570_p1 }
  0x13   : > { %p6321_p13 = pneg %p6580_p11 }
  0x15   : > { %p6322_p0 = pnand %p6321_p13, %p6320_p12 }
  0x17   : > { %p6323_p3 = pneg %p6322_p0 }
  0x19   : > { %p6328_p7 = pnand %p6326_p5, %p6323_p3 }
  0x1b   : > { %6331 = shalt.err (!%p6328_p7)
}
  0x1c   : > { %s6332_s22 = scalar_lea.vmem %s6573_s11, 9216  ;;  %p6340_p2 = scmp.lt.s32.totalorder %s6573_s11, %s6573_s11 }
  0x1d   : > { %p6333_p9 = scmp.ne.s32.totalorder %s6573_s11, %s6332_s22  ;;  %p6341_p12 = scmp.lt.s32.totalorder %s6332_s22, %s6332_s22 }
  0x1f   : > { %p6335_p10 = pnand %p6333_p9, %p6321_p13  ;;  %p6342_p0 = por %p6341_p12, %p6340_p2 }
  0x21   : > { %p6336_p1 = pneg %p6335_p10 }
  0x23   : > { %p6343_p6 = pnand %p6342_p0, %p6336_p1 }
  0x25   : > { %6346 = shalt.err (!%p6343_p6)
}
  0x26   : > { %s6479_s23 = smov 64   ;;  %s6480_s29 = smov 4  }
  0x27   : > { %6076 = dma.hbm_to_vmem [thread:$0]  (!%p6580_p11), %s7563_s1, 9216, %s6573_s11, [#allocation8], %s6479_s23, %s6479_s23, %s6480_s29  }
  0x28   : > { %s6347_s17 = scalar_lea.hbm %s7566_s4, 9216 }
  0x29   : > { %p6348_p2 = scmp.ne.s32.totalorder %s7566_s4, %s6347_s17  ;;  %p6354_p10 = scmp.lt.u32.totalorder %s6347_s17, %s7566_s4 }
  0x2b   : > { %p6350_p1 = pnand %p6348_p2, %p6321_p13 }
  0x2d   : > { %p6351_p6 = pneg %p6350_p1 }
  0x2f   : > { %p6356_p3 = pnand %p6354_p10, %p6351_p6 }
  0x31   : > { %6359 = shalt.err (!%p6356_p3)
}
  0x32   : > { %s6360_s11 = scalar_lea.vmem %s6584_s14, 9216  ;;  %p6368_p12 = scmp.lt.s32.totalorder %s6584_s14, %s6584_s14 }
  0x33   : > { %p6361_p5 = scmp.ne.s32.totalorder %s6584_s14, %s6360_s11  ;;  %p6369_p0 = scmp.lt.s32.totalorder %s6360_s11, %s6360_s11 }
  0x35   : > { %p6363_p7 = pnand %p6361_p5, %p6321_p13  ;;  %p6370_p2 = por %p6369_p0, %p6368_p12 }
  0x37   : > { %p6364_p9 = pneg %p6363_p7 }
  0x39   : > { %p6371_p1 = pnand %p6370_p2, %p6364_p9 }
  0x3b   : > { %6374 = shalt.err (!%p6371_p1)
}
  0x3c   : > { %6079 = dma.hbm_to_vmem [thread:$0]  (!%p6580_p11), %s7566_s4, 9216, %s6584_s14, [#allocation8], %s6479_s23, %s6479_s23, %s6480_s29  }
  0x3d   : > { %s6639_s13 = sadd.s32 1, %s6475_s27   ;;  %s31_s12 = sadd.s32 1, %s6471_s26 }
  0x3e   : > { %s28_s15 = ssub.s32 %s6475_s27, %s6639_s13  ;;  %p38_p13 = scmp.ne.s32.totalorder %s6471_s26, %s6467_s25 }
  0x3f   : > { %p29_p6 = scmp.eq.s32.totalorder %s28_s15, 0  ;;  %p39_p10 = scmp.eq.s32.totalorder %s6475_s27, 0 }
  0x40   : > { %p7577_p3 = scmp.eq.s32.totalorder %s6550_s28, 1  ;;  %p6090_p7 = scmp.lt.s32.totalorder %s6475_s27, 2 }
  0x41   : > { %s6655_s17 = scalar_select %p29_p6, %s6471_s26, %s31_s12  }
  0x42   : > { %p6649_p5 = por %p7577_p3, %p38_p13  ;;  %p40_p9 = por %p39_p10, %p38_p13 }
  0x43   : > { %s258_s18 = sand.u32 1, %s6471_s26   ;;  %s5275_s14 = sshll.u32 %s6475_s27, 11 }
  0x44   : > { %s7578_s16 = scalar_select %p6649_p5, 1, 0 }
  0x45   : > { %s4978_s19 = sshll.u32 %s258_s18, 7  ;;  %s6662_s20 = scalar_lea.hbm %s7562_s0, %s5275_s14 }
  0x46   : > { %s262_s21 = scalar_lea.vmem [#allocation4], %s4978_s19  ;;  %p6666_p11 = pnand %p6090_p7, %p40_p9 }
  0x47   : > { %s269_s11 = sshll.u32 %s262_s21, 4  ;;  %s6670_s10 = scalar_lea.sflag [#allocation5], %s258_s18  ;;  %s6664_s11 = int_to_ptr.vmem [resolvable:$true] %s269_s11 }
  0x48   : > { %s6375_s12 = scalar_lea.hbm %s6662_s20, 2048  ;;  %p6377_p0 = pneg %p6666_p11 }
  0x49   : > { %p6376_p12 = scmp.ne.s32.totalorder %s6662_s20, %s6375_s12  ;;  %s6380_s14 = scalar_lea.hbm %s7562_s0, 4096 }
  0x4a   : > { %p6381_p13 = scmp.lt.u32.totalorder %s6662_s20, %s7562_s0  ;;  %p6382_p6 = scmp.lt.u32.totalorder %s6380_s14, %s6375_s12 }
  0x4b   : > { %p6378_p2 = pnand %p6377_p0, %p6376_p12  ;;  %p6384_p3 = scmp.lt.u32.totalorder %s6375_s12, %s6662_s20 }
  0x4c   : > { %p6383_p10 = por %p6382_p6, %p6381_p13 }
  0x4d   : > { %p6379_p1 = pneg %p6378_p2 }
  0x4e   : > { %p6385_p7 = por %p6384_p3, %p6383_p10 }
  0x50   : > { %p6386_p9 = pnand %p6385_p7, %p6379_p1 }
  0x52   : > { %6389 = shalt.err (!%p6386_p9)
}
  0x53   : > { %s6390_s18 = scalar_lea.vmem %s6664_s11, 2048  ;;  %s6481_s21 = smov [#allocation4]  }
  0x54   : > { %p6391_p12 = scmp.ne.s32.totalorder %s6664_s11, %s6390_s18  ;;  %s6395_s15 = sshll.u32 %s6481_s21, 4  ;;  %s6396_s15 = int_to_ptr.vmem [resolvable:$false] %s6395_s15 }
  0x55   : > { %s6397_s19 = scalar_lea.vmem %s6396_s15, 4096  ;;  %p6398_p4 = scmp.lt.s32.totalorder %s6664_s11, %s6396_s15 }
  0x56   : > { %p6393_p2 = pnand %p6391_p12, %p6377_p0  ;;  %p6399_p13 = scmp.lt.s32.totalorder %s6397_s19, %s6390_s18 }
  0x58   : > { %p6394_p5 = pneg %p6393_p2  ;;  %p6400_p6 = por %p6399_p13, %p6398_p4 }
  0x5a   : > { %p6401_p10 = pnand %p6400_p6, %p6394_p5 }
  0x5c   : > { %6404 = shalt.err (!%p6401_p10)
}
  0x5d   : > { %s6482_s12 = smov 128   ;;  %s6483_s14 = smov 8  }
  0x5e   : > { %6083 = dma.hbm_to_vmem [thread:$0]  (!%p6666_p11), %s6662_s20, 2048, %s6664_s11, %s6670_s10, %s6482_s12, %s6482_s12, %s6483_s14  }
  0x5f   : > { %281 = sbr.rel (%p6569_p8) target bundleno = 1281 (0x501), region = 48  ;;  %s6701_s23 = sand.u32 (!%p6569_p8), 1, %s6467_s25  }
  0x60   : > { %s4982_s29 = sshll.u32 (!%p6569_p8), %s6701_s23, 7  ;;  %s284_s18 = scalar_lea.sflag (!%p6569_p8), [#allocation5], %s6701_s23 }
  0x61   : > { %s6705_s21 = scalar_lea.vmem (!%p6569_p8), [#allocation4], %s4982_s29  ;;  %p7580_p4 = scmp.ne.s32.totalorder (!%p6569_p8), %s7573_s30, 0 }
  0x66   : > { %6450 = dma.done.wait (%p7580_p4), %s284_s18, 2048  }
  0x67   : > { %6452 = vsyncadd (%p7580_p4), %s284_s18, 4294965248  ;;  %p7581_p5 = scmp.eq.s32.totalorder %s6550_s28, 0 }
  0x69   : > { %6454 = dma.done.wait (%p7581_p5), [#allocation8], 18432   ;;  %p7582_p8 = pmov %p7581_p5 }
  0x6a   : > { %vm333_vm0 = vcmask 1040384   ;;  %vm334_vm1 = vsmask.f32 256  ;;  %v463_v1 = vld [vmem:[%s6705_s21] sm:$0xff]  ;;  %v464_v2 = vld [vmem:[%s6705_s21 + $0x8] sm:$0xff]  ;;  %v465_v3 = vld [vmem:[%s6705_s21 + $0x10] sm:$0xff] }
  0x6b   : > { %6456 = vsyncadd (%p7582_p8), [#allocation8], 4294948864  ;;  %v466_v4 = vld [vmem:[%s6705_s21 + $0x18] sm:$0xff]  ;;  %v6724_v5 = vmax.f32 %v463_v1, %v464_v2  ;;  %v469_v6 = vld [vmem:[%s6705_s21 + $0x30] sm:$0xff]  ;;  %vm366_vm3 = vsmask.f32 7938 }
  0x6c   : > { %vm6716_vm2 = vmand %vm333_vm0, %vm334_vm1  ;;  %v470_v7 = vld [vmem:[%s6705_s21 + $0x38] sm:$0xff]  ;;  %v6728_v8 = vmax.f32 %v465_v3, %v466_v4  ;;  %v471_v9 = vld [vmem:[%s6705_s21 + $0x40] sm:$0xff]  ;;  %s6484_s30 = smov 124   ;;  %v6485_v33 = vmov 0   ;;  %vm535_vm5 = vcmask 31744   ;;  %vm658_vm6 = vcmask 1043456  }
  0x6d   : > { %v472_v10 = vld [vmem:[%s6705_s21 + $0x48] sm:$0xff]  ;;  %v6732_v11 = vmax.f32 %v469_v6, %v470_v7  ;;  %v467_v12 = vld [vmem:[%s6705_s21 + $0x20] sm:$0xff]  ;;  %v473_v15 = vld [vmem:[%s6705_s21 + $0x50] sm:$0xff]  ;;  %328 = vst [vmem:[#allocation2] sm:$0xf] %v6485_v33  ;;  %vm1161_vm11 = vcmask 1042432  }
  0x6e   : > { %v6735_v13 = vmax.f32 %v471_v9, %v472_v10  ;;  %v468_v14 = vld [vmem:[%s6705_s21 + $0x28] sm:$0xff]  ;;  %v474_v16 = vld [vmem:[%s6705_s21 + $0x58] sm:$0xff]  ;;  %v6136_v17 = vpack.i.bf16 %v6728_v8, %v6724_v5  ;;  %v475_v18 = vld [vmem:[%s6705_s21 + $0x60] sm:$0xff]  ;;  %329 = vst [vmem:[#allocation2 + $0x4] sm:$0x1] %v6485_v33  ;;  %vm1162_vm12 = vcmask 1046532  }
  0x6f   : > { %v476_v19 = vld [vmem:[%s6705_s21 + $0x68] sm:$0xff]  ;;  %v6744_v20 = vmax.f32 %v473_v15, %v474_v16  ;;  %vm6748_vm4 = vmand %vm333_vm0, %vm366_vm3  ;;  %v477_v24 = vld [vmem:[%s6705_s21 + $0x70] sm:$0xff]  ;;  %v6759_v28 = vmax.f32 %v467_v12, %v468_v14  ;;  %331 = vst [vmem:[#allocation2 + $0x48] sm:$0xf] %v6485_v33  ;;  %vm740_vm8 = vsmask.f32 3328 }
  0x70   : > { %v6141_v22 = vpack.i.bf16 %v6735_v13, %v6732_v11  ;;  %v6754_v23 = vmax.f32 %v475_v18, %v476_v19  ;;  %v478_v25 = vld [vmem:[%s6705_s21 + $0x78] sm:$0xff]  ;;  %v339_v26 = vld [vmem:[#allocation2 + $0x8] sm:$0x1]  ;;  %v342_v27 = vld [vmem:[#allocation2 + $0x10] sm:$0x1]  ;;  %6137 = vrot.lane.b32.xlu0 %v6136_v17, %s6484_s30  ;;  %s4985_s14 = sshll.u32 %s6701_s23, 6 }
  0x71   : > { %v340_v29 = vsel %vm6716_vm2, 0, %v339_v26  ;;  %v343_v30 = vsel %vm6716_vm2, 0, %v342_v27  ;;  %v371_v31 = vld [vmem:[#allocation2 + $0xc] sm:$0x1]  ;;  %v374_v32 = vld [vmem:[#allocation2 + $0x14] sm:$0x1]  ;;  %v6782_v47 = vmax.f32 %v477_v24, %v478_v25  ;;  %vm6829_vm7 = vmand %vm658_vm6, %vm366_vm3 }
  0x72   : > { %332 = vst [vmem:[#allocation2 + $0x4c] sm:$0x1] %v6485_v33  ;;  %398 = vst [vmem:[#allocation3] sm:$0xf] %v6485_v33  ;;  %6142 = vrot.lane.b32.xlu1 %v6141_v22, %s6484_s30  ;;  %v6146_v34 = vpack.i.bf16 %v6754_v23, %v6744_v20  ;;  %v372_v35 = vsel %vm6748_vm4, 0, %v371_v31  ;;  %v375_v36 = vsel %vm6748_vm4, 0, %v374_v32 }
  0x73   : > { %399 = vst [vmem:[#allocation3 + $0x4] sm:$0x1] %v6485_v33  ;;  %401 = vst [vmem:[#allocation3 + $0x48] sm:$0xf] %v6485_v33  ;;  %v348_v37 = vld [vmem:[#allocation2 + $0x20] sm:$0x1] }
  0x74   : > { %402 = vst [vmem:[#allocation3 + $0x4c] sm:$0x1] %v6485_v33  ;;  %341 = vst [vmem:[#allocation2 + $0x8] sm:$0x1] %v340_v29  ;;  %v351_v38 = vld [vmem:[#allocation2 + $0x28] sm:$0x1]  ;;  %499 = vrot.lane.b32.xlu0 %v6759_v28, %s6484_s30 }
  0x75   : > { %344 = vst [vmem:[#allocation2 + $0x10] sm:$0x1] %v343_v30  ;;  %373 = vst [vmem:[#allocation2 + $0xc] sm:$0x1] %v372_v35  ;;  %v349_v39 = vsel %vm6716_vm2, 0, %v348_v37  ;;  %v352_v40 = vsel %vm6716_vm2, 0, %v351_v38 }
  0x76   : > { %376 = vst [vmem:[#allocation2 + $0x14] sm:$0x1] %v375_v36  ;;  %v380_v41 = vld [vmem:[#allocation2 + $0x24] sm:$0x1]  ;;  %v345_v42 = vld [vmem:[#allocation2 + $0x18] sm:$0x1]  ;;  %6147 = vrot.lane.b32.xlu1 %v6146_v34, %s6484_s30  ;;  %vm6948_vm13 = vmor %vm1161_vm11, %vm1162_vm12 }
  0x77   : > { %350 = vst [vmem:[#allocation2 + $0x20] sm:$0x1] %v349_v39  ;;  %353 = vst [vmem:[#allocation2 + $0x28] sm:$0x1] %v352_v40  ;;  %v381_v43 = vsel %vm6748_vm4, 0, %v380_v41  ;;  %v346_v45 = vsel %vm6716_vm2, 0, %v345_v42 }
  0x78   : > { %v383_v44 = vld [vmem:[#allocation2 + $0x2c] sm:$0x1]  ;;  %v377_v46 = vld [vmem:[#allocation2 + $0x1c] sm:$0x1]  ;;  %382 = vst [vmem:[#allocation2 + $0x24] sm:$0x1] %v381_v43  ;;  %509 = vrot.lane.b32.xlu0 %v6782_v47, %s6484_s30 }
  0x79   : > { %v384_v48 = vsel %vm6748_vm4, 0, %v383_v44  ;;  %347 = vst [vmem:[#allocation2 + $0x18] sm:$0x1] %v346_v45  ;;  %v378_v49 = vsel %vm6748_vm4, 0, %v377_v46  ;;  %v6151_v50 = vld [vmem:[#allocation7 + $0x40] sm:$0xff]   ;;  %v6152_v51 = vld [vmem:[#allocation7 + $0x48] sm:$0xff]  }
  0x7a   : > { %385 = vst [vmem:[#allocation2 + $0x2c] sm:$0x1] %v384_v48  ;;  %379 = vst [vmem:[#allocation2 + $0x1c] sm:$0x1] %v378_v49  ;;  %5501 = vmatprep.subr.bf16.mxu0 %v6151_v50  ;;  %v354_v52 = vld [vmem:[#allocation2 + $0x30] sm:$0x1] }
  0x7b   : > { %5502 = vmatpush3.bf16.msra.mxu0 %v6151_v50  ;;  %v355_v53 = vsel %vm6716_vm2, 0, %v354_v52  ;;  %v6153_v54 = vld [vmem:[#allocation7 + $0x50] sm:$0xff]   ;;  %v357_v55 = vld [vmem:[#allocation2 + $0x38] sm:$0x1]  ;;  %v389_v59 = vld [vmem:[#allocation2 + $0x3c] sm:$0x1] }
  0x7c   : > { %5503 = vmatprep.subr.bf16.mxu0 %v6152_v51  ;;  %356 = vst [vmem:[#allocation2 + $0x30] sm:$0x1] %v355_v53  ;;  %v358_v56 = vsel %vm6716_vm2, 0, %v357_v55  ;;  %v386_v57 = vld [vmem:[#allocation2 + $0x34] sm:$0x1]  ;;  %v6154_v60 = vld [vmem:[#allocation7 + $0x58] sm:$0xff]  }
  0x7d   : > { %359 = vst [vmem:[#allocation2 + $0x38] sm:$0x1] %v358_v56  ;;  %v387_v58 = vsel %vm6748_vm4, 0, %v386_v57  ;;  %v390_v61 = vsel %vm6748_vm4, 0, %v389_v59  ;;  %v360_v62 = vld [vmem:[#allocation2 + $0x40] sm:$0x1] }
  0x7e   : > { %388 = vst [vmem:[#allocation2 + $0x34] sm:$0x1] %v387_v58  ;;  %391 = vst [vmem:[#allocation2 + $0x3c] sm:$0x1] %v390_v61  ;;  %v392_v63 = vld [vmem:[#allocation2 + $0x44] sm:$0x1] }
  0x7f   : > { %5504 = vmatpush3.bf16.msra.mxu0 %v6152_v51  ;;  %v6155_v1 = vld [vmem:[#allocation7 + $0x60] sm:$0xff]   ;;  %v361_v2 = vsel %vm6716_vm2, 0, %v360_v62  ;;  %v393_v3 = vsel %vm6748_vm4, 0, %v392_v63  ;;  %v6156_v10 = vld [vmem:[#allocation7 + $0x68] sm:$0xff]   ;;  %v6157_v12 = vld [vmem:[#allocation7 + $0x70] sm:$0xff]   ;;  %s325_s29 = scalar_lea.vmem [#allocation10], %s4985_s14 }
  0x80   : > { %5505 = vmatprep.subr.bf16.mxu0 %v6153_v54  ;;  %362 = vst [vmem:[#allocation2 + $0x40] sm:$0x1] %v361_v2  ;;  %394 = vst [vmem:[#allocation2 + $0x44] sm:$0x1] %v393_v3  ;;  %v336_v4 = vld [vmem:[#allocation2] sm:$0x1] }
  0x81   : > { %v337_v6 = vsel %vm6716_vm2, 0, %v336_v4  ;;  %v368_v7 = vld [vmem:[#allocation2 + $0x4] sm:$0x1]  ;;  %v6158_v14 = vld [vmem:[#allocation7 + $0x78] sm:$0xff]   ;;  %v660_v55 = vld [vmem:[#allocation2 + $0x8] sm:$0xf] }
  0x82   : > { %338 = vst [vmem:[#allocation2] sm:$0x1] %v337_v6  ;;  %v369_v9 = vsel %vm6748_vm4, 0, %v368_v7  ;;  %v6807_v15 = vld [vmem:[#allocation7] sm:$0xff]   ;;  %v663_v56 = vld [vmem:[#allocation2 + $0xc] sm:$0x1] }
  0x83   : > { %5506 = vmatpush3.bf16.msra.mxu0 %v6153_v54  ;;  %370 = vst [vmem:[#allocation2 + $0x4] sm:$0x1] %v369_v9  ;;  %v666_v57 = vld [vmem:[#allocation2 + $0x10] sm:$0xf]  ;;  %v678_v7 = vld [vmem:[#allocation2 + $0x20] sm:$0xf] }
  0x84   : > { %5507 = vmatprep.subr.bf16.mxu0 %v6154_v60  ;;  %v684_v9 = vld [vmem:[#allocation2 + $0x28] sm:$0xf]  ;;  %vm741_vm9 = vsmask.f32 7440  ;;  %s4881_s18 = sshll.u32 %s325_s29, 4  ;;  %s5284_s21 = sshll.u32 %s6550_s28, 10  ;;  %s7513_s18 = int_to_ptr.vmem [resolvable:$true] %s4881_s18 }
  0x85   : > { %vm6889_vm10 = vmor %vm740_vm8, %vm741_vm9  ;;  %s7518_s20 = scalar_lea.hbm %s7569_s7, %s5284_s21  ;;  %s4868_s28 = scalar_lea.sflag [#allocation6], %s6701_s23 }
  0x86   : > { %s6405_s11 = scalar_lea.vmem %s7513_s18, 1024  ;;  %p7593_p0 = scmp.ne.s32.totalorder %s7578_s16, 0 }
  0x87   : > { %5508 = vmatpush3.bf16.msra.mxu0 %v6154_v60  ;;  %p6406_p11 = scmp.ne.s32.totalorder %s7513_s18, %s6405_s11  ;;  %s6486_s22 = smov [#allocation10]  }
  0x88   : > { %5509 = vmatprep.subr.bf16.mxu0 %v6155_v1  ;;  %s6409_s10 = sshll.u32 %s6486_s22, 4  ;;  %s6410_s10 = int_to_ptr.vmem [resolvable:$false] %s6409_s10 }
  0x89   : > { %v6810_v16 = vld [vmem:[#allocation2] sm:$0xf]  ;;  %p6407_p1 = pnand %p6406_p11, %p7593_p0  ;;  %s6411_s15 = scalar_lea.vmem %s6410_s10, 2048 }
  0x8a   : > { %v744_v24 = vshrl.u32 %v6810_v16, 16  ;;  %v747_v25 = vshll.u32 %v6810_v16, 16  ;;  %p6412_p7 = scmp.lt.s32.totalorder %s7513_s18, %s6410_s10  ;;  %p6413_p9 = scmp.lt.s32.totalorder %s6411_s15, %s6405_s11 }
  0x8b   : > { %5510 = vmatpush3.bf16.msra.mxu0 %v6155_v1  ;;  %v669_v1 = vld [vmem:[#allocation2 + $0x14] sm:$0x1]  ;;  %p6408_p3 = pneg %p6407_p1 }
  0x8c   : > { %5511 = vmatprep.subr.bf16.mxu0 %v6156_v10  ;;  %v6819_v38 = vrot.slane %v744_v24, 4  ;;  %v687_v24 = vld [vmem:[#allocation2 + $0x2c] sm:$0x1]  ;;  %p6414_p12 = por %p6413_p9, %p6412_p7 }
  0x8e   : > { %p6415_p2 = pnand %p6414_p12, %p6408_p3 }
  0x8f   : > { %5512 = vmatpush3.bf16.msra.mxu0 %v6156_v10 }
  0x90   : > { %5513 = vmatprep.subr.bf16.mxu0 %v6157_v12 }
  0x93   : > { %5514 = vmatpush3.bf16.msra.mxu0 %v6157_v12 }
  0x94   : > { %5515 = vmatprep.subr.bf16.mxu0 %v6158_v14 }
  0x97   : > { %5516 = vmatpush3.bf16.msra.mxu0 %v6158_v14 }
  0x98   : > { %5525 = vmatprep.subr.bf16.mxu0 %v6807_v15 }
  0xe2   : > { %v6138_v17 = vpop.permute.xlu0 %6137 }
  0xe3   : > { %v6140_v18 = vunpack.i.h.bf16 %v6138_v17  ;;  %v6139_v19 = vunpack.i.l.bf16 %v6138_v17 }
  0xe4   : > { %v6143_v22 = vpop.permute.xlu1 %6142 }
  0xe5   : > { %v6145_v26 = vunpack.i.h.bf16 %v6143_v22  ;;  %v6144_v27 = vunpack.i.l.bf16 %v6143_v22  ;;  %v520_v29 = vmax.f32 %v6728_v8, %v6140_v18  ;;  %v519_v30 = vmax.f32 %v6724_v5, %v6139_v19  ;;  %v681_v22 = vld [vmem:[#allocation2 + $0x24] sm:$0x1] }
  0xe6   : > { %v500_v33 = vpop.permute.xlu0 %499 }
  0xe7   : > { %v523_v31 = vmax.f32 %v6735_v13, %v6145_v26  ;;  %v522_v32 = vmax.f32 %v6732_v11, %v6144_v27  ;;  %v528_v34 = vpack.c.bf16 %v520_v29, %v520_v29  ;;  %v527_v35 = vpack.c.bf16 %v519_v30, %v519_v30 }
  0xe8   : > { %v521_v36 = vmax.f32 %v6759_v28, %v500_v33  ;;  %v6148_v37 = vpop.permute.xlu1 %6147 }
  0xe9   : > { %v531_v39 = vpack.c.bf16 %v523_v31, %v523_v31  ;;  %v530_v40 = vpack.c.bf16 %v522_v32, %v522_v32  ;;  %v6150_v41 = vunpack.i.h.bf16 %v6148_v37  ;;  %v540_v42 = vsel %vm535_vm5, %v528_v34, 0 }
  0xea   : > { %v538_v8 = vsel %vm535_vm5, %v527_v35, 0  ;;  %v529_v5 = vpack.c.bf16 %v521_v36, %v521_v36  ;;  %v6149_v43 = vunpack.i.l.bf16 %v6148_v37  ;;  %v4987_v13 = vcombine.low %v540_v42, %v540_v42  ;;  %v510_v54 = vpop.permute.xlu0 %509 }
  0xeb   : > { %v4986_v44 = vcombine.low %v538_v8, %v538_v8  ;;  %v546_v11 = vsel %vm535_vm5, %v531_v39, 0  ;;  %v544_v45 = vsel %vm535_vm5, %v530_v40, 0  ;;  %v525_v49 = vmax.f32 %v6754_v23, %v6150_v41  ;;  %v6852_v41 = vld [vmem:[#allocation2 + $0x4] sm:$0x1]  ;;  %v672_v8 = vld [vmem:[#allocation2 + $0x18] sm:$0xf] }
  0xec   : > { %v4990_v46 = vcombine.low %v546_v11, %v546_v11  ;;  %v4989_v28 = vcombine.low %v544_v45, %v544_v45  ;;  %v542_v48 = vsel %vm535_vm5, %v529_v5, 0  ;;  %v586_v50 = vshrl.u32 %v4987_v13, 16 }
  0xed   : > { %v589_v51 = vshll.u32 %v4987_v13, 16  ;;  %v578_v52 = vshrl.u32 %v4986_v44, 16  ;;  %v581_v53 = vshll.u32 %v4986_v44, 16  ;;  %v4988_v2 = vcombine.low %v542_v48, %v542_v48 }
  0xee   : > { %v610_v58 = vshrl.u32 %v4990_v46, 16  ;;  %v613_v59 = vshll.u32 %v4990_v46, 16  ;;  %v602_v60 = vshrl.u32 %v4989_v28, 16  ;;  %v605_v61 = vshll.u32 %v4989_v28, 16  ;;  %v675_v46 = vld [vmem:[#allocation2 + $0x1c] sm:$0x1] }
  0xef   : > { %v588_v62 = vrot.slane %v586_v50, 7  ;;  %v580_v63 = vrot.slane %v578_v52, 7  ;;  %v533_v3 = vpack.c.bf16 %v525_v49, %v525_v49  ;;  %v524_v10 = vmax.f32 %v6744_v20, %v6149_v43 }
  0xf0   : > { %v612_v4 = vrot.slane %v610_v58, 7  ;;  %v604_v6 = vrot.slane %v602_v60, 7  ;;  %v526_v12 = vmax.f32 %v6782_v47, %v510_v54  ;;  %v594_v37 = vshrl.u32 %v4988_v2, 16  ;;  %v699_v58 = vld [vmem:[#allocation2 + $0x3c] sm:$0x1] }
  0xf1   : > { %v591_v14 = vor.u32 %v589_v51, %v588_v62  ;;  %v592_v17 = vrot.slane %v588_v62, 4  ;;  %v583_v18 = vor.u32 %v581_v53, %v580_v63  ;;  %v584_v19 = vrot.slane %v580_v63, 4  ;;  %v690_v62 = vld [vmem:[#allocation2 + $0x30] sm:$0xf]  ;;  %v693_v63 = vld [vmem:[#allocation2 + $0x34] sm:$0x1] }
  0xf2   : > { %v615_v26 = vor.u32 %v613_v59, %v612_v4  ;;  %v616_v27 = vrot.slane %v612_v4, 4  ;;  %v607_v29 = vor.u32 %v605_v61, %v604_v6  ;;  %v608_v30 = vrot.slane %v604_v6, 4 }
  0xf3   : > { %v661_v31 = vsel %vm6829_vm7, %v583_v18, %v660_v55  ;;  %v664_v32 = vsel %vm6716_vm2, %v584_v19, %v663_v56  ;;  %v667_v20 = vsel %vm6829_vm7, %v591_v14, %v666_v57  ;;  %v670_v47 = vsel %vm6716_vm2, %v592_v17, %v669_v1 }
  0xf4   : > { %662 = vst [vmem:[#allocation2 + $0x8] sm:$0xf] %v661_v31  ;;  %665 = vst [vmem:[#allocation2 + $0xc] sm:$0x1] %v664_v32  ;;  %v679_v33 = vsel %vm6829_vm7, %v607_v29, %v678_v7  ;;  %v682_v34 = vsel %vm6716_vm2, %v608_v30, %v681_v22  ;;  %v685_v35 = vsel %vm6829_vm7, %v615_v26, %v684_v9  ;;  %v550_v39 = vsel %vm535_vm5, %v533_v3, 0 }
  0xf5   : > { %668 = vst [vmem:[#allocation2 + $0x10] sm:$0xf] %v667_v20  ;;  %671 = vst [vmem:[#allocation2 + $0x14] sm:$0x1] %v670_v47  ;;  %v688_v36 = vsel %vm6716_vm2, %v616_v27, %v687_v24  ;;  %v532_v40 = vpack.c.bf16 %v524_v10, %v524_v10  ;;  %v749_v42 = vrot.slane %v747_v25, 5  ;;  %v4992_v5 = vcombine.low %v550_v39, %v550_v39 }
  0xf6   : > { %680 = vst [vmem:[#allocation2 + $0x20] sm:$0xf] %v679_v33  ;;  %683 = vst [vmem:[#allocation2 + $0x24] sm:$0x1] %v682_v34  ;;  %v534_v43 = vpack.c.bf16 %v526_v12, %v526_v12  ;;  %v753_v13 = vshll.u32 %v6852_v41, 16  ;;  %v596_v44 = vrot.slane %v594_v37, 7 }
  0xf7   : > { %686 = vst [vmem:[#allocation2 + $0x28] sm:$0xf] %v685_v35  ;;  %689 = vst [vmem:[#allocation2 + $0x2c] sm:$0x1] %v688_v36  ;;  %v597_v11 = vshll.u32 %v4988_v2, 16  ;;  %v548_v45 = vsel %vm535_vm5, %v532_v40, 0  ;;  %v750_v54 = vor.u32 %v749_v42, %v6819_v38 }
  0xf8   : > { %v626_v28 = vshrl.u32 %v4992_v5, 16  ;;  %v629_v48 = vshll.u32 %v4992_v5, 16  ;;  %v4991_v49 = vcombine.low %v548_v45, %v548_v45  ;;  %v552_v50 = vsel %vm535_vm5, %v534_v43, 0  ;;  %v696_v25 = vld [vmem:[#allocation2 + $0x38] sm:$0xf]  ;;  %v6316_v36 = vld [vmem:[#allocation9 + $0x228] sm:$0xff]  }
  0xf9   : > { %v599_v51 = vor.u32 %v597_v11, %v596_v44  ;;  %v600_v52 = vrot.slane %v596_v44, 4  ;;  %v4993_v53 = vcombine.low %v552_v50, %v552_v50  ;;  %v6860_v59 = vrot.slane %v753_v13, 5  ;;  %v702_v9 = vld [vmem:[#allocation2 + $0x40] sm:$0xf]  ;;  %v705_v29 = vld [vmem:[#allocation2 + $0x44] sm:$0x1] }
  0xfa   : > { %v628_v55 = vrot.slane %v626_v28, 7  ;;  %v618_v56 = vshrl.u32 %v4991_v49, 16  ;;  %v621_v57 = vshll.u32 %v4991_v49, 16  ;;  %v751_v14 = vrot.slane %v750_v54, 4 }
  0xfb   : > { %v673_v60 = vsel %vm6829_vm7, %v599_v51, %v672_v8  ;;  %v676_v61 = vsel %vm6716_vm2, %v600_v52, %v675_v46  ;;  %v634_v1 = vshrl.u32 %v4993_v53, 16  ;;  %v637_v2 = vshll.u32 %v4993_v53, 16  ;;  %v6866_v3 = vld [vmem:[#allocation2 + $0x8] sm:$0xf]  ;;  %v6868_v4 = vld [vmem:[#allocation2 + $0xc] sm:$0x1] }
  0xfc   : > { %674 = vst [vmem:[#allocation2 + $0x18] sm:$0xf] %v673_v60  ;;  %677 = vst [vmem:[#allocation2 + $0x1c] sm:$0x1] %v676_v61  ;;  %v631_v38 = vor.u32 %v629_v48, %v628_v55  ;;  %v632_v6 = vrot.slane %v628_v55, 4  ;;  %v620_v7 = vrot.slane %v618_v56, 7  ;;  %v756_v46 = vsel %vm6889_vm10, %v751_v14, %v6860_v59 }
  0xfd   : > { %v758_v10 = vshrl.u32 %v6866_v3, 16  ;;  %v636_v12 = vrot.slane %v634_v1, 7  ;;  %v761_v17 = vshll.u32 %v6866_v3, 16  ;;  %v767_v18 = vshll.u32 %v6868_v4, 16  ;;  %v6873_v19 = vld [vmem:[#allocation2 + $0x10] sm:$0xf] }
  0xfe   : > { %v623_v22 = vor.u32 %v621_v57, %v620_v7  ;;  %v624_v24 = vrot.slane %v620_v7, 4  ;;  %v697_v26 = vsel %vm6829_vm7, %v631_v38, %v696_v25  ;;  %v700_v27 = vsel %vm6716_vm2, %v632_v6, %v699_v58  ;;  %v6879_v30 = vld [vmem:[#allocation2 + $0x14] sm:$0x1]  ;;  %v6881_v33 = vld [vmem:[#allocation2 + $0x20] sm:$0xf] }
  0xff   : > { %698 = vst [vmem:[#allocation2 + $0x38] sm:$0xf] %v697_v26  ;;  %701 = vst [vmem:[#allocation2 + $0x3c] sm:$0x1] %v700_v27  ;;  %v639_v31 = vor.u32 %v637_v2, %v636_v12  ;;  %v640_v32 = vrot.slane %v636_v12, 4  ;;  %v760_v20 = vrot.slane %v758_v10, 4 }
 0x100   : > { %v763_v47 = vrot.slane %v761_v17, 5  ;;  %v691_v34 = vsel %vm6829_vm7, %v623_v22, %v690_v62  ;;  %v694_v35 = vsel %vm6716_vm2, %v624_v24, %v693_v63  ;;  %v772_v37 = vshrl.u32 %v6873_v19, 16  ;;  %v6900_v44 = vld [vmem:[#allocation2 + $0x28] sm:$0xf]  ;;  %v6902_v11 = vld [vmem:[#allocation2 + $0x24] sm:$0x1] }
 0x101   : > { %692 = vst [vmem:[#allocation2 + $0x30] sm:$0xf] %v691_v34  ;;  %695 = vst [vmem:[#allocation2 + $0x34] sm:$0x1] %v694_v35  ;;  %v703_v39 = vsel %vm6829_vm7, %v639_v31, %v702_v9  ;;  %v706_v40 = vsel %vm6716_vm2, %v640_v32, %v705_v29  ;;  %v775_v8 = vshll.u32 %v6873_v19, 16  ;;  %v769_v5 = vrot.slane %v767_v18, 5 }
 0x102   : > { %v764_v42 = vor.u32 %v763_v47, %v760_v20  ;;  %704 = vst [vmem:[#allocation2 + $0x40] sm:$0xf] %v703_v39  ;;  %707 = vst [vmem:[#allocation2 + $0x44] sm:$0x1] %v706_v40  ;;  %v774_v43 = vrot.slane %v772_v37, 4  ;;  %v781_v13 = vshll.u32 %v6879_v30, 16 }
 0x103   : > { %v800_v45 = vshrl.u32 %v6881_v33, 16  ;;  %v6908_v48 = vld [vmem:[#allocation2 + $0x18] sm:$0xf]  ;;  %v6910_v49 = vld [vmem:[#allocation2 + $0x1c] sm:$0x1]  ;;  %v777_v50 = vrot.slane %v775_v8, 5 }
 0x104   : > { %v765_v28 = vrot.slane %v764_v42, 4  ;;  %v786_v51 = vshrl.u32 %v6908_v48, 16  ;;  %v789_v52 = vshll.u32 %v6908_v48, 16  ;;  %v795_v25 = vshll.u32 %v6910_v49, 16  ;;  %v6915_v53 = vld [vmem:[#allocation2 + $0x2c] sm:$0x1] }
 0x105   : > { %v778_v55 = vor.u32 %v777_v50, %v774_v43  ;;  %v783_v56 = vrot.slane %v781_v13, 5  ;;  %v802_v57 = vrot.slane %v800_v45, 4  ;;  %v803_v63 = vshll.u32 %v6881_v33, 16  ;;  %v1139_v35 = vld [vmem:[#allocation2 + $0x10] sm:$0xe]  ;;  %v6160_v43 = vld [vmem:[#allocation7 + $0x8] sm:$0xff]  }
 0x106   : > { %v770_v54 = vsel %vm6889_vm10, %v765_v28, %v769_v5  ;;  %v788_v59 = vrot.slane %v786_v51, 4  ;;  %v791_v60 = vrot.slane %v789_v52, 5  ;;  %v797_v61 = vrot.slane %v795_v25, 5  ;;  %v6922_v38 = vld [vmem:[#allocation2 + $0x38] sm:$0xf] }
 0x107   : > { %v4994_v58 = vcombine.low %v756_v46, %v770_v54  ;;  %v779_v62 = vrot.slane %v778_v55, 4  ;;  %v809_v1 = vshll.u32 %v6902_v11, 16  ;;  %v814_v2 = vshrl.u32 %v6900_v44, 16  ;;  %v739_v32 = vld [vmem:[#allocation2 + $0x3c] sm:$0x1] }
 0x108   : > { %v792_v6 = vor.u32 %v791_v60, %v788_v59  ;;  %v817_v7 = vshll.u32 %v6900_v44, 16  ;;  %v823_v9 = vshll.u32 %v6915_v53, 16  ;;  %v6926_v10 = vld [vmem:[#allocation2 + $0x30] sm:$0xf]  ;;  %v6928_v12 = vld [vmem:[#allocation2 + $0x34] sm:$0x1] }
 0x109   : > { %5517 = vmatprep.mubr.bf16.mxu0 %v4994_v58  ;;  %v784_v14 = vsel %vm6889_vm10, %v779_v62, %v783_v56  ;;  %v805_v17 = vrot.slane %v803_v63, 5  ;;  %v811_v18 = vrot.slane %v809_v1, 5  ;;  %v816_v22 = vrot.slane %v814_v2, 4  ;;  %v1140_v46 = vld [vmem:[#allocation2 + $0x18] sm:$0xe] }
 0x10a   : > { %v793_v24 = vrot.slane %v792_v6, 4  ;;  %v819_v26 = vrot.slane %v817_v7, 5  ;;  %v825_v27 = vrot.slane %v823_v9, 5  ;;  %v828_v29 = vshrl.u32 %v6926_v10, 16  ;;  %v1143_v1 = vld [vmem:[#allocation2 + $0x30] sm:$0xe] }
 0x10b   : > { %v806_v31 = vor.u32 %v805_v17, %v802_v57  ;;  %v831_v20 = vshll.u32 %v6926_v10, 16  ;;  %v837_v47 = vshll.u32 %v6928_v12, 16  ;;  %v842_v34 = vshrl.u32 %v6922_v38, 16 }
 0x10c   : > { %v798_v37 = vsel %vm6889_vm10, %v793_v24, %v797_v61  ;;  %v820_v39 = vor.u32 %v819_v26, %v816_v22  ;;  %v830_v40 = vrot.slane %v828_v29, 4  ;;  %v845_v42 = vshll.u32 %v6922_v38, 16  ;;  %v6161_v61 = vld [vmem:[#allocation7 + $0x10] sm:$0xff]   ;;  %v6163_v24 = vld [vmem:[#allocation7 + $0x18] sm:$0xff]  }
 0x10d   : > { %v4995_v8 = vcombine.low %v784_v14, %v798_v37  ;;  %v1174_v5 = vrot.slane %v6879_v30, 5  ;;  %v807_v13 = vrot.slane %v806_v31, 4  ;;  %v833_v45 = vrot.slane %v831_v20, 5  ;;  %v1137_v37 = vld [vmem:[#allocation2] sm:$0xe] }
 0x10e   : > { %v821_v28 = vrot.slane %v820_v39, 4  ;;  %v844_v50 = vrot.slane %v842_v34, 4  ;;  %v847_v51 = vrot.slane %v845_v42, 5  ;;  %v851_v52 = vshll.u32 %v739_v32, 16  ;;  %v6164_v34 = vld [vmem:[#allocation7 + $0x20] sm:$0xff]   ;;  %v6171_v42 = vld [vmem:[#allocation7 + $0x88] sm:$0xff]  }
 0x10f   : > { %5518 = vmatmul.mubr.bf16.vlgmr.msra.gmra.mrb[0].mxu0 %v4995_v8  ;;  %v1178_v25 = vrot.slane %v6910_v49, 5  ;;  %v812_v54 = vsel %vm6889_vm10, %v807_v13, %v811_v18  ;;  %v834_v55 = vor.u32 %v833_v45, %v830_v40  ;;  %v839_v56 = vrot.slane %v837_v47, 5  ;;  %v1138_v39 = vld [vmem:[#allocation2 + $0x8] sm:$0xe] }
 0x110   : > { %5526 = vmatpush3.bf16.msra.mxu0 %v6807_v15  ;;  %v826_v30 = vsel %vm6889_vm10, %v821_v28, %v825_v27  ;;  %v848_v57 = vor.u32 %v847_v51, %v844_v50  ;;  %v853_v58 = vrot.slane %v851_v52, 5  ;;  %v5020_v60 = vrot.slane %v1139_v35, 9  ;;  %v1144_v15 = vld [vmem:[#allocation2 + $0x38] sm:$0xe]  ;;  %v6169_v35 = vld [vmem:[#allocation7 + $0x80] sm:$0xff]   ;;  %v6173_v28 = vld [vmem:[#allocation7 + $0x90] sm:$0xff]  }
 0x111   : > { %5527 = vmatprep.subr.bf16.mxu0 %v6160_v43  ;;  %v4996_v49 = vcombine.low %v812_v54, %v826_v30  ;;  %v835_v62 = vrot.slane %v834_v55, 4  ;;  %v5021_v63 = vrot.slane %v1140_v46, 9  ;;  %v5024_v18 = vrot.slane %v1143_v1, 9  ;;  %v6175_v50 = vld [vmem:[#allocation7 + $0xa0] sm:$0xff]   ;;  %v395_v51 = vld [vmem:[#allocation2 + $0x4c] sm:$0x1] }
 0x112   : > { %v849_v2 = vrot.slane %v848_v57, 4  ;;  %v6956_v7 = vsel %vm6948_vm13, %v5020_v60, %v1174_v5  ;;  %v1190_v26 = vrot.slane %v6928_v12, 5  ;;  %v5025_v27 = vrot.slane %v1144_v15, 9  ;;  %v363_v5 = vld [vmem:[#allocation2 + $0x48] sm:$0x1]  ;;  %v6177_v54 = vld [vmem:[#allocation7 + $0xb0] sm:$0xff]  }
 0x113   : > { %5521 = vmatprep.mubr.bf16.mxu0 %v4996_v49  ;;  %v840_v6 = vsel %vm6889_vm10, %v835_v62, %v839_v56  ;;  %v6960_v9 = vsel %vm6948_vm13, %v5021_v63, %v1178_v25  ;;  %v5006_v29 = vcombine.low %v6810_v16, %v6866_v3  ;;  %v1194_v31 = vrot.slane %v739_v32, 5  ;;  %v6165_v16 = vld [vmem:[#allocation7 + $0x28] sm:$0xff]   ;;  %v6166_v3 = vld [vmem:[#allocation7 + $0x30] sm:$0xff]   ;;  %v6167_v32 = vld [vmem:[#allocation7 + $0x38] sm:$0xff]  }
 0x114   : > { %5528 = vmatpush3.bf16.msra.mxu0 %v6160_v43  ;;  %v854_v14 = vsel %vm6889_vm10, %v849_v2, %v853_v58  ;;  %v5027_v17 = vcombine.low %v6956_v7, %v6960_v9  ;;  %v6971_v20 = vsel %vm6948_vm13, %v5024_v18, %v1190_v26  ;;  %v5007_v40 = vcombine.low %v6873_v19, %v6908_v48  ;;  %v6176_v52 = vld [vmem:[#allocation7 + $0xa8] sm:$0xff]   ;;  %v6178_v55 = vld [vmem:[#allocation7 + $0xb8] sm:$0xff]   ;;  %v6179_v60 = vld [vmem:[#allocation7 + $0xc0] sm:$0xff]  }
 0x115   : > { %5529 = vmatprep.subr.bf16.mxu0 %v6161_v61  ;;  %v4997_v22 = vcombine.low %v840_v6, %v854_v14  ;;  %v6975_v47 = vsel %vm6948_vm13, %v5025_v27, %v1194_v31  ;;  %v5008_v8 = vcombine.low %v6881_v33, %v6900_v44  ;;  %v1166_v43 = vrot.slane %v6852_v41, 5  ;;  %v6180_v62 = vld [vmem:[#allocation7 + $0xc8] sm:$0xff]   ;;  %v6184_v2 = vld [vmem:[#allocation7 + $0xe0] sm:$0xff]   ;;  %v1520_v7 = vld [vmem:[#allocation2 + $0x10] sm:$0xf] }
 0x116   : > { %v5029_v12 = vcombine.low %v6971_v20, %v6975_v47  ;;  %v1170_v13 = vrot.slane %v6868_v4, 5  ;;  %v5018_v45 = vrot.slane %v1137_v37, 9  ;;  %v5019_v46 = vrot.slane %v1138_v39, 9  ;;  %v6174_v4 = vld [vmem:[#allocation7 + $0x98] sm:$0xff]   ;;  %v6182_v1 = vld [vmem:[#allocation2 + $0x8] ss:$8 sps:$4 sm:$0xff]  }
 0x117   : > { %5522 = vmatmul.mubr.bf16.gmra.mrb[4].mxu0 %v4997_v22  ;;  %v364_v19 = vsel %vm6716_vm2, 0, %v363_v5  ;;  %v5009_v41 = vcombine.low %v6926_v10, %v6922_v38  ;;  %v396_v25 = vsel %vm6748_vm4, 0, %v395_v51  ;;  %v1141_v38 = vld [vmem:[#allocation2 + $0x20] sm:$0xe]  ;;  %v1142_v10 = vld [vmem:[#allocation2 + $0x28] sm:$0xe] }
 0x118   : > { %5530 = vmatpush3.bf16.msra.mxu0 %v6161_v61  ;;  %5541 = vmatprep.mubr.bf16.mxu0 %v5006_v29  ;;  %365 = vst [vmem:[#allocation2 + $0x48] sm:$0x1] %v364_v19  ;;  %v1167_v48 = vsel %vm6948_vm13, %v5018_v45, %v1166_v43  ;;  %v1171_v33 = vsel %vm6948_vm13, %v5019_v46, %v1170_v13  ;;  %397 = vst [vmem:[#allocation2 + $0x4c] sm:$0x1] %v396_v25  ;;  %v5022_v56 = vrot.slane %v1141_v38, 9  ;;  %v6185_v15 = vld [vmem:[#allocation7 + $0xe8] sm:$0xff]  }
 0x119   : > { %5531 = vmatprep.subr.bf16.mxu0 %v6163_v24  ;;  %v5026_v44 = vcombine.low %v1167_v48, %v1171_v33  ;;  %v1182_v30 = vrot.slane %v6902_v11, 5  ;;  %v5023_v57 = vrot.slane %v1142_v10, 9  ;;  %v1186_v58 = vrot.slane %v6915_v53, 5  ;;  %v6181_v11 = vld [vmem:[#allocation7 + $0xd0] sm:$0xff]   ;;  %v6183_v53 = vld [vmem:[#allocation7 + $0xd8] sm:$0xff]   ;;  %v6189_v20 = vld [vmem:[#allocation7 + $0x100] sm:$0xff]  }
 0x11a   : > { %v1518_v6 = vld [vmem:[#allocation2 + $0x8] sm:$0xf]  ;;  %v6186_v9 = vld [vmem:[#allocation7 + $0xf0] sm:$0xff]   ;;  %v1549_v18 = vshrl.u32 %v1520_v7, 16  ;;  %v1552_v22 = vshll.u32 %v1520_v7, 16 }
 0x11b   : > { %v1183_v49 = vsel %vm6948_vm13, %v5022_v56, %v1182_v30  ;;  %v1187_v61 = vsel %vm6948_vm13, %v5023_v57, %v1186_v58  ;;  %v1535_v14 = vshrl.u32 %v1518_v6, 16  ;;  %v7007_v47 = vld [vmem:[#allocation2 + $0xc] sm:$0x1]  ;;  %v6190_v39 = vld [vmem:[#allocation2 + $0x28] ss:$8 sps:$4 sm:$0xff]  }
 0x11c   : > { %5532 = vmatpush3.bf16.msra.mxu0 %v6163_v24  ;;  %v5028_v63 = vcombine.low %v1183_v49, %v1187_v61  ;;  %v6187_v24 = vld [vmem:[#allocation7 + $0xf8] sm:$0xff]   ;;  %v1551_v29 = vrot.slane %v1549_v18, 4  ;;  %v1554_v31 = vrot.slane %v1552_v22, 5  ;;  %v1524_v33 = vld [vmem:[#allocation2 + $0x20] sm:$0xf]  ;;  %v6196_v56 = vld [vmem:[#allocation7 + $0x128] sm:$0xff]  }
 0x11d   : > { %5533 = vmatprep.subr.bf16.mxu0 %v6164_v34  ;;  %v1537_v26 = vrot.slane %v1535_v14, 4  ;;  %v6192_v46 = vld [vmem:[#allocation2 + $0x38] ss:$8 sps:$4 sm:$0xff]   ;;  %v1580_v25 = vshll.u32 %v1524_v33, 16  ;;  %v7017_v49 = vld [vmem:[#allocation2 + $0x1c] sm:$0x1] }
 0x11e   : > { %v1522_v48 = vld [vmem:[#allocation2 + $0x18] sm:$0xf]  ;;  %v1572_v7 = vshll.u32 %v7017_v49, 16  ;;  %v7025_v18 = vld [vmem:[#allocation2 + $0x34] sm:$0x1] }
 0x11f   : > { %v1566_v51 = vshll.u32 %v1522_v48, 16  ;;  %v1530_v61 = vld [vmem:[#allocation2 + $0x38] sm:$0xf] }
 0x120   : > { %5534 = vmatpush3.bf16.msra.mxu0 %v6164_v34  ;;  %v7009_v34 = vld [vmem:[#allocation2 + $0x14] sm:$0x1]  ;;  %v1619_v22 = vshrl.u32 %v1530_v61, 16 }
 0x121   : > { %5535 = vmatprep.subr.bf16.mxu0 %v6165_v16  ;;  %v1558_v37 = vshll.u32 %v7009_v34, 16  ;;  %v1568_v57 = vrot.slane %v1566_v51, 5 }
 0x123   : > { %v1560_v43 = vrot.slane %v1558_v37, 5 }
 0x124   : > { %5536 = vmatpush3.bf16.msra.mxu0 %v6165_v16  ;;  %v1555_v16 = vor.u32 %v1554_v31, %v1551_v29 }
 0x125   : > { %5537 = vmatprep.subr.bf16.mxu0 %v6166_v3 }
 0x128   : > { %5538 = vmatpush3.bf16.msra.mxu0 %v6166_v3  ;;  %v6188_v3 = vld [vmem:[#allocation2 + $0x18] ss:$8 sps:$4 sm:$0xff]  }
 0x129   : > { %5539 = vmatprep.subr.bf16.mxu0 %v6167_v32 }
 0x12c   : > { %5540 = vmatpush3.bf16.msra.mxu0 %v6167_v32  ;;  %v6191_v32 = vld [vmem:[#allocation7 + $0x108] sm:$0xff]  }
 0x12d   : > { %5549 = vmatprep.subr.bf16.mxu0 %v6169_v35 }
 0x12f   : > { %5542 = vmatmul.mubr.bf16.vlgmr.msra.gmra.mrb[0].mxu0 %v5007_v40 }
 0x130   : > { %5545 = vmatprep.mubr.bf16.mxu0 %v5008_v8  ;;  %5550 = vmatpush3.bf16.msra.mxu0 %v6169_v35  ;;  %v1544_v35 = vshll.u32 %v7007_v47, 16  ;;  %v6193_v8 = vld [vmem:[#allocation7 + $0x110] sm:$0xff]  }
 0x131   : > { %5551 = vmatprep.subr.bf16.mxu0 %v6171_v42 }
 0x132   : > { %v1546_v5 = vrot.slane %v1544_v35, 5 }
 0x134   : > { %5552 = vmatpush3.bf16.msra.mxu0 %v6171_v42  ;;  %v1556_v42 = vrot.slane %v1555_v16, 4  ;;  %v6198_v16 = vld [vmem:[#allocation7 + $0x138] sm:$0xff]  }
 0x135   : > { %5553 = vmatprep.subr.bf16.mxu0 %v6173_v28 }
 0x136   : > { %v1561_v45 = vsel %vm6889_vm10, %v1556_v42, %v1560_v43 }
 0x137   : > { %5546 = vmatmul.mubr.bf16.gmra.mrb[4].mxu0 %v5009_v41  ;;  %v1526_v41 = vld [vmem:[#allocation2 + $0x28] sm:$0xf] }
 0x138   : > { %5554 = vmatpush3.bf16.msra.mxu0 %v6173_v28  ;;  %5565 = vmatprep.mubr.bf16.mxu0 %v5026_v44  ;;  %v6194_v28 = vld [vmem:[#allocation7 + $0x118] sm:$0xff]   ;;  %v6195_v44 = vld [vmem:[#allocation7 + $0x120] sm:$0xff]   ;;  %v1594_v38 = vshll.u32 %v1526_v41, 16 }
 0x139   : > { %5555 = vmatprep.subr.bf16.mxu0 %v6174_v4 }
 0x13c   : > { %5556 = vmatpush3.bf16.msra.mxu0 %v6174_v4  ;;  %v1528_v4 = vld [vmem:[#allocation2 + $0x30] sm:$0xf] }
 0x13d   : > { %5557 = vmatprep.subr.bf16.mxu0 %v6175_v50  ;;  %v1605_v10 = vshrl.u32 %v1528_v4, 16 }
 0x140   : > { %5558 = vmatpush3.bf16.msra.mxu0 %v6175_v50  ;;  %v1563_v50 = vshrl.u32 %v1522_v48, 16  ;;  %v7033_v48 = vld [vmem:[#allocation2 + $0x44] sm:$0x1] }
 0x141   : > { %5559 = vmatprep.subr.bf16.mxu0 %v6176_v52 }
 0x142   : > { %v1565_v30 = vrot.slane %v1563_v50, 4  ;;  %v1642_v50 = vshll.u32 %v7033_v48, 16 }
 0x144   : > { %5560 = vmatpush3.bf16.msra.mxu0 %v6176_v52  ;;  %v1577_v52 = vshrl.u32 %v1524_v33, 16 }
 0x145   : > { %5561 = vmatprep.subr.bf16.mxu0 %v6177_v54 }
 0x146   : > { %v1579_v58 = vrot.slane %v1577_v52, 4 }
 0x148   : > { %5562 = vmatpush3.bf16.msra.mxu0 %v6177_v54  ;;  %v1591_v54 = vshrl.u32 %v1526_v41, 16 }
 0x149   : > { %5563 = vmatprep.subr.bf16.mxu0 %v6178_v55 }
 0x14c   : > { %5564 = vmatpush3.bf16.msra.mxu0 %v6178_v55  ;;  %v1608_v55 = vshll.u32 %v1528_v4, 16 }
 0x14d   : > { %5573 = vmatprep.subr.bf16.mxu0 %v6179_v60 }
 0x14f   : > { %5566 = vmatmul.mubr.bf16.vlgmr.msra.gmra.mrb[0].mxu0 %v5027_v17  ;;  %v1538_v17 = vshll.u32 %v1518_v6, 16  ;;  %v1569_v6 = vor.u32 %v1568_v57, %v1565_v30 }
 0x150   : > { %5569 = vmatprep.mubr.bf16.mxu0 %v5028_v63  ;;  %5574 = vmatpush3.bf16.msra.mxu0 %v6179_v60  ;;  %v1582_v60 = vrot.slane %v1580_v25, 5  ;;  %v1596_v63 = vrot.slane %v1594_v38, 5  ;;  %v1799_v25 = vld [vmem:[#allocation2 + $0x8] sm:$0xe] }
 0x151   : > { %5575 = vmatprep.subr.bf16.mxu0 %v6180_v62  ;;  %v1540_v27 = vrot.slane %v1538_v17, 5  ;;  %v7023_v17 = vld [vmem:[#allocation2 + $0x2c] sm:$0x1] }
 0x152   : > { %v1600_v31 = vshll.u32 %v7023_v17, 16 }
 0x154   : > { %5576 = vmatpush3.bf16.msra.mxu0 %v6180_v62  ;;  %v1593_v62 = vrot.slane %v1591_v54, 4  ;;  %v1602_v43 = vrot.slane %v1600_v31, 5  ;;  %v1800_v54 = vld [vmem:[#allocation2 + $0x10] sm:$0xe]  ;;  %v1801_v31 = vld [vmem:[#allocation2 + $0x18] sm:$0xe] }
 0x155   : > { %5577 = vmatprep.subr.bf16.mxu0 %v6181_v11 }
 0x156   : > { %v1597_v29 = vor.u32 %v1596_v63, %v1593_v62  ;;  %v5063_v62 = vrot.slane %v1800_v54, 9  ;;  %v1829_v63 = vrot.slane %v7009_v34, 5  ;;  %v6202_v34 = vld [vmem:[#allocation7 + $0x158] sm:$0xff]  }
 0x157   : > { %5570 = vmatmul.mubr.bf16.gmra.mrb[4].mxu0 %v5029_v12  ;;  %v1541_v12 = vor.u32 %v1540_v27, %v1537_v26 }
 0x158   : > { %5578 = vmatpush3.bf16.msra.mxu0 %v6181_v11  ;;  %5589 = vmatprep.mubr.bf16.mxu0 %v6182_v1  ;;  %v1607_v11 = vrot.slane %v1605_v10, 4  ;;  %v1532_v1 = vld [vmem:[#allocation2 + $0x40] sm:$0xf]  ;;  %v6200_v10 = vld [vmem:[#allocation7 + $0x148] sm:$0xff]  }
 0x159   : > { %5579 = vmatprep.subr.bf16.mxu0 %v6183_v53  ;;  %v1542_v40 = vrot.slane %v1541_v12, 4  ;;  %v1633_v26 = vshrl.u32 %v1532_v1, 16  ;;  %v1636_v27 = vshll.u32 %v1532_v1, 16  ;;  %v1614_v12 = vshll.u32 %v7025_v18, 16 }
 0x15b   : > { %v1547_v13 = vsel %vm6889_vm10, %v1542_v40, %v1546_v5  ;;  %v1635_v42 = vrot.slane %v1633_v26, 4  ;;  %v1598_v5 = vrot.slane %v1597_v29, 4  ;;  %v6203_v26 = vld [vmem:[#allocation7 + $0x160] sm:$0xff]   ;;  %v6205_v29 = vld [vmem:[#allocation7 + $0x170] sm:$0xff]  }
 0x15c   : > { %5580 = vmatpush3.bf16.msra.mxu0 %v6183_v53  ;;  %v5050_v19 = vcombine.low %v1547_v13, %v1561_v45  ;;  %v1610_v53 = vrot.slane %v1608_v55, 5  ;;  %v1616_v45 = vrot.slane %v1614_v12, 5  ;;  %v1803_v12 = vld [vmem:[#allocation2 + $0x28] sm:$0xe] }
 0x15d   : > { %5581 = vmatprep.subr.bf16.mxu0 %v6184_v2  ;;  %v1603_v51 = vsel %vm6889_vm10, %v1598_v5, %v1602_v43  ;;  %v1845_v5 = vrot.slane %v7025_v18, 5  ;;  %v6207_v43 = vld [vmem:[#allocation7 + $0x180] sm:$0xff]   ;;  %v6208_v18 = vld [vmem:[#allocation7 + $0x188] sm:$0xff]  }
 0x160   : > { %5582 = vmatpush3.bf16.msra.mxu0 %v6184_v2  ;;  %v7019_v2 = vld [vmem:[#allocation2 + $0x24] sm:$0x1] }
 0x161   : > { %5583 = vmatprep.subr.bf16.mxu0 %v6185_v15  ;;  %v1586_v14 = vshll.u32 %v7019_v2, 16 }
 0x163   : > { %v1588_v37 = vrot.slane %v1586_v14, 5  ;;  %v442_v14 = vld [vmem:[#allocation3 + $0x1c] sm:$0x1] }
 0x164   : > { %5584 = vmatpush3.bf16.msra.mxu0 %v6185_v15  ;;  %v6197_v15 = vld [vmem:[#allocation7 + $0x130] sm:$0xff]  }
 0x165   : > { %5585 = vmatprep.subr.bf16.mxu0 %v6186_v9 }
 0x168   : > { %5586 = vmatpush3.bf16.msra.mxu0 %v6186_v9  ;;  %v1583_v9 = vor.u32 %v1582_v60, %v1579_v58  ;;  %v1644_v58 = vrot.slane %v1642_v50, 5  ;;  %v5062_v60 = vrot.slane %v1799_v25, 9  ;;  %v1853_v50 = vrot.slane %v7033_v48, 5  ;;  %v6213_v48 = vld [vmem:[#allocation7 + $0x1a8] sm:$0xff]  }
 0x169   : > { %5587 = vmatprep.subr.bf16.mxu0 %v6187_v24 }
 0x16a   : > { %v1584_v35 = vrot.slane %v1583_v9, 4  ;;  %v412_v9 = vld [vmem:[#allocation3 + $0x18] sm:$0x1] }
 0x16c   : > { %5588 = vmatpush3.bf16.msra.mxu0 %v6187_v24  ;;  %v1622_v24 = vshll.u32 %v1530_v61, 16  ;;  %v1589_v41 = vsel %vm6889_vm10, %v1584_v35, %v1588_v37  ;;  %v1825_v61 = vrot.slane %v7007_v47, 5  ;;  %v1833_v35 = vrot.slane %v7017_v49, 5 }
 0x16d   : > { %5597 = vmatprep.subr.bf16.mxu0 %v6189_v20 }
 0x16e   : > { %v1624_v40 = vrot.slane %v1622_v24, 5  ;;  %v443_v24 = vsel %vm6748_vm4, 0, %v442_v14 }
 0x16f   : > { %5590 = vmatmul.mubr.bf16.vlgmr.msra.gmra.mrb[0].mxu0 %v6188_v3  ;;  %v1570_v3 = vrot.slane %v1569_v6, 4  ;;  %v1830_v6 = vsel %vm6948_vm13, %v5063_v62, %v1829_v63  ;;  %444 = vst [vmem:[#allocation3 + $0x1c] sm:$0x1] %v443_v24  ;;  %v6218_v24 = vld [vmem:[#allocation2 + $0x30] ss:$8 sps:$4 sm:$0xff]  }
 0x170   : > { %5593 = vmatprep.mubr.bf16.mxu0 %v6190_v39  ;;  %5598 = vmatpush3.bf16.msra.mxu0 %v6189_v20  ;;  %v1611_v20 = vor.u32 %v1610_v53, %v1607_v11  ;;  %v1621_v39 = vrot.slane %v1619_v22, 4  ;;  %v6201_v11 = vld [vmem:[#allocation7 + $0x150] sm:$0xff]   ;;  %v413_v22 = vsel %vm6716_vm2, 0, %v412_v9  ;;  %v6219_v9 = vld [vmem:[#allocation7 + $0x1c8] sm:$0xff]  }
 0x171   : > { %5599 = vmatprep.subr.bf16.mxu0 %v6191_v32  ;;  %414 = vst [vmem:[#allocation3 + $0x18] sm:$0x1] %v413_v22 }
 0x172   : > { %v1612_v13 = vrot.slane %v1611_v20, 4  ;;  %v1625_v4 = vor.u32 %v1624_v40, %v1621_v39  ;;  %v1802_v20 = vld [vmem:[#allocation2 + $0x20] sm:$0xe]  ;;  %v1837_v39 = vrot.slane %v7019_v2, 5  ;;  %v5066_v40 = vrot.slane %v1803_v12, 9 }
 0x173   : > { %v5065_v37 = vrot.slane %v1802_v20, 9 }
 0x174   : > { %5600 = vmatpush3.bf16.msra.mxu0 %v6191_v32  ;;  %v1574_v32 = vrot.slane %v1572_v7, 5  ;;  %v1617_v52 = vsel %vm6889_vm10, %v1612_v13, %v1616_v45  ;;  %v1626_v30 = vrot.slane %v1625_v4, 4 }
 0x175   : > { %5601 = vmatprep.subr.bf16.mxu0 %v6193_v8  ;;  %v1838_v45 = vsel %vm6948_vm13, %v5065_v37, %v1837_v39  ;;  %v2182_v39 = vld [vmem:[#allocation2 + $0x20] sm:$0xf] }
 0x177   : > { %5594 = vmatmul.mubr.bf16.gmra.mrb[4].mxu0 %v6192_v46  ;;  %v7029_v46 = vld [vmem:[#allocation2 + $0x3c] sm:$0x1] }
 0x178   : > { %5602 = vmatpush3.bf16.msra.mxu0 %v6193_v8  ;;  %5613 = vmatprep.mubr.bf16.mxu0 %v5050_v19  ;;  %v1638_v8 = vrot.slane %v1636_v27, 5  ;;  %v6199_v19 = vld [vmem:[#allocation7 + $0x140] sm:$0xff]   ;;  %v1628_v33 = vshll.u32 %v7029_v46, 16  ;;  %v6204_v27 = vld [vmem:[#allocation7 + $0x168] sm:$0xff]   ;;  %v1849_v4 = vrot.slane %v7029_v46, 5 }
 0x179   : > { %5603 = vmatprep.subr.bf16.mxu0 %v6194_v28  ;;  %v6212_v46 = vld [vmem:[#allocation7 + $0x1a0] sm:$0xff]  }
 0x17a   : > { %v1630_v55 = vrot.slane %v1628_v33, 5 }
 0x17c   : > { %5604 = vmatpush3.bf16.msra.mxu0 %v6194_v28  ;;  %v1575_v28 = vsel %vm6889_vm10, %v1570_v3, %v1574_v32  ;;  %v1631_v53 = vsel %vm6889_vm10, %v1626_v30, %v1630_v55  ;;  %v6206_v3 = vld [vmem:[#allocation7 + $0x178] sm:$0xff]   ;;  %v5064_v32 = vrot.slane %v1801_v31, 9  ;;  %v2178_v30 = vld [vmem:[#allocation2 + $0x10] sm:$0xf] }
 0x17d   : > { %5605 = vmatprep.subr.bf16.mxu0 %v6195_v44  ;;  %v5051_v38 = vcombine.low %v1575_v28, %v1589_v41  ;;  %v1805_v28 = vld [vmem:[#allocation2 + $0x38] sm:$0xe]  ;;  %v2198_v62 = vshll.u32 %v2178_v30, 16 }
 0x17e   : > { %v1834_v13 = vsel %vm6948_vm13, %v5064_v32, %v1833_v35  ;;  %v5068_v33 = vrot.slane %v1805_v28, 9  ;;  %v2180_v55 = vld [vmem:[#allocation2 + $0x18] sm:$0xf] }
 0x17f   : > { %v6222_v35 = vld [vmem:[#allocation7 + $0x1d8] sm:$0xff]  }
 0x180   : > { %5606 = vmatpush3.bf16.msra.mxu0 %v6195_v44  ;;  %v1639_v44 = vor.u32 %v1638_v8, %v1635_v42  ;;  %v1841_v42 = vrot.slane %v7023_v17, 5  ;;  %v1806_v17 = vld [vmem:[#allocation2 + $0x40] sm:$0xe] }
 0x181   : > { %5607 = vmatprep.subr.bf16.mxu0 %v6196_v56 }
 0x182   : > { %v1640_v57 = vrot.slane %v1639_v44, 4  ;;  %v1842_v49 = vsel %vm6948_vm13, %v5066_v40, %v1841_v42  ;;  %v5069_v44 = vrot.slane %v1806_v17, 9  ;;  %v2184_v40 = vld [vmem:[#allocation2 + $0x28] sm:$0xf]  ;;  %v2186_v42 = vld [vmem:[#allocation2 + $0x30] sm:$0xf] }
 0x183   : > { %v2240_v28 = vshll.u32 %v2184_v40, 16 }
 0x184   : > { %5608 = vmatpush3.bf16.msra.mxu0 %v6196_v56  ;;  %v5052_v56 = vcombine.low %v1603_v51, %v1617_v52  ;;  %v1645_v1 = vsel %vm6889_vm10, %v1640_v57, %v1644_v58  ;;  %v6209_v51 = vld [vmem:[#allocation7 + $0x190] sm:$0xff]   ;;  %v1850_v52 = vsel %vm6948_vm13, %v5068_v33, %v1849_v4  ;;  %v1854_v25 = vsel %vm6948_vm13, %v5069_v44, %v1853_v50  ;;  %v2190_v50 = vld [vmem:[#allocation2 + $0x40] sm:$0xf] }
 0x185   : > { %5609 = vmatprep.subr.bf16.mxu0 %v6197_v15  ;;  %v5053_v47 = vcombine.low %v1631_v53, %v1645_v1  ;;  %v5073_v54 = vcombine.low %v1850_v52, %v1854_v25  ;;  %v2209_v57 = vshrl.u32 %v2180_v55, 16  ;;  %v2212_v58 = vshll.u32 %v2180_v55, 16  ;;  %v6217_v53 = vld [vmem:[#allocation7 + $0x1c0] sm:$0xff]  }
 0x186   : > { %v2242_v44 = vrot.slane %v2240_v28, 5  ;;  %v2460_v28 = vld [vmem:[#allocation2 + $0x18] sm:$0xe] }
 0x187   : > { %v2211_v63 = vrot.slane %v2209_v57, 4 }
 0x188   : > { %5610 = vmatpush3.bf16.msra.mxu0 %v6197_v15  ;;  %v1826_v15 = vsel %vm6948_vm13, %v5062_v60, %v1825_v61  ;;  %v6215_v60 = vld [vmem:[#allocation7 + $0x1b8] sm:$0xff]   ;;  %v2195_v61 = vshrl.u32 %v2178_v30, 16 }
 0x189   : > { %5611 = vmatprep.subr.bf16.mxu0 %v6198_v16  ;;  %v5070_v7 = vcombine.low %v1826_v15, %v1830_v6  ;;  %v2200_v15 = vrot.slane %v2198_v62, 5  ;;  %v7075_v6 = vld [vmem:[#allocation2 + $0x1c] sm:$0x1]  ;;  %v2282_v62 = vshll.u32 %v2190_v50, 16 }
 0x18a   : > { %v2197_v1 = vrot.slane %v2195_v61, 4  ;;  %v2218_v22 = vshll.u32 %v7075_v6, 16  ;;  %v2279_v61 = vshrl.u32 %v2190_v50, 16  ;;  %v2489_v50 = vrot.slane %v7075_v6, 5 }
 0x18c   : > { %5612 = vmatpush3.bf16.msra.mxu0 %v6198_v16  ;;  %v1804_v16 = vld [vmem:[#allocation2 + $0x30] sm:$0xe]  ;;  %v2201_v14 = vor.u32 %v2200_v15, %v2197_v1  ;;  %v2220_v20 = vrot.slane %v2218_v22, 5 }
 0x18d   : > { %5621 = vmatprep.subr.bf16.mxu0 %v6199_v19  ;;  %v5067_v8 = vrot.slane %v1804_v16, 9 }
 0x18e   : > { %v2202_v31 = vrot.slane %v2201_v14, 4 }
 0x18f   : > { %5614 = vmatmul.mubr.bf16.vlgmr.msra.gmra.mrb[0].mxu0 %v5051_v38  ;;  %v1846_v2 = vsel %vm6948_vm13, %v5067_v8, %v1845_v5  ;;  %v6211_v38 = vld [vmem:[#allocation7 + $0x198] sm:$0xff]   ;;  %v6223_v5 = vld [vmem:[#allocation7 + $0x1e0] sm:$0xff]  }
 0x190   : > { %5617 = vmatprep.mubr.bf16.mxu0 %v5052_v56  ;;  %5622 = vmatpush3.bf16.msra.mxu0 %v6199_v19  ;;  %v5071_v19 = vcombine.low %v1834_v13, %v1838_v45  ;;  %v5072_v41 = vcombine.low %v1842_v49, %v1846_v2  ;;  %v6214_v56 = vld [vmem:[#allocation7 + $0x1b0] sm:$0xff]   ;;  %v2188_v8 = vld [vmem:[#allocation2 + $0x38] sm:$0xf]  ;;  %v2226_v13 = vshll.u32 %v2182_v39, 16  ;;  %v2237_v45 = vshrl.u32 %v2184_v40, 16 }
 0x191   : > { %5623 = vmatprep.subr.bf16.mxu0 %v6200_v10  ;;  %v2251_v49 = vshrl.u32 %v2186_v42, 16  ;;  %v2254_v2 = vshll.u32 %v2186_v42, 16  ;;  %v2265_v17 = vshrl.u32 %v2188_v8, 16 }
 0x192   : > { %v2239_v4 = vrot.slane %v2237_v45, 4 }
 0x193   : > { %v2256_v52 = vrot.slane %v2254_v2, 5  ;;  %v2267_v25 = vrot.slane %v2265_v17, 4  ;;  %v6228_v2 = vld [vmem:[#allocation7 + $0x208] sm:$0xff]  }
 0x194   : > { %5624 = vmatpush3.bf16.msra.mxu0 %v6200_v10  ;;  %v6210_v10 = vld [vmem:[#allocation2 + $0x10] ss:$8 sps:$4 sm:$0xff]   ;;  %v2243_v30 = vor.u32 %v2242_v44, %v2239_v4  ;;  %v5107_v44 = vrot.slane %v2460_v28, 9 }
 0x195   : > { %5625 = vmatprep.subr.bf16.mxu0 %v6201_v11  ;;  %v2459_v4 = vld [vmem:[#allocation2 + $0x10] sm:$0xe] }
 0x196   : > { %v2244_v22 = vrot.slane %v2243_v30, 4 }
 0x197   : > { %5618 = vmatmul.mubr.bf16.gmra.mrb[4].mxu0 %v5053_v47 }
 0x198   : > { %5626 = vmatpush3.bf16.msra.mxu0 %v6201_v11  ;;  %5637 = vmatprep.mubr.bf16.mxu0 %v5070_v7  ;;  %v2214_v11 = vrot.slane %v2212_v58, 5  ;;  %v6216_v7 = vld [vmem:[#allocation2 + $0x20] ss:$8 sps:$4 sm:$0xff]   ;;  %v7091_v58 = vld [vmem:[#allocation2 + $0x34] sm:$0x1] }
 0x199   : > { %5627 = vmatprep.subr.bf16.mxu0 %v6202_v34  ;;  %v2260_v1 = vshll.u32 %v7091_v58, 16 }
 0x19a   : > { %v2215_v47 = vor.u32 %v2214_v11, %v2211_v63 }
 0x19c   : > { %5628 = vmatpush3.bf16.msra.mxu0 %v6202_v34  ;;  %v7077_v34 = vld [vmem:[#allocation2 + $0x14] sm:$0x1] }
 0x19d   : > { %5629 = vmatprep.subr.bf16.mxu0 %v6203_v26 }
 0x1a0   : > { %5630 = vmatpush3.bf16.msra.mxu0 %v6203_v26  ;;  %v2204_v26 = vshll.u32 %v7077_v34, 16 }
 0x1a1   : > { %5631 = vmatprep.subr.bf16.mxu0 %v6204_v27 }
 0x1a2   : > { %v2206_v12 = vrot.slane %v2204_v26, 5  ;;  %v2281_v26 = vrot.slane %v2279_v61, 4  ;;  %v6233_v61 = vld [vmem:[#allocation7 + $0x230] sm:$0xff]  }
 0x1a4   : > { %5632 = vmatpush3.bf16.msra.mxu0 %v6204_v27  ;;  %v2216_v27 = vrot.slane %v2215_v47, 4  ;;  %v2207_v32 = vsel %vm6889_vm10, %v2202_v31, %v2206_v12  ;;  %v2262_v12 = vrot.slane %v2260_v1, 5  ;;  %v6234_v1 = vld [vmem:[#allocation7 + $0x238] sm:$0xff]  }
 0x1a5   : > { %5633 = vmatprep.subr.bf16.mxu0 %v6205_v29 }
 0x1a6   : > { %v2221_v16 = vsel %vm6889_vm10, %v2216_v27, %v2220_v20  ;;  %v2284_v27 = vrot.slane %v2282_v62, 5  ;;  %v2461_v62 = vld [vmem:[#allocation2 + $0x20] sm:$0xe] }
 0x1a7   : > { %v5094_v37 = vcombine.low %v2207_v32, %v2221_v16  ;;  %v7097_v32 = vld [vmem:[#allocation2 + $0x44] sm:$0x1] }
 0x1a8   : > { %5634 = vmatpush3.bf16.msra.mxu0 %v6205_v29  ;;  %v6221_v29 = vld [vmem:[#allocation7 + $0x1d0] sm:$0xff]   ;;  %v2288_v40 = vshll.u32 %v7097_v32, 16 }
 0x1a9   : > { %5635 = vmatprep.subr.bf16.mxu0 %v6206_v3 }
 0x1aa   : > { %v2290_v17 = vrot.slane %v2288_v40, 5 }
 0x1ac   : > { %5636 = vmatpush3.bf16.msra.mxu0 %v6206_v3  ;;  %v6220_v3 = vld [vmem:[#allocation2 + $0x40] ss:$8 sps:$4 sm:$0xff]  }
 0x1ad   : > { %5645 = vmatprep.subr.bf16.mxu0 %v6207_v43 }
 0x1af   : > { %5638 = vmatmul.mubr.bf16.vlgmr.msra.gmra.mrb[0].mxu0 %v5071_v19  ;;  %v2268_v19 = vshll.u32 %v2188_v8, 16  ;;  %v2285_v8 = vor.u32 %v2284_v27, %v2281_v26 }
 0x1b0   : > { %5641 = vmatprep.mubr.bf16.mxu0 %v5072_v41  ;;  %5646 = vmatpush3.bf16.msra.mxu0 %v6207_v43  ;;  %v2223_v43 = vshrl.u32 %v2182_v39, 16  ;;  %v2228_v41 = vrot.slane %v2226_v13, 5  ;;  %v7101_v39 = vld [vmem:[#allocation2 + $0x4c] sm:$0x1] }
 0x1b1   : > { %5647 = vmatprep.subr.bf16.mxu0 %v6208_v18 }
 0x1b2   : > { %v2225_v33 = vrot.slane %v2223_v43, 4  ;;  %v2302_v43 = vshll.u32 %v7101_v39, 16 }
 0x1b4   : > { %5648 = vmatpush3.bf16.msra.mxu0 %v6208_v18  ;;  %v6224_v18 = vld [vmem:[#allocation7 + $0x1e8] sm:$0xff]   ;;  %v2229_v55 = vor.u32 %v2228_v41, %v2225_v33  ;;  %v2304_v41 = vrot.slane %v2302_v43, 5 }
 0x1b5   : > { %5649 = vmatprep.subr.bf16.mxu0 %v6209_v51 }
 0x1b7   : > { %5642 = vmatmul.mubr.bf16.gmra.mrb[4].mxu0 %v5073_v54  ;;  %v2270_v54 = vrot.slane %v2268_v19, 5 }
 0x1b8   : > { %5650 = vmatpush3.bf16.msra.mxu0 %v6209_v51  ;;  %5661 = vmatprep.mubr.bf16.mxu0 %v6210_v10  ;;  %v2253_v51 = vrot.slane %v2251_v49, 4  ;;  %v7085_v10 = vld [vmem:[#allocation2 + $0x24] sm:$0x1] }
 0x1b9   : > { %5651 = vmatprep.subr.bf16.mxu0 %v6211_v38  ;;  %v2271_v15 = vor.u32 %v2270_v54, %v2267_v25  ;;  %v2485_v25 = vrot.slane %v7077_v34, 5  ;;  %v6231_v34 = vld [vmem:[#allocation7 + $0x220] sm:$0xff]  }
 0x1bb   : > { %v2272_v16 = vrot.slane %v2271_v15, 4  ;;  %v5108_v15 = vrot.slane %v2461_v62, 9  ;;  %v6238_v62 = vld [vmem:[#allocation9 + $0x58] sm:$0xff]  }
 0x1bc   : > { %5652 = vmatpush3.bf16.msra.mxu0 %v6211_v38  ;;  %v2192_v38 = vld [vmem:[#allocation2 + $0x48] sm:$0xf] }
 0x1bd   : > { %5653 = vmatprep.subr.bf16.mxu0 %v6212_v46  ;;  %v2293_v63 = vshrl.u32 %v2192_v38, 16  ;;  %v2296_v11 = vshll.u32 %v2192_v38, 16 }
 0x1bf   : > { %v2298_v31 = vrot.slane %v2296_v11, 5  ;;  %v2463_v11 = vld [vmem:[#allocation2 + $0x30] sm:$0xe] }
 0x1c0   : > { %5654 = vmatpush3.bf16.msra.mxu0 %v6212_v46  ;;  %v7087_v46 = vld [vmem:[#allocation2 + $0x2c] sm:$0x1] }
 0x1c1   : > { %5655 = vmatprep.subr.bf16.mxu0 %v6213_v48  ;;  %v2246_v57 = vshll.u32 %v7087_v46, 16 }
 0x1c4   : > { %5656 = vmatpush3.bf16.msra.mxu0 %v6213_v48  ;;  %v6225_v48 = vld [vmem:[#allocation7 + $0x1f0] sm:$0xff]  }
 0x1c5   : > { %5657 = vmatprep.subr.bf16.mxu0 %v6214_v56 }
 0x1c8   : > { %5658 = vmatpush3.bf16.msra.mxu0 %v6214_v56  ;;  %v2232_v56 = vshll.u32 %v7085_v10, 16 }
 0x1c9   : > { %5659 = vmatprep.subr.bf16.mxu0 %v6215_v60 }
 0x1ca   : > { %v2234_v14 = vrot.slane %v2232_v56, 5  ;;  %v6230_v56 = vld [vmem:[#allocation7 + $0x218] sm:$0xff]  }
 0x1cc   : > { %5660 = vmatpush3.bf16.msra.mxu0 %v6215_v60  ;;  %v7093_v60 = vld [vmem:[#allocation2 + $0x3c] sm:$0x1] }
 0x1cd   : > { %5669 = vmatprep.subr.bf16.mxu0 %v6217_v53  ;;  %v2274_v47 = vshll.u32 %v7093_v60, 16  ;;  %v2505_v26 = vrot.slane %v7093_v60, 5 }
 0x1cf   : > { %5662 = vmatmul.mubr.bf16.vlgmr.msra.gmra.mrb[0].mxu0 %v6216_v7  ;;  %v6226_v7 = vld [vmem:[#allocation7 + $0x1f8] sm:$0xff]  }
 0x1d0   : > { %5665 = vmatprep.mubr.bf16.mxu0 %v6218_v24  ;;  %5670 = vmatpush3.bf16.msra.mxu0 %v6217_v53  ;;  %v2257_v53 = vor.u32 %v2256_v52, %v2253_v51  ;;  %v2248_v24 = vrot.slane %v2246_v57, 5  ;;  %v6229_v51 = vld [vmem:[#allocation7 + $0x210] sm:$0xff]   ;;  %v5106_v52 = vrot.slane %v2459_v4, 9  ;;  %v6232_v57 = vld [vmem:[#allocation7 + $0x228] sm:$0xff]  }
 0x1d1   : > { %5671 = vmatprep.subr.bf16.mxu0 %v6219_v9  ;;  %v454_v4 = vld [vmem:[#allocation3 + $0x3c] sm:$0x1] }
 0x1d2   : > { %v2258_v20 = vrot.slane %v2257_v53, 4  ;;  %v2249_v42 = vsel %vm6889_vm10, %v2244_v22, %v2248_v24  ;;  %v2486_v6 = vsel %vm6948_vm13, %v5106_v52, %v2485_v25  ;;  %v2464_v53 = vld [vmem:[#allocation2 + $0x38] sm:$0xe]  ;;  %v2501_v22 = vrot.slane %v7091_v58, 5  ;;  %v6236_v52 = vld [vmem:[#allocation9 + $0x48] sm:$0xff]  }
 0x1d3   : > { %v5111_v24 = vrot.slane %v2464_v53, 9  ;;  %v448_v25 = vld [vmem:[#allocation3 + $0x2c] sm:$0x1]  ;;  %v6239_v53 = vld [vmem:[#allocation9 + $0x60] sm:$0xff]  }
 0x1d4   : > { %5672 = vmatpush3.bf16.msra.mxu0 %v6219_v9  ;;  %v2230_v9 = vrot.slane %v2229_v55, 4  ;;  %v2263_v13 = vsel %vm6889_vm10, %v2258_v20, %v2262_v12  ;;  %v2466_v20 = vld [vmem:[#allocation2 + $0x48] sm:$0xe] }
 0x1d5   : > { %5673 = vmatprep.subr.bf16.mxu0 %v6221_v29 }
 0x1d7   : > { %5666 = vmatmul.mubr.bf16.gmra.mrb[4].mxu0 %v6220_v3  ;;  %v2276_v3 = vrot.slane %v2274_v47, 5  ;;  %v2493_v47 = vrot.slane %v7085_v10, 5 }
 0x1d8   : > { %5674 = vmatpush3.bf16.msra.mxu0 %v6221_v29  ;;  %5685 = vmatprep.mubr.bf16.mxu0 %v5094_v37  ;;  %v2295_v29 = vrot.slane %v2293_v63, 4  ;;  %v6227_v37 = vld [vmem:[#allocation7 + $0x200] sm:$0xff]   ;;  %v2462_v63 = vld [vmem:[#allocation2 + $0x28] sm:$0xe] }
 0x1d9   : > { %5675 = vmatprep.subr.bf16.mxu0 %v6222_v35  ;;  %v2277_v45 = vsel %vm6889_vm10, %v2272_v16, %v2276_v3  ;;  %v2494_v27 = vsel %vm6948_vm13, %v5108_v15, %v2493_v47  ;;  %v2509_v16 = vrot.slane %v7097_v32, 5  ;;  %v5113_v3 = vrot.slane %v2466_v20, 9  ;;  %v6240_v47 = vld [vmem:[#allocation9 + $0x68] sm:$0xff]  }
 0x1da   : > { %v5096_v19 = vcombine.low %v2263_v13, %v2277_v45  ;;  %v415_v13 = vld [vmem:[#allocation3 + $0x20] sm:$0x1] }
 0x1db   : > { %v416_v45 = vsel %vm6716_vm2, 0, %v415_v13 }
 0x1dc   : > { %5676 = vmatpush3.bf16.msra.mxu0 %v6222_v35  ;;  %v2235_v35 = vsel %vm6889_vm10, %v2230_v9, %v2234_v14  ;;  %v2497_v9 = vrot.slane %v7087_v46, 5  ;;  %v5110_v14 = vrot.slane %v2463_v11, 9  ;;  %v2506_v46 = vsel %vm6948_vm13, %v5111_v24, %v2505_v26  ;;  %417 = vst [vmem:[#allocation3 + $0x20] sm:$0x1] %v416_v45  ;;  %v433_v11 = vld [vmem:[#allocation3 + $0x4] sm:$0x1] }
 0x1dd   : > { %5677 = vmatprep.subr.bf16.mxu0 %v6223_v5  ;;  %v5095_v49 = vcombine.low %v2235_v35, %v2249_v42  ;;  %v2513_v35 = vrot.slane %v7101_v39, 5  ;;  %v445_v39 = vld [vmem:[#allocation3 + $0x24] sm:$0x1]  ;;  %v434_v15 = vsel %vm6748_vm4, 0, %v433_v11  ;;  %v460_v24 = vld [vmem:[#allocation3 + $0x4c] sm:$0x1] }
 0x1de   : > { %v2502_v10 = vsel %vm6948_vm13, %v5110_v14, %v2501_v22  ;;  %v446_v28 = vsel %vm6748_vm4, 0, %v445_v39  ;;  %435 = vst [vmem:[#allocation3 + $0x4] sm:$0x1] %v434_v15  ;;  %v7171_v14 = vld [vmem:[#allocation9] sm:$0xff]   ;;  %v430_v22 = vld [vmem:[#allocation3 + $0x48] sm:$0x1] }
 0x1df   : > { %v5116_v60 = vcombine.low %v2502_v10, %v2506_v46  ;;  %v2514_v40 = vsel %vm6948_vm13, %v5113_v3, %v2513_v35  ;;  %447 = vst [vmem:[#allocation3 + $0x24] sm:$0x1] %v446_v28  ;;  %v431_v26 = vsel %vm6716_vm2, 0, %v430_v22  ;;  %v7188_v46 = vld [vmem:[%s7565_s3] ss:$0 sm:$0xff] }
 0x1e0   : > { %5678 = vmatpush3.bf16.msra.mxu0 %v6223_v5  ;;  %v2299_v5 = vor.u32 %v2298_v31, %v2295_v29  ;;  %v2465_v31 = vld [vmem:[#allocation2 + $0x40] sm:$0xe]  ;;  %432 = vst [vmem:[#allocation3 + $0x48] sm:$0x1] %v431_v26 }
 0x1e1   : > { %5679 = vmatprep.subr.bf16.mxu0 %v6224_v18  ;;  %v5112_v12 = vrot.slane %v2465_v31, 9  ;;  %v7183_v31 = vld [vmem:[%s7564_s2] ss:$0 sm:$0xff] }
 0x1e2   : > { %v2300_v33 = vrot.slane %v2299_v5, 4  ;;  %v436_v5 = vld [vmem:[#allocation3 + $0xc] sm:$0x1] }
 0x1e3   : > { %v437_v32 = vsel %vm6748_vm4, 0, %v436_v5  ;;  %v2837_v22 = vld [vmem:[#allocation3 + $0x20] sm:$0xf] }
 0x1e4   : > { %5680 = vmatpush3.bf16.msra.mxu0 %v6224_v18  ;;  %v2286_v18 = vrot.slane %v2285_v8, 4  ;;  %v2305_v38 = vsel %vm6889_vm10, %v2300_v33, %v2304_v41  ;;  %v406_v8 = vld [vmem:[#allocation3 + $0x8] sm:$0x1]  ;;  %438 = vst [vmem:[#allocation3 + $0xc] sm:$0x1] %v437_v32 }
 0x1e5   : > { %5681 = vmatprep.subr.bf16.mxu0 %v6225_v48  ;;  %v407_v43 = vsel %vm6716_vm2, 0, %v406_v8  ;;  %v424_v33 = vld [vmem:[#allocation3 + $0x38] sm:$0x1] }
 0x1e6   : > { %v2291_v54 = vsel %vm6889_vm10, %v2286_v18, %v2290_v17  ;;  %408 = vst [vmem:[#allocation3 + $0x8] sm:$0x1] %v407_v43  ;;  %v6235_v18 = vld [vmem:[#allocation9 + $0x40] sm:$0xff]   ;;  %v425_v41 = vsel %vm6716_vm2, 0, %v424_v33 }
 0x1e7   : > { %v5097_v55 = vcombine.low %v2291_v54, %v2305_v38  ;;  %5717 = vmatprep.subr.bf16.mxu1 %v6235_v18  ;;  %426 = vst [vmem:[#allocation3 + $0x38] sm:$0x1] %v425_v41  ;;  %v427_v54 = vld [vmem:[#allocation3 + $0x40] sm:$0x1]  ;;  %v449_v38 = vsel %vm6748_vm4, 0, %v448_v25 }
 0x1e8   : > { %5682 = vmatpush3.bf16.msra.mxu0 %v6225_v48  ;;  %v2490_v48 = vsel %vm6948_vm13, %v5107_v44, %v2489_v50  ;;  %v455_v44 = vsel %vm6748_vm4, 0, %v454_v4  ;;  %5718 = vmatpush3.bf16.msra.mxu1 %v6235_v18  ;;  %v418_v50 = vld [vmem:[#allocation3 + $0x28] sm:$0x1]  ;;  %450 = vst [vmem:[#allocation3 + $0x2c] sm:$0x1] %v449_v38 }
 0x1e9   : > { %5683 = vmatprep.subr.bf16.mxu0 %v6226_v7  ;;  %v5114_v30 = vcombine.low %v2486_v6, %v2490_v48  ;;  %456 = vst [vmem:[#allocation3 + $0x3c] sm:$0x1] %v455_v44  ;;  %5719 = vmatprep.subr.bf16.mxu1 %v6236_v52  ;;  %v428_v48 = vsel %vm6716_vm2, 0, %v427_v54  ;;  %v2834_v25 = vld [vmem:[#allocation3 + $0x1c] sm:$0x1] }
 0x1ea   : > { %429 = vst [vmem:[#allocation3 + $0x40] sm:$0x1] %v428_v48 }
 0x1eb   : > { %v2822_v11 = vld [vmem:[#allocation3 + $0xc] sm:$0x1] }
 0x1ec   : > { %5684 = vmatpush3.bf16.msra.mxu0 %v6226_v7  ;;  %v5109_v7 = vrot.slane %v2462_v63, 9  ;;  %5720 = vmatpush3.bf16.msra.mxu1 %v6236_v52  ;;  %v403_v63 = vld [vmem:[#allocation3] sm:$0x1]  ;;  %v2831_v52 = vld [vmem:[#allocation3 + $0x18] sm:$0xf] }
 0x1ed   : > { %5693 = vmatprep.subr.bf16.mxu0 %v6227_v37 }
 0x1ee   : > { %v2498_v29 = vsel %vm6948_vm13, %v5109_v7, %v2497_v9  ;;  %v6241_v7 = vld [vmem:[#allocation9 + $0x70] sm:$0xff]   ;;  %v6242_v9 = vld [vmem:[#allocation9 + $0x78] sm:$0xff]  }
 0x1ef   : > { %5686 = vmatmul.mubr.bf16.vlgmr.msra.gmra.mrb[0].mxu0 %v5095_v49  ;;  %v5115_v58 = vcombine.low %v2494_v27, %v2498_v29  ;;  %v409_v49 = vld [vmem:[#allocation3 + $0x10] sm:$0x1]  ;;  %v461_v27 = vsel %vm6748_vm4, 0, %v460_v24 }
 0x1f0   : > { %5689 = vmatprep.mubr.bf16.mxu0 %v5096_v19  ;;  %5694 = vmatpush3.bf16.msra.mxu0 %v6227_v37  ;;  %v2510_v37 = vsel %vm6948_vm13, %v5112_v12, %v2509_v16  ;;  %v410_v17 = vsel %vm6716_vm2, 0, %v409_v49  ;;  %462 = vst [vmem:[#allocation3 + $0x4c] sm:$0x1] %v461_v27  ;;  %v7204_v49 = vld [vmem:[#allocation3 + $0x4] sm:$0x1] }
 0x1f1   : > { %5695 = vmatprep.subr.bf16.mxu0 %v6228_v2  ;;  %v5117_v42 = vcombine.low %v2510_v37, %v2514_v40  ;;  %411 = vst [vmem:[#allocation3 + $0x10] sm:$0x1] %v410_v17  ;;  %v2909_v33 = vshll.u32 %v7204_v49, 16 }
 0x1f4   : > { %5696 = vmatpush3.bf16.msra.mxu0 %v6228_v2  ;;  %v439_v2 = vld [vmem:[#allocation3 + $0x14] sm:$0x1] }
 0x1f5   : > { %5697 = vmatprep.subr.bf16.mxu0 %v6229_v51  ;;  %v440_v19 = vsel %vm6748_vm4, 0, %v439_v2 }
 0x1f6   : > { %441 = vst [vmem:[#allocation3 + $0x14] sm:$0x1] %v440_v19 }
 0x1f7   : > { %5690 = vmatmul.mubr.bf16.gmra.mrb[4].mxu0 %v5097_v55  ;;  %v457_v55 = vld [vmem:[#allocation3 + $0x44] sm:$0x1] }
 0x1f8   : > { %5698 = vmatpush3.bf16.msra.mxu0 %v6229_v51  ;;  %5709 = vmatprep.mubr.bf16.mxu0 %v5114_v30  ;;  %v419_v51 = vsel %vm6716_vm2, 0, %v418_v50  ;;  %v458_v6 = vsel %vm6748_vm4, 0, %v457_v55  ;;  %v451_v30 = vld [vmem:[#allocation3 + $0x34] sm:$0x1] }
 0x1f9   : > { %5699 = vmatprep.subr.bf16.mxu0 %v6230_v56  ;;  %420 = vst [vmem:[#allocation3 + $0x28] sm:$0x1] %v419_v51  ;;  %459 = vst [vmem:[#allocation3 + $0x44] sm:$0x1] %v458_v6 }
 0x1fc   : > { %5700 = vmatpush3.bf16.msra.mxu0 %v6230_v56  ;;  %v421_v56 = vld [vmem:[#allocation3 + $0x30] sm:$0x1] }
 0x1fd   : > { %5701 = vmatprep.subr.bf16.mxu0 %v6231_v34 }
 0x200   : > { %5702 = vmatpush3.bf16.msra.mxu0 %v6231_v34  ;;  %v6237_v34 = vld [vmem:[#allocation9 + $0x50] sm:$0xff]  }
 0x201   : > { %5703 = vmatprep.subr.bf16.mxu0 %v6232_v57  ;;  %5721 = vmatprep.subr.bf16.mxu1 %v6237_v34 }
 0x202   : > { %5722 = vmatpush3.bf16.msra.mxu1 %v6237_v34 }
 0x203   : > { %5723 = vmatprep.subr.bf16.mxu1 %v6238_v62 }
 0x204   : > { %5704 = vmatpush3.bf16.msra.mxu0 %v6232_v57  ;;  %v422_v57 = vsel %vm6716_vm2, 0, %v421_v56 }
 0x205   : > { %5705 = vmatprep.subr.bf16.mxu0 %v6233_v61  ;;  %423 = vst [vmem:[#allocation3 + $0x30] sm:$0x1] %v422_v57 }
 0x206   : > { %5724 = vmatpush3.bf16.msra.mxu1 %v6238_v62 }
 0x207   : > { %5725 = vmatprep.subr.bf16.mxu1 %v6239_v53 }
 0x208   : > { %5706 = vmatpush3.bf16.msra.mxu0 %v6233_v61  ;;  %v452_v61 = vsel %vm6748_vm4, 0, %v451_v30  ;;  %v2819_v30 = vld [vmem:[#allocation3 + $0x8] sm:$0xf] }
 0x209   : > { %5707 = vmatprep.subr.bf16.mxu0 %v6234_v1  ;;  %453 = vst [vmem:[#allocation3 + $0x34] sm:$0x1] %v452_v61 }
 0x20a   : > { %5726 = vmatpush3.bf16.msra.mxu1 %v6239_v53 }
 0x20b   : > { %5727 = vmatprep.subr.bf16.mxu1 %v6240_v47 }
 0x20c   : > { %5708 = vmatpush3.bf16.msra.mxu0 %v6234_v1  ;;  %v404_v1 = vsel %vm6716_vm2, 0, %v403_v63 }
 0x20d   : > { %405 = vst [vmem:[#allocation3] sm:$0x1] %v404_v1 }
 0x20e   : > { %5728 = vmatpush3.bf16.msra.mxu1 %v6240_v47 }
 0x20f   : > { %5710 = vmatmul.mubr.bf16.vlgmr.msra.gmra.mrb[0].mxu0 %v5115_v58  ;;  %5729 = vmatprep.subr.bf16.mxu1 %v6241_v7 }
 0x210   : > { %5713 = vmatprep.mubr.bf16.mxu0 %v5116_v60 }
 0x212   : > { %5730 = vmatpush3.bf16.msra.mxu1 %v6241_v7 }
 0x213   : > { %5731 = vmatprep.subr.bf16.mxu1 %v6242_v9 }
 0x214   : > { %v7178_v29 = vld [vmem:[#allocation3] sm:$0xf] }
 0x215   : > { %v2900_v20 = vshrl.u32 %v7178_v29, 16  ;;  %v2903_v21 = vshll.u32 %v7178_v29, 16 }
 0x216   : > { %5732 = vmatpush3.bf16.msra.mxu1 %v6242_v9 }
 0x217   : > { %5714 = vmatmul.mubr.bf16.gmra.mrb[4].mxu0 %v5117_v42  ;;  %5741 = vmatprep.subr.bf16.mxu1 %v7171_v14  ;;  %v7198_v8 = vrot.slane %v2900_v20, 4  ;;  %v7200_v5 = vrot.slane %v2903_v21, 5 }
 0x219   : > { %v2906_v18 = vor.u32 %v7200_v5, %v7198_v8 }
 0x2e2   : > { %v5711_v10 = vpop.f32.mrb[0].mxu0 }
 0x2e3   : > { %v2677_v58 = vmul.f32 %v5711_v10, %v7183_v31  ;;  %v2629_v12 = vpop.f32.mrb[1].mxu0  ;;  %v2840_v10 = vld [vmem:[#allocation3 + $0x24] sm:$0x1] }
 0x2e4   : > { %v2675_v60 = vmul.f32 %v7183_v31, %v2629_v12  ;;  %v5712_v16 = vpop.f32.mrb[2].mxu0 }
 0x2e5   : > { %v2692_v3 = vadd.f32 %v7188_v46, %v2677_v58  ;;  %v2678_v35 = vmul.f32 %v5712_v16, %v7183_v31  ;;  %v2632_v37 = vpop.f32.mrb[3].mxu0 }
 0x2e6   : > { %v2690_v40 = vadd.f32 %v7188_v46, %v2675_v60  ;;  %v2676_v42 = vmul.f32 %v7183_v31, %v2632_v37 }
 0x2e7   : > { %v2700_v43 = vmax.f32 %v2692_v3, 0.0  ;;  %v2693_v32 = vadd.f32 %v7188_v46, %v2678_v35  ;;  %v2825_v3 = vld [vmem:[#allocation3 + $0x10] sm:$0xf]  ;;  %v2828_v35 = vld [vmem:[#allocation3 + $0x14] sm:$0x1] }
 0x2e8   : > { %v2698_v13 = vmax.f32 %v2690_v40, 0.0  ;;  %v2691_v39 = vadd.f32 %v7188_v46, %v2676_v42 }
 0x2e9   : > { %v5278_v45 = vpack.c.bf16 %v2700_v43, %v2700_v43  ;;  %v2701_v28 = vmax.f32 %v2693_v32, 0.0 }
 0x2ea   : > { %v5276_v2 = vpack.c.bf16 %v2698_v13, %v2698_v13  ;;  %v2699_v17 = vmax.f32 %v2691_v39, 0.0  ;;  %v5715_v19 = vpop.f32.mrb[4].mxu0 }
 0x2eb   : > { %v2755_v41 = vshrl.u32 %v5278_v45, 16  ;;  %v2758_v4 = vshll.u32 %v5278_v45, 16  ;;  %v5279_v44 = vpack.c.bf16 %v2701_v28, %v2701_v28  ;;  %v2681_v50 = vmul.f32 %v5715_v19, %v7183_v31  ;;  %v2645_v51 = vpop.f32.mrb[5].mxu0 }
 0x2ec   : > { %v2739_v54 = vshrl.u32 %v5276_v2, 16  ;;  %v2742_v38 = vshll.u32 %v5276_v2, 16  ;;  %v5277_v48 = vpack.c.bf16 %v2699_v17, %v2699_v17  ;;  %v2679_v55 = vmul.f32 %v7183_v31, %v2645_v51  ;;  %v5716_v6 = vpop.f32.mrb[6].mxu0 }
 0x2ed   : > { %v2757_v56 = vrot.slane %v2755_v41, 7  ;;  %v2763_v34 = vshrl.u32 %v5279_v44, 16  ;;  %v2766_v57 = vshll.u32 %v5279_v44, 16  ;;  %v2696_v61 = vadd.f32 %v7188_v46, %v2681_v50  ;;  %v2648_v62 = vpop.f32.mrb[7].mxu0  ;;  %v2855_v44 = vld [vmem:[#allocation3 + $0x38] sm:$0xf] }
 0x2ee   : > { %v2741_v63 = vrot.slane %v2739_v54, 7  ;;  %v2747_v53 = vshrl.u32 %v5277_v48, 16  ;;  %v2750_v1 = vshll.u32 %v5277_v48, 16  ;;  %v2694_v15 = vadd.f32 %v7188_v46, %v2679_v55 }
 0x2ef   : > { %v2760_v47 = vor.u32 %v2758_v4, %v2757_v56  ;;  %v2761_v7 = vrot.slane %v2757_v56, 4  ;;  %v2765_v9 = vrot.slane %v2763_v34, 7  ;;  %v2704_v24 = vmax.f32 %v2696_v61, 0.0  ;;  %v2846_v56 = vld [vmem:[#allocation3 + $0x2c] sm:$0x1] }
 0x2f0   : > { %v2744_v26 = vor.u32 %v2742_v38, %v2741_v63  ;;  %v2745_v27 = vrot.slane %v2741_v63, 4  ;;  %v2749_v20 = vrot.slane %v2747_v53, 7  ;;  %v2702_v21 = vmax.f32 %v2694_v15, 0.0  ;;  %v2858_v38 = vld [vmem:[#allocation3 + $0x3c] sm:$0x1] }
 0x2f1   : > { %v2832_v58 = vsel %vm6829_vm7, %v2760_v47, %v2831_v52  ;;  %v2835_v12 = vsel %vm6716_vm2, %v2761_v7, %v2834_v25  ;;  %v2768_v60 = vor.u32 %v2766_v57, %v2765_v9  ;;  %v2769_v16 = vrot.slane %v2765_v9, 4 }
 0x2f2   : > { %2833 = vst [vmem:[#allocation3 + $0x18] sm:$0xf] %v2832_v58  ;;  %2836 = vst [vmem:[#allocation3 + $0x1c] sm:$0x1] %v2835_v12  ;;  %v2820_v37 = vsel %vm6829_vm7, %v2744_v26, %v2819_v30  ;;  %v2823_v40 = vsel %vm6716_vm2, %v2745_v27, %v2822_v11  ;;  %v2752_v42 = vor.u32 %v2750_v1, %v2749_v20  ;;  %v2753_v43 = vrot.slane %v2749_v20, 4 }
 0x2f3   : > { %2821 = vst [vmem:[#allocation3 + $0x8] sm:$0xf] %v2820_v37  ;;  %2824 = vst [vmem:[#allocation3 + $0xc] sm:$0x1] %v2823_v40  ;;  %v2838_v32 = vsel %vm6829_vm7, %v2768_v60, %v2837_v22  ;;  %v2841_v13 = vsel %vm6716_vm2, %v2769_v16, %v2840_v10  ;;  %v5282_v39 = vpack.c.bf16 %v2704_v24, %v2704_v24  ;;  %v7236_v52 = vrot.slane %v2906_v18, 4 }
 0x2f4   : > { %v5280_v45 = vpack.c.bf16 %v2702_v21, %v2702_v21  ;;  %2839 = vst [vmem:[#allocation3 + $0x20] sm:$0xf] %v2838_v32  ;;  %2842 = vst [vmem:[#allocation3 + $0x24] sm:$0x1] %v2841_v13  ;;  %v2826_v28 = vsel %vm6829_vm7, %v2752_v42, %v2825_v3  ;;  %v2829_v2 = vsel %vm6716_vm2, %v2753_v43, %v2828_v35  ;;  %v7240_v25 = vrot.slane %v2909_v33, 5 }
 0x2f5   : > { %v2682_v17 = vmul.f32 %v5716_v6, %v7183_v31  ;;  %v2680_v19 = vmul.f32 %v7183_v31, %v2648_v62  ;;  %2827 = vst [vmem:[#allocation3 + $0x10] sm:$0xf] %v2826_v28  ;;  %2830 = vst [vmem:[#allocation3 + $0x14] sm:$0x1] %v2829_v2  ;;  %v2787_v41 = vshrl.u32 %v5282_v39, 16  ;;  %v2790_v31 = vshll.u32 %v5282_v39, 16 }
 0x2f6   : > { %v2771_v4 = vshrl.u32 %v5280_v45, 16  ;;  %v2774_v55 = vshll.u32 %v5280_v45, 16  ;;  %v2843_v6 = vld [vmem:[#allocation3 + $0x28] sm:$0xf]  ;;  %v2912_v11 = vsel %vm6889_vm10, %v7236_v52, %v7240_v25  ;;  %v2861_v27 = vld [vmem:[#allocation3 + $0x40] sm:$0xf] }
 0x2f7   : > { %v2697_v50 = vadd.f32 %v7188_v46, %v2682_v17  ;;  %v2695_v51 = vadd.f32 %v7188_v46, %v2680_v19  ;;  %v2789_v54 = vrot.slane %v2787_v41, 7  ;;  %v2864_v10 = vld [vmem:[#allocation3 + $0x44] sm:$0x1]  ;;  %v2849_v21 = vld [vmem:[#allocation3 + $0x30] sm:$0xf] }
 0x2f8   : > { %v2773_v48 = vrot.slane %v2771_v4, 7  ;;  %v2852_v37 = vld [vmem:[#allocation3 + $0x34] sm:$0x1] }
 0x2f9   : > { %v2705_v30 = vmax.f32 %v2697_v50, 0.0  ;;  %v2703_v34 = vmax.f32 %v2695_v51, 0.0  ;;  %v2792_v57 = vor.u32 %v2790_v31, %v2789_v54  ;;  %v2793_v46 = vrot.slane %v2789_v54, 4  ;;  %v7242_v8 = vld [vmem:[#allocation3 + $0x18] sm:$0xf] }
 0x2fa   : > { %v2776_v61 = vor.u32 %v2774_v55, %v2773_v48  ;;  %v2777_v62 = vrot.slane %v2773_v48, 4  ;;  %v7244_v63 = vld [vmem:[#allocation3 + $0x8] sm:$0xf]  ;;  %v7246_v33 = vld [vmem:[#allocation3 + $0xc] sm:$0x1]  ;;  %v2942_v26 = vshrl.u32 %v7242_v8, 16 }
 0x2fb   : > { %v5283_v5 = vpack.c.bf16 %v2705_v30, %v2705_v30  ;;  %v5281_v18 = vpack.c.bf16 %v2703_v34, %v2703_v34  ;;  %v2856_v53 = vsel %vm6829_vm7, %v2792_v57, %v2855_v44  ;;  %v2859_v1 = vsel %vm6716_vm2, %v2793_v46, %v2858_v38  ;;  %v7270_v13 = vld [vmem:[#allocation3 + $0x1c] sm:$0x1]  ;;  %v7274_v41 = vld [vmem:[#allocation3 + $0x20] sm:$0xf] }
 0x2fc   : > { %v2844_v15 = vsel %vm6829_vm7, %v2776_v61, %v2843_v6  ;;  %v2847_v47 = vsel %vm6716_vm2, %v2777_v62, %v2846_v56  ;;  %2857 = vst [vmem:[#allocation3 + $0x38] sm:$0xf] %v2856_v53  ;;  %2860 = vst [vmem:[#allocation3 + $0x3c] sm:$0x1] %v2859_v1  ;;  %v7260_v24 = vld [vmem:[#allocation3 + $0x10] sm:$0xf] }
 0x2fd   : > { %2845 = vst [vmem:[#allocation3 + $0x28] sm:$0xf] %v2844_v15  ;;  %2848 = vst [vmem:[#allocation3 + $0x2c] sm:$0x1] %v2847_v47  ;;  %v2795_v7 = vshrl.u32 %v5283_v5, 16  ;;  %v2798_v9 = vshll.u32 %v5283_v5, 16 }
 0x2fe   : > { %v2779_v22 = vshrl.u32 %v5281_v18, 16  ;;  %v2782_v20 = vshll.u32 %v5281_v18, 16  ;;  %v2914_v58 = vshrl.u32 %v7244_v63, 16  ;;  %v2917_v12 = vshll.u32 %v7244_v63, 16  ;;  %v7266_v16 = vld [vmem:[#allocation3 + $0x14] sm:$0x1] }
 0x2ff   : > { %v2923_v60 = vshll.u32 %v7246_v33, 16  ;;  %v2797_v3 = vrot.slane %v2795_v7, 7  ;;  %v2928_v40 = vshrl.u32 %v7260_v24, 16  ;;  %v2931_v42 = vshll.u32 %v7260_v24, 16  ;;  %v7290_v5 = vld [vmem:[#allocation3 + $0x24] sm:$0x1] }
 0x300   : > { %v2781_v35 = vrot.slane %v2779_v22, 7  ;;  %v2916_v43 = vrot.slane %v2914_v58, 4  ;;  %v2919_v32 = vrot.slane %v2917_v12, 5  ;;  %v2937_v39 = vshll.u32 %v7266_v16, 16 }
 0x301   : > { %v2945_v45 = vshll.u32 %v7242_v8, 16  ;;  %v2800_v28 = vor.u32 %v2798_v9, %v2797_v3  ;;  %v2801_v2 = vrot.slane %v2797_v3, 4  ;;  %v2925_v44 = vrot.slane %v2923_v60, 5 }
 0x302   : > { %v2784_v17 = vor.u32 %v2782_v20, %v2781_v35  ;;  %v2785_v19 = vrot.slane %v2781_v35, 4  ;;  %v2920_v4 = vor.u32 %v2919_v32, %v2916_v43  ;;  %v2930_v50 = vrot.slane %v2928_v40, 4 }
 0x303   : > { %v2933_v51 = vrot.slane %v2931_v42, 5  ;;  %v2862_v54 = vsel %vm6829_vm7, %v2800_v28, %v2861_v27  ;;  %v2865_v31 = vsel %vm6716_vm2, %v2801_v2, %v2864_v10  ;;  %v2944_v56 = vrot.slane %v2942_v26, 4  ;;  %v7293_v53 = vld [vmem:[#allocation3 + $0x38] sm:$0xf]  ;;  %v7307_v58 = vld [vmem:[#allocation3 + $0x3c] sm:$0x1] }
 0x304   : > { %v2850_v38 = vsel %vm6829_vm7, %v2784_v17, %v2849_v21  ;;  %v2853_v48 = vsel %vm6716_vm2, %v2785_v19, %v2852_v37  ;;  %2863 = vst [vmem:[#allocation3 + $0x40] sm:$0xf] %v2862_v54  ;;  %2866 = vst [vmem:[#allocation3 + $0x44] sm:$0x1] %v2865_v31  ;;  %v2921_v55 = vrot.slane %v2920_v4, 4  ;;  %v2947_v30 = vrot.slane %v2945_v45, 5 }
 0x305   : > { %2851 = vst [vmem:[#allocation3 + $0x30] sm:$0xf] %v2850_v38  ;;  %2854 = vst [vmem:[#allocation3 + $0x34] sm:$0x1] %v2853_v48  ;;  %v2934_v6 = vor.u32 %v2933_v51, %v2930_v50  ;;  %v2939_v34 = vrot.slane %v2937_v39, 5  ;;  %v2951_v57 = vshll.u32 %v7270_v13, 16 }
 0x306   : > { %v7285_v46 = vld [vmem:[#allocation3 + $0x28] sm:$0xf]  ;;  %v2956_v61 = vshrl.u32 %v7274_v41, 16  ;;  %v2926_v23 = vsel %vm6889_vm10, %v2921_v55, %v2925_v44  ;;  %v2948_v62 = vor.u32 %v2947_v30, %v2944_v56  ;;  %v2959_v18 = vshll.u32 %v7274_v41, 16  ;;  %v7302_v22 = vld [vmem:[#allocation3 + $0x2c] sm:$0x1] }
 0x307   : > { %v2935_v0 = vrot.slane %v2934_v6, 4  ;;  %v5136_v1 = vcombine.low %v2912_v11, %v2926_v23  ;;  %v2953_v15 = vrot.slane %v2951_v57, 5  ;;  %v2970_v27 = vshrl.u32 %v7285_v46, 16  ;;  %v6244_v10 = vld [vmem:[#allocation9 + $0x8] sm:$0xff]   ;;  %v3295_v28 = vld [vmem:[#allocation3 + $0x10] sm:$0xe] }
 0x308   : > { %v2958_v47 = vrot.slane %v2956_v61, 4  ;;  %v2949_v9 = vrot.slane %v2948_v62, 4  ;;  %v2961_v26 = vrot.slane %v2959_v18, 5  ;;  %v2965_v20 = vshll.u32 %v7290_v5, 16  ;;  %v3296_v31 = vld [vmem:[#allocation3 + $0x18] sm:$0xe] }
 0x309   : > { %v2940_v7 = vsel %vm6889_vm10, %v2935_v0, %v2939_v34  ;;  %5733 = vmatprep.mubr.bf16.mxu1 %v5136_v1  ;;  %v2973_v21 = vshll.u32 %v7285_v46, 16  ;;  %v2998_v52 = vshrl.u32 %v7293_v53, 16  ;;  %v2972_v12 = vrot.slane %v2970_v27, 4  ;;  %v6245_v55 = vld [vmem:[#allocation9 + $0x10] sm:$0xff]   ;;  %v6247_v1 = vld [vmem:[#allocation9 + $0x18] sm:$0xff]  }
 0x30a   : > { %v2954_v25 = vsel %vm6889_vm10, %v2949_v9, %v2953_v15  ;;  %v2962_v11 = vor.u32 %v2961_v26, %v2958_v47  ;;  %v3001_v60 = vshll.u32 %v7293_v53, 16  ;;  %v2979_v37 = vshll.u32 %v7302_v22, 16 }
 0x30b   : > { %v5137_v3 = vcombine.low %v2940_v7, %v2954_v25  ;;  %v2975_v35 = vrot.slane %v2973_v21, 5  ;;  %v3327_v43 = vrot.slane %v7266_v16, 5  ;;  %v2967_v2 = vrot.slane %v2965_v20, 5  ;;  %v3300_v7 = vld [vmem:[#allocation3 + $0x38] sm:$0xe] }
 0x30c   : > { %v7314_v40 = vld [vmem:[#allocation3 + $0x30] sm:$0xf]  ;;  %v2897_v42 = vld [vmem:[#allocation3 + $0x34] sm:$0x1]  ;;  %v2963_v32 = vrot.slane %v2962_v11, 4  ;;  %v3000_v19 = vrot.slane %v2998_v52, 4  ;;  %v5148_v52 = vcombine.low %v7178_v29, %v7244_v63 }
 0x30d   : > { %v2984_v39 = vshrl.u32 %v7314_v40, 16  ;;  %v2987_v45 = vshll.u32 %v7314_v40, 16  ;;  %5734 = vmatmul.mubr.bf16.vlgmr.msra.gmra.mrb[0].mxu1 %v5137_v3  ;;  %v2976_v17 = vor.u32 %v2975_v35, %v2972_v12  ;;  %v3003_v4 = vrot.slane %v3001_v60, 5  ;;  %v3299_v18 = vld [vmem:[#allocation3 + $0x30] sm:$0xe]  ;;  %v6249_v29 = vld [vmem:[#allocation9 + $0x28] sm:$0xff]  }
 0x30e   : > { %5742 = vmatpush3.bf16.msra.mxu1 %v7171_v14  ;;  %v2993_v51 = vshll.u32 %v2897_v42, 16  ;;  %v3007_v54 = vshll.u32 %v7307_v58, 16  ;;  %v3331_v16 = vrot.slane %v7270_v13, 5  ;;  %v2981_v48 = vrot.slane %v2979_v37, 5  ;;  %v6248_v12 = vld [vmem:[#allocation9 + $0x20] sm:$0xff]   ;;  %v6250_v63 = vld [vmem:[#allocation9 + $0x30] sm:$0xff]  }
 0x30f   : > { %v2986_v44 = vrot.slane %v2984_v39, 4  ;;  %v2989_v50 = vrot.slane %v2987_v45, 5  ;;  %5743 = vmatprep.subr.bf16.mxu1 %v6244_v10  ;;  %v2977_v38 = vrot.slane %v2976_v17, 4  ;;  %v3004_v6 = vor.u32 %v3003_v4, %v3000_v19  ;;  %v6253_v37 = vld [vmem:[#allocation9 + $0x80] sm:$0xff]   ;;  %v6255_v39 = vld [vmem:[#allocation9 + $0x88] sm:$0xff]   ;;  %v6257_v4 = vld [vmem:[#allocation9 + $0x90] sm:$0xff]  }
 0x310   : > { %v2968_v56 = vsel %vm6889_vm10, %v2963_v32, %v2967_v2  ;;  %v5162_v57 = vrot.slane %v3295_v28, 9  ;;  %v5163_v61 = vrot.slane %v3296_v31, 9  ;;  %v2995_v62 = vrot.slane %v2993_v51, 5  ;;  %v3298_v51 = vld [vmem:[#allocation3 + $0x28] sm:$0xe] }
 0x311   : > { %v2990_v30 = vor.u32 %v2989_v50, %v2986_v44  ;;  %v2982_v14 = vsel %vm6889_vm10, %v2977_v38, %v2981_v48  ;;  %v3005_v34 = vrot.slane %v3004_v6, 4  ;;  %v3009_v13 = vrot.slane %v3007_v54, 5  ;;  %v6261_v50 = vld [vmem:[#allocation9 + $0xb0] sm:$0xff]   ;;  %v6262_v54 = vld [vmem:[#allocation9 + $0xb8] sm:$0xff]  }
 0x312   : > { %5744 = vmatpush3.bf16.msra.mxu1 %v6244_v10  ;;  %v5138_v23 = vcombine.low %v2968_v56, %v2982_v14  ;;  %v7328_v15 = vsel %vm6948_vm13, %v5162_v57, %v3327_v43  ;;  %v7332_v47 = vsel %vm6948_vm13, %v5163_v61, %v3331_v16  ;;  %v5166_v20 = vrot.slane %v3299_v18, 9  ;;  %v3294_v43 = vld [vmem:[#allocation3 + $0x8] sm:$0xe]  ;;  %v3297_v31 = vld [vmem:[#allocation3 + $0x20] sm:$0xe]  ;;  %v6263_v16 = vld [vmem:[#allocation9 + $0xc0] sm:$0xff]  }
 0x313   : > { %v2991_v0 = vrot.slane %v2990_v30, 4  ;;  %5745 = vmatprep.subr.bf16.mxu1 %v6245_v55  ;;  %v3010_v26 = vsel %vm6889_vm10, %v3005_v34, %v3009_v13  ;;  %v5169_v27 = vcombine.low %v7328_v15, %v7332_v47  ;;  %v3343_v21 = vrot.slane %v2897_v42, 5  ;;  %v3293_v42 = vld [vmem:[#allocation3] sm:$0xe]  ;;  %v6264_v56 = vld [vmem:[#allocation9 + $0xc8] sm:$0xff]   ;;  %v6268_v34 = vld [vmem:[#allocation9 + $0xe0] sm:$0xff]  }
 0x314   : > { %5737 = vmatprep.mubr.bf16.mxu1 %v5138_v23  ;;  %v5167_v25 = vrot.slane %v3300_v7, 9  ;;  %v3347_v11 = vrot.slane %v7307_v58, 5  ;;  %v6251_v58 = vld [vmem:[#allocation9 + $0x38] sm:$0xff]   ;;  %v5149_v32 = vcombine.low %v7260_v24, %v7242_v8  ;;  %v5150_v45 = vcombine.low %v7274_v41, %v7285_v46  ;;  %v6259_v41 = vld [vmem:[#allocation9 + $0xa0] sm:$0xff]   ;;  %v6260_v46 = vld [vmem:[#allocation9 + $0xa8] sm:$0xff]  }
 0x315   : > { %v2996_v9 = vsel %vm6889_vm10, %v2991_v0, %v2995_v62  ;;  %v7345_v60 = vsel %vm6948_vm13, %v5166_v20, %v3343_v21  ;;  %v3319_v28 = vrot.slane %v7204_v49, 5  ;;  %v3323_v2 = vrot.slane %v7246_v33, 5  ;;  %v6258_v49 = vld [vmem:[#allocation9 + $0x98] sm:$0xff]   ;;  %v6269_v57 = vld [vmem:[#allocation9 + $0xe8] sm:$0xff]   ;;  %v3673_v61 = vld [vmem:[#allocation3 + $0x10] sm:$0xf] }
 0x316   : > { %v5139_v10 = vcombine.low %v2996_v9, %v3010_v26  ;;  %5746 = vmatpush3.bf16.msra.mxu1 %v6245_v55  ;;  %v7349_v3 = vsel %vm6948_vm13, %v5167_v25, %v3347_v11  ;;  %v5160_v17 = vrot.slane %v3293_v42, 9  ;;  %v5161_v19 = vrot.slane %v3294_v43, 9  ;;  %v6266_v14 = vld [vmem:[#allocation3 + $0x8] ss:$8 sps:$4 sm:$0xff]   ;;  %v6270_v23 = vld [vmem:[#allocation9 + $0xf0] sm:$0xff]   ;;  %v6275_v25 = vld [vmem:[#allocation9 + $0x108] sm:$0xff]  }
 0x317   : > { %5747 = vmatprep.subr.bf16.mxu1 %v6247_v1  ;;  %v5171_v35 = vcombine.low %v7345_v60, %v7349_v3  ;;  %v5151_v24 = vcombine.low %v7314_v40, %v7293_v53  ;;  %v5165_v53 = vrot.slane %v3298_v51, 9  ;;  %v3339_v40 = vrot.slane %v7302_v22, 5  ;;  %v6265_v22 = vld [vmem:[#allocation9 + $0xd0] sm:$0xff]   ;;  %v3671_v0 = vld [vmem:[#allocation3 + $0x8] sm:$0xf]  ;;  %v6273_v9 = vld [vmem:[#allocation9 + $0x100] sm:$0xff]  }
 0x318   : > { %5738 = vmatmul.mubr.bf16.gmra.mrb[4].mxu1 %v5139_v10  ;;  %v3320_v44 = vsel %vm6948_vm13, %v5160_v17, %v3319_v28  ;;  %v3324_v8 = vsel %vm6948_vm13, %v5161_v19, %v3323_v2  ;;  %v5164_v38 = vrot.slane %v3297_v31, 9  ;;  %v3335_v48 = vrot.slane %v7290_v5, 5  ;;  %v6267_v5 = vld [vmem:[#allocation9 + $0xd8] sm:$0xff]   ;;  %v7377_v10 = vld [vmem:[#allocation3 + $0x14] sm:$0x1] }
 0x319   : > { %5757 = vmatprep.mubr.bf16.mxu1 %v5148_v52  ;;  %v5168_v33 = vcombine.low %v3320_v44, %v3324_v8  ;;  %v3340_v55 = vsel %vm6948_vm13, %v5165_v53, %v3339_v40  ;;  %v3702_v62 = vshrl.u32 %v3673_v61, 16  ;;  %v3705_v13 = vshll.u32 %v3673_v61, 16  ;;  %v6271_v18 = vld [vmem:[#allocation9 + $0xf8] sm:$0xff]   ;;  %v6272_v52 = vld [vmem:[#allocation3 + $0x18] ss:$8 sps:$4 sm:$0xff]   ;;  %v6279_v17 = vld [vmem:[#allocation9 + $0x120] sm:$0xff]  }
 0x31a   : > { %5748 = vmatpush3.bf16.msra.mxu1 %v6247_v1  ;;  %v3336_v6 = vsel %vm6948_vm13, %v5164_v38, %v3335_v48  ;;  %v3688_v1 = vshrl.u32 %v3671_v0, 16  ;;  %v3691_v15 = vshll.u32 %v3671_v0, 16  ;;  %v7379_v21 = vld [vmem:[#allocation3 + $0xc] sm:$0x1]  ;;  %v6274_v60 = vld [vmem:[#allocation3 + $0x28] ss:$8 sps:$4 sm:$0xff]  }
 0x31b   : > { %5749 = vmatprep.subr.bf16.mxu1 %v6248_v12  ;;  %v5170_v30 = vcombine.low %v3336_v6, %v3340_v55  ;;  %v3704_v47 = vrot.slane %v3702_v62, 4  ;;  %v3707_v7 = vrot.slane %v3705_v13, 5  ;;  %v3697_v3 = vshll.u32 %v7379_v21, 16  ;;  %v6276_v43 = vld [vmem:[#allocation3 + $0x38] ss:$8 sps:$4 sm:$0xff]  }
 0x31c   : > { %v3690_v26 = vrot.slane %v3688_v1, 4  ;;  %v3677_v28 = vld [vmem:[#allocation3 + $0x20] sm:$0xf]  ;;  %v3681_v2 = vld [vmem:[#allocation3 + $0x30] sm:$0xf] }
 0x31d   : > { %v3708_v20 = vor.u32 %v3707_v7, %v3704_v47  ;;  %v3675_v19 = vld [vmem:[#allocation3 + $0x18] sm:$0xf]  ;;  %v3733_v44 = vshll.u32 %v3677_v28, 16  ;;  %v3679_v8 = vld [vmem:[#allocation3 + $0x28] sm:$0xf]  ;;  %v6281_v38 = vld [vmem:[#allocation9 + $0x130] sm:$0xff]  }
 0x31e   : > { %5750 = vmatpush3.bf16.msra.mxu1 %v6248_v12  ;;  %v3711_v12 = vshll.u32 %v7377_v10, 16  ;;  %v3747_v51 = vshll.u32 %v3679_v8, 16  ;;  %v7387_v6 = vld [vmem:[#allocation3 + $0x24] sm:$0x1]  ;;  %v7391_v61 = vld [vmem:[#allocation3 + $0x1c] sm:$0x1] }
 0x31f   : > { %5751 = vmatprep.subr.bf16.mxu1 %v6249_v29  ;;  %v3735_v31 = vrot.slane %v3733_v44, 5  ;;  %v3739_v62 = vshll.u32 %v7387_v6, 16  ;;  %v7394_v13 = vld [vmem:[#allocation3 + $0x2c] sm:$0x1] }
 0x322   : > { %5752 = vmatpush3.bf16.msra.mxu1 %v6249_v29  ;;  %v6277_v29 = vld [vmem:[#allocation9 + $0x110] sm:$0xff]  }
 0x323   : > { %5753 = vmatprep.subr.bf16.mxu1 %v6250_v63 }
 0x326   : > { %5754 = vmatpush3.bf16.msra.mxu1 %v6250_v63 }
 0x327   : > { %5755 = vmatprep.subr.bf16.mxu1 %v6251_v58 }
 0x32a   : > { %5756 = vmatpush3.bf16.msra.mxu1 %v6251_v58  ;;  %v3713_v58 = vrot.slane %v3711_v12, 5  ;;  %v3741_v12 = vrot.slane %v3739_v62, 5  ;;  %v3954_v62 = vld [vmem:[#allocation3 + $0x18] sm:$0xe] }
 0x32b   : > { %5765 = vmatprep.subr.bf16.mxu1 %v6253_v37 }
 0x32d   : > { %5758 = vmatmul.mubr.bf16.vlgmr.msra.gmra.mrb[0].mxu1 %v5149_v32 }
 0x32e   : > { %5761 = vmatprep.mubr.bf16.mxu1 %v5150_v45  ;;  %5766 = vmatpush3.bf16.msra.mxu1 %v6253_v37  ;;  %v3699_v37 = vrot.slane %v3697_v3, 5 }
 0x32f   : > { %5767 = vmatprep.subr.bf16.mxu1 %v6255_v39 }
 0x332   : > { %5768 = vmatpush3.bf16.msra.mxu1 %v6255_v39  ;;  %v6278_v39 = vld [vmem:[#allocation9 + $0x118] sm:$0xff]  }
 0x333   : > { %5769 = vmatprep.subr.bf16.mxu1 %v6257_v4 }
 0x335   : > { %5762 = vmatmul.mubr.bf16.gmra.mrb[4].mxu1 %v5151_v24  ;;  %v3758_v24 = vshrl.u32 %v3681_v2, 16 }
 0x336   : > { %5770 = vmatpush3.bf16.msra.mxu1 %v6257_v4  ;;  %5781 = vmatprep.mubr.bf16.mxu1 %v5168_v33  ;;  %v3730_v4 = vshrl.u32 %v3677_v28, 16  ;;  %v3716_v33 = vshrl.u32 %v3675_v19, 16 }
 0x337   : > { %5771 = vmatprep.subr.bf16.mxu1 %v6258_v49  ;;  %v3760_v53 = vrot.slane %v3758_v24, 4 }
 0x338   : > { %v3718_v48 = vrot.slane %v3716_v33, 4 }
 0x33a   : > { %5772 = vmatpush3.bf16.msra.mxu1 %v6258_v49  ;;  %v3761_v49 = vshll.u32 %v3681_v2, 16 }
 0x33b   : > { %5773 = vmatprep.subr.bf16.mxu1 %v6259_v41 }
 0x33c   : > { %v3763_v40 = vrot.slane %v3761_v49, 5 }
 0x33e   : > { %5774 = vmatpush3.bf16.msra.mxu1 %v6259_v41  ;;  %v3719_v41 = vshll.u32 %v3675_v19, 16  ;;  %v3953_v19 = vld [vmem:[#allocation3 + $0x10] sm:$0xe] }
 0x33f   : > { %5775 = vmatprep.subr.bf16.mxu1 %v6260_v46 }
 0x340   : > { %v3721_v55 = vrot.slane %v3719_v41, 5  ;;  %v3952_v41 = vld [vmem:[#allocation3 + $0x8] sm:$0xe] }
 0x342   : > { %5776 = vmatpush3.bf16.msra.mxu1 %v6260_v46  ;;  %v6280_v46 = vld [vmem:[#allocation9 + $0x128] sm:$0xff]   ;;  %v3722_v0 = vor.u32 %v3721_v55, %v3718_v48 }
 0x343   : > { %5777 = vmatprep.subr.bf16.mxu1 %v6261_v50 }
 0x346   : > { %5778 = vmatpush3.bf16.msra.mxu1 %v6261_v50  ;;  %v3744_v50 = vshrl.u32 %v3679_v8, 16  ;;  %v6284_v8 = vld [vmem:[#allocation9 + $0x148] sm:$0xff]  }
 0x347   : > { %5779 = vmatprep.subr.bf16.mxu1 %v6262_v54 }
 0x34a   : > { %5780 = vmatpush3.bf16.msra.mxu1 %v6262_v54  ;;  %v3732_v54 = vrot.slane %v3730_v4, 4 }
 0x34b   : > { %5789 = vmatprep.subr.bf16.mxu1 %v6263_v16 }
 0x34d   : > { %5782 = vmatmul.mubr.bf16.vlgmr.msra.gmra.mrb[0].mxu1 %v5169_v27  ;;  %v3693_v27 = vrot.slane %v3691_v15, 5  ;;  %v6282_v15 = vld [vmem:[#allocation9 + $0x138] sm:$0xff]  }
 0x34e   : > { %5785 = vmatprep.mubr.bf16.mxu1 %v5170_v30  ;;  %5790 = vmatpush3.bf16.msra.mxu1 %v6263_v16  ;;  %v3685_v16 = vld [vmem:[#allocation3 + $0x40] sm:$0xf]  ;;  %v3749_v30 = vrot.slane %v3747_v51, 5 }
 0x34f   : > { %5791 = vmatprep.subr.bf16.mxu1 %v6264_v56  ;;  %v3694_v11 = vor.u32 %v3693_v27, %v3690_v26 }
 0x351   : > { %v3695_v63 = vrot.slane %v3694_v11, 4  ;;  %v3723_v11 = vrot.slane %v3722_v0, 4  ;;  %v6290_v0 = vld [vmem:[#allocation9 + $0x178] sm:$0xff]  }
 0x352   : > { %5792 = vmatpush3.bf16.msra.mxu1 %v6264_v56  ;;  %v3746_v56 = vrot.slane %v3744_v50, 4  ;;  %v3982_v50 = vrot.slane %v7377_v10, 5 }
 0x353   : > { %5793 = vmatprep.subr.bf16.mxu1 %v6265_v22  ;;  %v3700_v32 = vsel %vm6889_vm10, %v3695_v63, %v3699_v37 }
 0x354   : > { %v3750_v47 = vor.u32 %v3749_v30, %v3746_v56  ;;  %v6286_v30 = vld [vmem:[#allocation9 + $0x158] sm:$0xff]  }
 0x355   : > { %5786 = vmatmul.mubr.bf16.gmra.mrb[4].mxu1 %v5171_v35  ;;  %v3709_v35 = vrot.slane %v3708_v20, 4 }
 0x356   : > { %5794 = vmatpush3.bf16.msra.mxu1 %v6265_v22  ;;  %5805 = vmatprep.mubr.bf16.mxu1 %v6266_v14  ;;  %v3683_v22 = vld [vmem:[#allocation3 + $0x38] sm:$0xf]  ;;  %v7389_v14 = vld [vmem:[#allocation3 + $0x34] sm:$0x1] }
 0x357   : > { %5795 = vmatprep.subr.bf16.mxu1 %v6267_v5  ;;  %v3714_v42 = vsel %vm6889_vm10, %v3709_v35, %v3713_v58  ;;  %v3775_v1 = vshll.u32 %v3683_v22, 16  ;;  %v3767_v7 = vshll.u32 %v7389_v14, 16  ;;  %v6283_v35 = vld [vmem:[#allocation9 + $0x140] sm:$0xff]   ;;  %v7399_v58 = vld [vmem:[#allocation3 + $0x44] sm:$0x1] }
 0x358   : > { %v5192_v45 = vcombine.low %v3700_v32, %v3714_v42 }
 0x359   : > { %v3777_v3 = vrot.slane %v3775_v1, 5  ;;  %v3769_v63 = vrot.slane %v3767_v7, 5  ;;  %v3990_v1 = vrot.slane %v7387_v6, 5  ;;  %v3998_v7 = vrot.slane %v7389_v14, 5  ;;  %v3959_v6 = vld [vmem:[#allocation3 + $0x40] sm:$0xe] }
 0x35a   : > { %5796 = vmatpush3.bf16.msra.mxu1 %v6267_v5  ;;  %v3736_v5 = vor.u32 %v3735_v31, %v3732_v54  ;;  %v6285_v31 = vld [vmem:[#allocation9 + $0x150] sm:$0xff]  }
 0x35b   : > { %5797 = vmatprep.subr.bf16.mxu1 %v6268_v34 }
 0x35c   : > { %v3737_v26 = vrot.slane %v3736_v5, 4  ;;  %v6288_v5 = vld [vmem:[#allocation9 + $0x168] sm:$0xff]  }
 0x35e   : > { %5798 = vmatpush3.bf16.msra.mxu1 %v6268_v34  ;;  %v3786_v34 = vshrl.u32 %v3685_v16, 16  ;;  %v3742_v42 = vsel %vm6889_vm10, %v3737_v26, %v3741_v12  ;;  %v3986_v26 = vrot.slane %v7391_v61, 5 }
 0x35f   : > { %5799 = vmatprep.subr.bf16.mxu1 %v6269_v57 }
 0x360   : > { %v3788_v27 = vrot.slane %v3786_v34, 4  ;;  %v6289_v34 = vld [vmem:[#allocation9 + $0x170] sm:$0xff]  }
 0x362   : > { %5800 = vmatpush3.bf16.msra.mxu1 %v6269_v57  ;;  %v3789_v57 = vshll.u32 %v3685_v16, 16 }
 0x363   : > { %5801 = vmatprep.subr.bf16.mxu1 %v6270_v23 }
 0x364   : > { %v3791_v20 = vrot.slane %v3789_v57, 5  ;;  %v3955_v57 = vld [vmem:[#allocation3 + $0x20] sm:$0xe] }
 0x366   : > { %5802 = vmatpush3.bf16.msra.mxu1 %v6270_v23  ;;  %v3764_v23 = vor.u32 %v3763_v40, %v3760_v53  ;;  %v5204_v53 = vrot.slane %v3952_v41, 9  ;;  %v3978_v40 = vrot.slane %v7379_v21, 5  ;;  %v6287_v21 = vld [vmem:[#allocation9 + $0x160] sm:$0xff]  }
 0x367   : > { %5803 = vmatprep.subr.bf16.mxu1 %v6271_v18 }
 0x368   : > { %v3979_v56 = vsel %vm6948_vm13, %v5204_v53, %v3978_v40  ;;  %v7443_v40 = vld [vmem:[#allocation3 + $0x1c] sm:$0x1] }
 0x36a   : > { %5804 = vmatpush3.bf16.msra.mxu1 %v6271_v18  ;;  %v3772_v18 = vshrl.u32 %v3683_v22, 16 }
 0x36b   : > { %5813 = vmatprep.subr.bf16.mxu1 %v6273_v9 }
 0x36d   : > { %5806 = vmatmul.mubr.bf16.vlgmr.msra.gmra.mrb[0].mxu1 %v6272_v52  ;;  %v3753_v52 = vshll.u32 %v7394_v13, 16 }
 0x36e   : > { %5809 = vmatprep.mubr.bf16.mxu1 %v6274_v60  ;;  %5814 = vmatpush3.bf16.msra.mxu1 %v6273_v9  ;;  %v3725_v9 = vshll.u32 %v7391_v61, 16  ;;  %v3774_v60 = vrot.slane %v3772_v18, 4  ;;  %v5207_v18 = vrot.slane %v3955_v57, 9 }
 0x36f   : > { %5815 = vmatprep.subr.bf16.mxu1 %v6275_v25  ;;  %v3755_v32 = vrot.slane %v3753_v52, 5  ;;  %v3994_v52 = vrot.slane %v7394_v13, 5  ;;  %v5211_v13 = vrot.slane %v3959_v6, 9  ;;  %v6308_v6 = vld [vmem:[#allocation9 + $0x1e8] sm:$0xff]  }
 0x370   : > { %v3727_v37 = vrot.slane %v3725_v9, 5  ;;  %v3778_v2 = vor.u32 %v3777_v3, %v3774_v60  ;;  %v5206_v9 = vrot.slane %v3954_v62, 9  ;;  %v6292_v60 = vld [vmem:[#allocation9 + $0x188] sm:$0xff]   ;;  %v6306_v62 = vld [vmem:[#allocation9 + $0x1d8] sm:$0xff]  }
 0x371   : > { %v3958_v3 = vld [vmem:[#allocation3 + $0x38] sm:$0xe] }
 0x372   : > { %5816 = vmatpush3.bf16.msra.mxu1 %v6275_v25  ;;  %v3765_v25 = vrot.slane %v3764_v23, 4  ;;  %v3728_v28 = vsel %vm6889_vm10, %v3723_v11, %v3727_v37  ;;  %v3779_v51 = vrot.slane %v3778_v2, 4  ;;  %v3957_v23 = vld [vmem:[#allocation3 + $0x30] sm:$0xe]  ;;  %v3987_v14 = vsel %vm6948_vm13, %v5206_v9, %v3986_v26 }
 0x373   : > { %5817 = vmatprep.subr.bf16.mxu1 %v6277_v29  ;;  %v5193_v4 = vcombine.low %v3728_v28, %v3742_v42  ;;  %v6293_v42 = vld [vmem:[#allocation9 + $0x190] sm:$0xff]   ;;  %v6295_v28 = vld [vmem:[#allocation9 + $0x198] sm:$0xff]   ;;  %v6294_v2 = vld [vmem:[#allocation3 + $0x10] ss:$8 sps:$4 sm:$0xff]  }
 0x375   : > { %5810 = vmatmul.mubr.bf16.gmra.mrb[4].mxu1 %v6276_v43  ;;  %v3792_v43 = vor.u32 %v3791_v20, %v3788_v27  ;;  %v6291_v27 = vld [vmem:[#allocation9 + $0x180] sm:$0xff]  }
 0x376   : > { %5818 = vmatpush3.bf16.msra.mxu1 %v6277_v29  ;;  %5829 = vmatprep.mubr.bf16.mxu1 %v5192_v45  ;;  %v3751_v29 = vrot.slane %v3750_v47, 4  ;;  %v7405_v45 = vld [vmem:[#allocation3 + $0x3c] sm:$0x1]  ;;  %v5209_v47 = vrot.slane %v3957_v23, 9  ;;  %v6304_v23 = vld [vmem:[#allocation3 + $0x40] ss:$8 sps:$4 sm:$0xff]  }
 0x377   : > { %5819 = vmatprep.subr.bf16.mxu1 %v6278_v39  ;;  %v3781_v49 = vshll.u32 %v7405_v45, 16  ;;  %v3793_v33 = vrot.slane %v3792_v43, 4  ;;  %v4002_v37 = vrot.slane %v7405_v45, 5  ;;  %v6297_v45 = vld [vmem:[#allocation9 + $0x1a8] sm:$0xff]  }
 0x378   : > { %v3756_v44 = vsel %vm6889_vm10, %v3751_v29, %v3755_v32  ;;  %v3999_v11 = vsel %vm6948_vm13, %v5209_v47, %v3998_v7  ;;  %v4006_v29 = vrot.slane %v7399_v58, 5  ;;  %v6307_v47 = vld [vmem:[#allocation9 + $0x1e0] sm:$0xff]   ;;  %v4335_v7 = vld [vmem:[#allocation3 + $0x20] sm:$0xf] }
 0x379   : > { %v3783_v16 = vrot.slane %v3781_v49, 5 }
 0x37a   : > { %5820 = vmatpush3.bf16.msra.mxu1 %v6278_v39  ;;  %v3770_v39 = vsel %vm6889_vm10, %v3765_v25, %v3769_v63  ;;  %v3991_v25 = vsel %vm6948_vm13, %v5207_v18, %v3990_v1  ;;  %v5210_v63 = vrot.slane %v3958_v3, 9  ;;  %v4007_v43 = vsel %vm6948_vm13, %v5211_v13, %v4006_v29  ;;  %v4337_v1 = vld [vmem:[#allocation3 + $0x28] sm:$0xf]  ;;  %v4343_v29 = vld [vmem:[#allocation3 + $0x40] sm:$0xf] }
 0x37b   : > { %5821 = vmatprep.subr.bf16.mxu1 %v6279_v17  ;;  %v5194_v24 = vcombine.low %v3756_v44, %v3770_v39  ;;  %v3784_v10 = vsel %vm6889_vm10, %v3779_v51, %v3783_v16  ;;  %v5213_v12 = vcombine.low %v3987_v14, %v3991_v25  ;;  %v6300_v16 = vld [vmem:[#allocation3 + $0x20] ss:$8 sps:$4 sm:$0xff]   ;;  %v4390_v9 = vshrl.u32 %v4337_v1, 16 }
 0x37c   : > { %v4003_v32 = vsel %vm6948_vm13, %v5210_v63, %v4002_v37  ;;  %v4393_v26 = vshll.u32 %v4337_v1, 16  ;;  %v4376_v25 = vshrl.u32 %v4335_v7, 16 }
 0x37d   : > { %v5215_v39 = vcombine.low %v4003_v32, %v4007_v43  ;;  %v6309_v43 = vld [vmem:[#allocation9 + $0x1f0] sm:$0xff]   ;;  %v7451_v32 = vld [vmem:[#allocation3 + $0x2c] sm:$0x1] }
 0x37e   : > { %5822 = vmatpush3.bf16.msra.mxu1 %v6279_v17  ;;  %v3795_v17 = vshll.u32 %v7399_v58, 16  ;;  %v6296_v58 = vld [vmem:[#allocation9 + $0x1a0] sm:$0xff]   ;;  %v4395_v3 = vrot.slane %v4393_v26, 5  ;;  %v4378_v63 = vrot.slane %v4376_v25, 4 }
 0x37f   : > { %5823 = vmatprep.subr.bf16.mxu1 %v6280_v46 }
 0x380   : > { %v3797_v54 = vrot.slane %v3795_v17, 5  ;;  %v4331_v17 = vld [vmem:[#allocation3 + $0x10] sm:$0xf] }
 0x381   : > { %v4348_v44 = vshrl.u32 %v4331_v17, 16 }
 0x382   : > { %5824 = vmatpush3.bf16.msra.mxu1 %v6280_v46  ;;  %v5205_v46 = vrot.slane %v3953_v19, 9  ;;  %v6298_v19 = vld [vmem:[#allocation9 + $0x1b0] sm:$0xff]  }
 0x383   : > { %5825 = vmatprep.subr.bf16.mxu1 %v6281_v38  ;;  %v4350_v41 = vrot.slane %v4348_v44, 4 }
 0x384   : > { %v3983_v48 = vsel %vm6948_vm13, %v5205_v46, %v3982_v50  ;;  %v6301_v50 = vld [vmem:[#allocation9 + $0x1c0] sm:$0xff]  }
 0x385   : > { %v5212_v22 = vcombine.low %v3979_v56, %v3983_v48 }
 0x386   : > { %5826 = vmatpush3.bf16.msra.mxu1 %v6281_v38  ;;  %v3798_v38 = vsel %vm6889_vm10, %v3793_v33, %v3797_v54 }
 0x387   : > { %5827 = vmatprep.subr.bf16.mxu1 %v6282_v15  ;;  %v5195_v55 = vcombine.low %v3784_v10, %v3798_v38  ;;  %v6303_v38 = vld [vmem:[#allocation9 + $0x1c8] sm:$0xff]  }
 0x38a   : > { %5828 = vmatpush3.bf16.msra.mxu1 %v6282_v15  ;;  %v3956_v15 = vld [vmem:[#allocation3 + $0x28] sm:$0xe] }
 0x38b   : > { %5837 = vmatprep.subr.bf16.mxu1 %v6283_v35  ;;  %v5208_v20 = vrot.slane %v3956_v15, 9  ;;  %v4339_v15 = vld [vmem:[#allocation3 + $0x30] sm:$0xf] }
 0x38d   : > { %5830 = vmatmul.mubr.bf16.vlgmr.msra.gmra.mrb[0].mxu1 %v5193_v4  ;;  %v3995_v61 = vsel %vm6948_vm13, %v5208_v20, %v3994_v52  ;;  %v4333_v4 = vld [vmem:[#allocation3 + $0x18] sm:$0xf]  ;;  %v4404_v20 = vshrl.u32 %v4339_v15, 16  ;;  %v4407_v52 = vshll.u32 %v4339_v15, 16 }
 0x38e   : > { %5833 = vmatprep.mubr.bf16.mxu1 %v5194_v24  ;;  %5838 = vmatpush3.bf16.msra.mxu1 %v6283_v35  ;;  %v5214_v35 = vcombine.low %v3995_v61, %v3999_v11  ;;  %v6299_v24 = vld [vmem:[#allocation9 + $0x1b8] sm:$0xff]   ;;  %v4362_v49 = vshrl.u32 %v4333_v4, 16  ;;  %v4365_v33 = vshll.u32 %v4333_v4, 16  ;;  %v4379_v11 = vshll.u32 %v4335_v7, 16  ;;  %v7455_v4 = vld [vmem:[#allocation3 + $0x24] sm:$0x1] }
 0x38f   : > { %5839 = vmatprep.subr.bf16.mxu1 %v6284_v8  ;;  %v4345_v61 = vld [vmem:[#allocation3 + $0x48] sm:$0xf]  ;;  %v4409_v13 = vrot.slane %v4407_v52, 5 }
 0x390   : > { %v4364_v51 = vrot.slane %v4362_v49, 4  ;;  %v4367_v54 = vrot.slane %v4365_v33, 5  ;;  %v4381_v37 = vrot.slane %v4379_v11, 5  ;;  %v7458_v49 = vld [vmem:[#allocation3 + $0x3c] sm:$0x1]  ;;  %v6310_v33 = vld [vmem:[#allocation9 + $0x1f8] sm:$0xff]  }
 0x392   : > { %5840 = vmatpush3.bf16.msra.mxu1 %v6284_v8  ;;  %v4351_v8 = vshll.u32 %v4331_v17, 16  ;;  %v4368_v10 = vor.u32 %v4367_v54, %v4364_v51  ;;  %v4432_v17 = vshrl.u32 %v4343_v29, 16  ;;  %v4385_v54 = vshll.u32 %v7455_v4, 16 }
 0x393   : > { %5841 = vmatprep.subr.bf16.mxu1 %v6285_v31 }
 0x394   : > { %v4353_v46 = vrot.slane %v4351_v8, 5  ;;  %v4382_v8 = vor.u32 %v4381_v37, %v4378_v63 }
 0x395   : > { %5834 = vmatmul.mubr.bf16.gmra.mrb[4].mxu1 %v5195_v55  ;;  %v6302_v55 = vld [vmem:[#allocation3 + $0x30] ss:$8 sps:$4 sm:$0xff]  }
 0x396   : > { %5842 = vmatpush3.bf16.msra.mxu1 %v6285_v31  ;;  %5853 = vmatprep.mubr.bf16.mxu1 %v5212_v22  ;;  %v7441_v31 = vld [vmem:[#allocation3 + $0x14] sm:$0x1]  ;;  %v4354_v53 = vor.u32 %v4353_v46, %v4350_v41  ;;  %v6305_v22 = vld [vmem:[#allocation9 + $0x1d0] sm:$0xff]  }
 0x397   : > { %5843 = vmatprep.subr.bf16.mxu1 %v6286_v30  ;;  %v4357_v48 = vshll.u32 %v7441_v31, 16 }
 0x398   : > { %v4355_v56 = vrot.slane %v4354_v53, 4 }
 0x39a   : > { %5844 = vmatpush3.bf16.msra.mxu1 %v6286_v30  ;;  %v4371_v30 = vshll.u32 %v7443_v40, 16 }
 0x39b   : > { %5845 = vmatprep.subr.bf16.mxu1 %v6287_v21 }
 0x39c   : > { %v4373_v57 = vrot.slane %v4371_v30, 5  ;;  %v7463_v30 = vld [vmem:[#allocation3 + $0x4c] sm:$0x1] }
 0x39e   : > { %5846 = vmatpush3.bf16.msra.mxu1 %v6287_v21  ;;  %v4359_v21 = vrot.slane %v4357_v48, 5 }
 0x39f   : > { %5847 = vmatprep.subr.bf16.mxu1 %v6288_v5 }
 0x3a2   : > { %5848 = vmatpush3.bf16.msra.mxu1 %v6288_v5  ;;  %v4369_v5 = vrot.slane %v4368_v10, 4  ;;  %v4427_v10 = vshll.u32 %v7458_v49, 16 }
 0x3a3   : > { %5849 = vmatprep.subr.bf16.mxu1 %v6289_v34 }
 0x3a4   : > { %v4429_v15 = vrot.slane %v4427_v10, 5 }
 0x3a6   : > { %5850 = vmatpush3.bf16.msra.mxu1 %v6289_v34  ;;  %v4360_v34 = vsel %vm6889_vm10, %v4355_v56, %v4359_v21 }
 0x3a7   : > { %5851 = vmatprep.subr.bf16.mxu1 %v6290_v0 }
 0x3aa   : > { %5852 = vmatpush3.bf16.msra.mxu1 %v6290_v0  ;;  %v4374_v0 = vsel %vm6889_vm10, %v4369_v5, %v4373_v57 }
 0x3ab   : > { %5861 = vmatprep.subr.bf16.mxu1 %v6291_v27  ;;  %v5236_v18 = vcombine.low %v4360_v34, %v4374_v0  ;;  %v7465_v34 = vld [vmem:[#allocation3 + $0x44] sm:$0x1] }
 0x3ac   : > { %v4441_v7 = vshll.u32 %v7465_v34, 16 }
 0x3ad   : > { %5854 = vmatmul.mubr.bf16.vlgmr.msra.gmra.mrb[0].mxu1 %v5213_v12 }
 0x3ae   : > { %5857 = vmatprep.mubr.bf16.mxu1 %v5214_v35  ;;  %5862 = vmatpush3.bf16.msra.mxu1 %v6291_v27  ;;  %v4341_v27 = vld [vmem:[#allocation3 + $0x38] sm:$0xf]  ;;  %v4406_v35 = vrot.slane %v4404_v20, 4 }
 0x3af   : > { %5863 = vmatprep.subr.bf16.mxu1 %v6292_v60  ;;  %v4418_v14 = vshrl.u32 %v4341_v27, 16  ;;  %v4421_v12 = vshll.u32 %v4341_v27, 16  ;;  %v6312_v20 = vld [vmem:[#allocation9 + $0x208] sm:$0xff]  }
 0x3b0   : > { %v4410_v44 = vor.u32 %v4409_v13, %v4406_v35  ;;  %v4642_v13 = vrot.slane %v7443_v40, 5  ;;  %v6315_v40 = vld [vmem:[#allocation9 + $0x220] sm:$0xff]  }
 0x3b2   : > { %5864 = vmatpush3.bf16.msra.mxu1 %v6292_v60  ;;  %v4392_v60 = vrot.slane %v4390_v9, 4  ;;  %v4411_v48 = vrot.slane %v4410_v44, 4  ;;  %v4612_v9 = vld [vmem:[#allocation3 + $0x10] sm:$0xe] }
 0x3b3   : > { %5865 = vmatprep.subr.bf16.mxu1 %v6293_v42 }
 0x3b5   : > { %5858 = vmatmul.mubr.bf16.gmra.mrb[4].mxu1 %v5215_v39  ;;  %v4420_v39 = vrot.slane %v4418_v14, 4  ;;  %v4613_v14 = vld [vmem:[#allocation3 + $0x18] sm:$0xe] }
 0x3b6   : > { %5866 = vmatpush3.bf16.msra.mxu1 %v6293_v42  ;;  %5877 = vmatprep.mubr.bf16.mxu1 %v6294_v2  ;;  %v4446_v42 = vshrl.u32 %v4345_v61, 16  ;;  %v4449_v2 = vshll.u32 %v4345_v61, 16  ;;  %v4638_v61 = vrot.slane %v7441_v31, 5  ;;  %v5249_v35 = vrot.slane %v4613_v14, 9 }
 0x3b7   : > { %5867 = vmatprep.subr.bf16.mxu1 %v6295_v28 }
 0x3b8   : > { %v4451_v51 = vrot.slane %v4449_v2, 5  ;;  %v4643_v31 = vsel %vm6948_vm13, %v5249_v35, %v4642_v13  ;;  %v4615_v2 = vld [vmem:[#allocation3 + $0x28] sm:$0xe] }
 0x3b9   : > { %v5251_v44 = vrot.slane %v4615_v2, 9 }
 0x3ba   : > { %5868 = vmatpush3.bf16.msra.mxu1 %v6295_v28  ;;  %v4423_v28 = vrot.slane %v4421_v12, 5  ;;  %v5248_v12 = vrot.slane %v4612_v9, 9 }
 0x3bb   : > { %5869 = vmatprep.subr.bf16.mxu1 %v6296_v58 }
 0x3bc   : > { %v4424_v46 = vor.u32 %v4423_v28, %v4420_v39  ;;  %v4639_v37 = vsel %vm6948_vm13, %v5248_v12, %v4638_v61  ;;  %v6317_v28 = vld [vmem:[#allocation9 + $0x230] sm:$0xff]  }
 0x3bd   : > { %v5256_v39 = vcombine.low %v4639_v37, %v4643_v31 }
 0x3be   : > { %5870 = vmatpush3.bf16.msra.mxu1 %v6296_v58  ;;  %v4396_v58 = vor.u32 %v4395_v3, %v4392_v60  ;;  %v4425_v5 = vrot.slane %v4424_v46, 4  ;;  %v4443_v60 = vrot.slane %v4441_v7, 5  ;;  %v6313_v3 = vld [vmem:[#allocation9 + $0x210] sm:$0xff]  }
 0x3bf   : > { %5871 = vmatprep.subr.bf16.mxu1 %v6297_v45 }
 0x3c0   : > { %v4397_v53 = vrot.slane %v4396_v58, 4  ;;  %v4430_v27 = vsel %vm6889_vm10, %v4425_v5, %v4429_v15  ;;  %v4616_v58 = vld [vmem:[#allocation3 + $0x30] sm:$0xe] }
 0x3c2   : > { %5872 = vmatpush3.bf16.msra.mxu1 %v6297_v45  ;;  %v7453_v45 = vld [vmem:[#allocation3 + $0x34] sm:$0x1] }
 0x3c3   : > { %5873 = vmatprep.subr.bf16.mxu1 %v6298_v19  ;;  %v4413_v41 = vshll.u32 %v7453_v45, 16 }
 0x3c5   : > { %v4415_v21 = vrot.slane %v4413_v41, 5  ;;  %v4654_v41 = vrot.slane %v7453_v45, 5 }
 0x3c6   : > { %5874 = vmatpush3.bf16.msra.mxu1 %v6298_v19  ;;  %v4435_v19 = vshll.u32 %v4343_v29, 16 }
 0x3c7   : > { %5875 = vmatprep.subr.bf16.mxu1 %v6299_v24  ;;  %v4416_v1 = vsel %vm6889_vm10, %v4411_v48, %v4415_v21 }
 0x3c8   : > { %v5238_v52 = vcombine.low %v4416_v1, %v4430_v27 }
 0x3ca   : > { %5876 = vmatpush3.bf16.msra.mxu1 %v6299_v24  ;;  %v4399_v24 = vshll.u32 %v7451_v32, 16 }
 0x3cb   : > { %5885 = vmatprep.subr.bf16.mxu1 %v6301_v50 }
 0x3cc   : > { %v4401_v56 = vrot.slane %v4399_v24, 5  ;;  %v4617_v24 = vld [vmem:[#allocation3 + $0x38] sm:$0xe] }
 0x3cd   : > { %5878 = vmatmul.mubr.bf16.vlgmr.msra.gmra.mrb[0].mxu1 %v6300_v16  ;;  %v4434_v16 = vrot.slane %v4432_v17, 4  ;;  %v6318_v17 = vld [vmem:[#allocation9 + $0x238] sm:$0xff]  }
 0x3ce   : > { %5881 = vmatprep.mubr.bf16.mxu1 %v6302_v55  ;;  %5886 = vmatpush3.bf16.msra.mxu1 %v6301_v50  ;;  %v4448_v50 = vrot.slane %v4446_v42, 4  ;;  %v4383_v55 = vrot.slane %v4382_v8, 4  ;;  %v4402_v0 = vsel %vm6889_vm10, %v4397_v53, %v4401_v56  ;;  %v4650_v8 = vrot.slane %v7451_v32, 5  ;;  %v4618_v32 = vld [vmem:[#allocation3 + $0x40] sm:$0xe] }
 0x3cf   : > { %5887 = vmatprep.subr.bf16.mxu1 %v6303_v38  ;;  %v4662_v56 = vrot.slane %v7465_v34, 5  ;;  %v5269_v34 = vld [vmem:[%s7568_s6] ss:$0 sm:$0xff] }
 0x3d0   : > { %v4452_v57 = vor.u32 %v4451_v51, %v4448_v50  ;;  %v4646_v50 = vrot.slane %v7455_v4, 5  ;;  %v5253_v51 = vrot.slane %v4617_v24, 9  ;;  %v4651_v53 = vsel %vm6948_vm13, %v5251_v44, %v4650_v8 }
 0x3d2   : > { %5888 = vmatpush3.bf16.msra.mxu1 %v6303_v38  ;;  %v4437_v38 = vrot.slane %v4435_v19, 5  ;;  %v4453_v11 = vrot.slane %v4452_v57, 4  ;;  %v4614_v19 = vld [vmem:[#allocation3 + $0x20] sm:$0xe] }
 0x3d3   : > { %5889 = vmatprep.subr.bf16.mxu1 %v6305_v22  ;;  %v5250_v46 = vrot.slane %v4614_v19, 9 }
 0x3d5   : > { %5882 = vmatmul.mubr.bf16.gmra.mrb[4].mxu1 %v6304_v23  ;;  %v4387_v23 = vrot.slane %v4385_v54, 5  ;;  %v4658_v54 = vrot.slane %v7458_v49, 5  ;;  %v4647_v45 = vsel %vm6948_vm13, %v5250_v46, %v4646_v50  ;;  %v5254_v49 = vrot.slane %v4618_v32, 9 }
 0x3d6   : > { %5890 = vmatpush3.bf16.msra.mxu1 %v6305_v22  ;;  %5901 = vmatprep.mubr.bf16.mxu1 %v5236_v18  ;;  %v6311_v22 = vld [vmem:[#allocation9 + $0x200] sm:$0xff]   ;;  %v4455_v18 = vshll.u32 %v7463_v30, 16  ;;  %v5257_v48 = vcombine.low %v4647_v45, %v4651_v53 }
 0x3d7   : > { %5891 = vmatprep.subr.bf16.mxu1 %v6306_v62  ;;  %v4659_v4 = vsel %vm6948_vm13, %v5253_v51, %v4658_v54  ;;  %v4663_v21 = vsel %vm6948_vm13, %v5254_v49, %v4662_v56 }
 0x3da   : > { %5892 = vmatpush3.bf16.msra.mxu1 %v6306_v62  ;;  %v4438_v62 = vor.u32 %v4437_v38, %v4434_v16  ;;  %v4619_v16 = vld [vmem:[#allocation3 + $0x48] sm:$0xe] }
 0x3db   : > { %5893 = vmatprep.subr.bf16.mxu1 %v6307_v47  ;;  %v5255_v10 = vrot.slane %v4619_v16, 9 }
 0x3dc   : > { %v4439_v25 = vrot.slane %v4438_v62, 4 }
 0x3de   : > { %5894 = vmatpush3.bf16.msra.mxu1 %v6307_v47  ;;  %v4388_v47 = vsel %vm6889_vm10, %v4383_v55, %v4387_v23  ;;  %v4444_v29 = vsel %vm6889_vm10, %v4439_v25, %v4443_v60  ;;  %v5268_v23 = vld [vmem:[%s7567_s5] ss:$0 sm:$0xff] }
 0x3df   : > { %5895 = vmatprep.subr.bf16.mxu1 %v6308_v6  ;;  %v5237_v26 = vcombine.low %v4388_v47, %v4402_v0 }
 0x3e2   : > { %5896 = vmatpush3.bf16.msra.mxu1 %v6308_v6  ;;  %v4457_v6 = vrot.slane %v4455_v18, 5 }
 0x3e3   : > { %5897 = vmatprep.subr.bf16.mxu1 %v6309_v43 }
 0x3e4   : > { %v4458_v63 = vsel %vm6889_vm10, %v4453_v11, %v4457_v6 }
 0x3e5   : > { %v5239_v42 = vcombine.low %v4444_v29, %v4458_v63 }
 0x3e6   : > { %5898 = vmatpush3.bf16.msra.mxu1 %v6309_v43  ;;  %v6314_v43 = vld [vmem:[#allocation9 + $0x218] sm:$0xff]  }
 0x3e7   : > { %5899 = vmatprep.subr.bf16.mxu1 %v6310_v33 }
 0x3ea   : > { %5900 = vmatpush3.bf16.msra.mxu1 %v6310_v33  ;;  %v5252_v33 = vrot.slane %v4616_v58, 9 }
 0x3eb   : > { %5909 = vmatprep.subr.bf16.mxu1 %v6311_v22 }
 0x3ec   : > { %v4655_v38 = vsel %vm6948_vm13, %v5252_v33, %v4654_v41 }
 0x3ed   : > { %5902 = vmatmul.mubr.bf16.vlgmr.msra.gmra.mrb[0].mxu1 %v5237_v26  ;;  %v5258_v55 = vcombine.low %v4655_v38, %v4659_v4 }
 0x3ee   : > { %5905 = vmatprep.mubr.bf16.mxu1 %v5238_v52  ;;  %5910 = vmatpush3.bf16.msra.mxu1 %v6311_v22  ;;  %v4666_v22 = vrot.slane %v7463_v30, 5 }
 0x3ef   : > { %5911 = vmatprep.subr.bf16.mxu1 %v6312_v20 }
 0x3f0   : > { %v4667_v5 = vsel %vm6948_vm13, %v5255_v10, %v4666_v22 }
 0x3f1   : > { %v5259_v57 = vcombine.low %v4663_v21, %v4667_v5 }
 0x3f2   : > { %5912 = vmatpush3.bf16.msra.mxu1 %v6312_v20 }
 0x3f3   : > { %5913 = vmatprep.subr.bf16.mxu1 %v6313_v3 }
 0x3f5   : > { %5906 = vmatmul.mubr.bf16.gmra.mrb[4].mxu1 %v5239_v42 }
 0x3f6   : > { %5914 = vmatpush3.bf16.msra.mxu1 %v6313_v3  ;;  %5925 = vmatprep.mubr.bf16.mxu1 %v5256_v39 }
 0x3f7   : > { %5915 = vmatprep.subr.bf16.mxu1 %v6314_v43 }
 0x3fa   : > { %5916 = vmatpush3.bf16.msra.mxu1 %v6314_v43 }
 0x3fb   : > { %5917 = vmatprep.subr.bf16.mxu1 %v6315_v40 }
 0x3fe   : > { %5918 = vmatpush3.bf16.msra.mxu1 %v6315_v40 }
 0x3ff   : > { %5919 = vmatprep.subr.bf16.mxu1 %v6316_v36 }
 0x402   : > { %5920 = vmatpush3.bf16.msra.mxu1 %v6316_v36 }
 0x403   : > { %5921 = vmatprep.subr.bf16.mxu1 %v6317_v28 }
 0x406   : > { %5922 = vmatpush3.bf16.msra.mxu1 %v6317_v28 }
 0x407   : > { %5923 = vmatprep.subr.bf16.mxu1 %v6318_v17 }
 0x40a   : > { %5924 = vmatpush3.bf16.msra.mxu1 %v6318_v17 }
 0x40d   : > { %5926 = vmatmul.mubr.bf16.vlgmr.msra.gmra.mrb[0].mxu1 %v5257_v48 }
 0x40e   : > { %5929 = vmatprep.mubr.bf16.mxu1 %v5258_v55 }
 0x415   : > { %5930 = vmatmul.mubr.bf16.gmra.mrb[4].mxu1 %v5259_v57 }
 0x4e0   : > { %v5927_v0 = vpop.f32.mrb[0].mxu1 }
 0x4e1   : > { %v4830_v30 = vmul.f32 %v5927_v0, %v5268_v23  ;;  %v4782_v62 = vpop.f32.mrb[1].mxu1 }
 0x4e2   : > { %v4828_v18 = vmul.f32 %v5268_v23, %v4782_v62  ;;  %v5928_v1 = vpop.f32.mrb[2].mxu1 }
 0x4e3   : > { %v4845_v15 = vadd.f32 %v5269_v34, %v4830_v30  ;;  %v4831_v47 = vmul.f32 %v5928_v1, %v5268_v23  ;;  %v4785_v59 = vpop.f32.mrb[3].mxu1 }
 0x4e4   : > { %v4843_v7 = vadd.f32 %v5269_v34, %v4828_v18  ;;  %v4829_v9 = vmul.f32 %v5268_v23, %v4785_v59 }
 0x4e5   : > { %v4853_v26 = vmax.f32 %v4845_v15, 0.0  ;;  %v4846_v27 = vadd.f32 %v5269_v34, %v4831_v47 }
 0x4e6   : > { %v4851_v20 = vmax.f32 %v4843_v7, 0.0  ;;  %v4844_v52 = vadd.f32 %v5269_v34, %v4829_v9 }
 0x4e7   : > { %4861 = vst [vmem:[%s325_s29 + $0x10] sm:$0xff] %v4853_v26  ;;  %v4854_v25 = vmax.f32 %v4846_v27, 0.0 }
 0x4e8   : > { %4859 = vst [vmem:[%s325_s29] sm:$0xff] %v4851_v20  ;;  %v4852_v11 = vmax.f32 %v4844_v52, 0.0  ;;  %v5931_v6 = vpop.f32.mrb[4].mxu1 }
 0x4e9   : > { %4862 = vst [vmem:[%s325_s29 + $0x18] sm:$0xff] %v4854_v25  ;;  %v4834_v14 = vmul.f32 %v5931_v6, %v5268_v23  ;;  %v4798_v12 = vpop.f32.mrb[5].mxu1 }
 0x4ea   : > { %4860 = vst [vmem:[%s325_s29 + $0x8] sm:$0xff] %v4852_v11  ;;  %v4832_v61 = vmul.f32 %v5268_v23, %v4798_v12  ;;  %v5932_v60 = vpop.f32.mrb[6].mxu1 }
 0x4eb   : > { %v4849_v3 = vadd.f32 %v5269_v34, %v4834_v14  ;;  %v4835_v35 = vmul.f32 %v5932_v60, %v5268_v23  ;;  %v4801_v13 = vpop.f32.mrb[7].mxu1 }
 0x4ec   : > { %v4847_v29 = vadd.f32 %v5269_v34, %v4832_v61  ;;  %v4833_v63 = vmul.f32 %v5268_v23, %v4801_v13 }
 0x4ed   : > { %v4857_v37 = vmax.f32 %v4849_v3, 0.0  ;;  %v4850_v42 = vadd.f32 %v5269_v34, %v4835_v35 }
 0x4ee   : > { %v4855_v31 = vmax.f32 %v4847_v29, 0.0  ;;  %v4848_v43 = vadd.f32 %v5269_v34, %v4833_v63 }
 0x4ef   : > { %4865 = vst [vmem:[%s325_s29 + $0x30] sm:$0xff] %v4857_v37  ;;  %v4858_v39 = vmax.f32 %v4850_v42, 0.0 }
 0x4f0   : > { %4863 = vst [vmem:[%s325_s29 + $0x20] sm:$0xff] %v4855_v31  ;;  %v4856_v40 = vmax.f32 %v4848_v43, 0.0 }
 0x4f1   : > { %4866 = vst [vmem:[%s325_s29 + $0x38] sm:$0xff] %v4858_v39 }
 0x4f2   : > { %4864 = vst [vmem:[%s325_s29 + $0x28] sm:$0xff] %v4856_v40 }
 0x4f3   : > { %6418 = shalt.err (!%p6415_p2)
}
 0x4f4   : > { %s6419_s19 = scalar_lea.hbm %s7518_s20, 1024  ;;  %s6423_s29 = scalar_lea.hbm %s7569_s7, 2048 }
 0x4f5   : > { %p6420_p13 = scmp.ne.s32.totalorder %s7518_s20, %s6419_s19  ;;  %p6424_p4 = scmp.lt.u32.totalorder %s7518_s20, %s7569_s7 }
 0x4f6   : > { %p6425_p5 = scmp.lt.u32.totalorder %s6423_s29, %s6419_s19  ;;  %p6427_p11 = scmp.lt.u32.totalorder %s6419_s19, %s7518_s20 }
 0x4f7   : > { %p6421_p6 = pnand %p6420_p13, %p7593_p0 }
 0x4f8   : > { %p6426_p8 = por %p6425_p5, %p6424_p4 }
 0x4f9   : > { %p6422_p10 = pneg %p6421_p6 }
 0x4fa   : > { %p6428_p1 = por %p6427_p11, %p6426_p8 }
 0x4fc   : > { %p6429_p3 = pnand %p6428_p1, %p6422_p10 }
 0x4fe   : > { %6432 = shalt.err (!%p6429_p3)
}
 0x4ff   : > { %s6487_s9 = smov 128   ;;  %s6488_s11 = smov 8  }
 0x500   : > { %6071 = dma.vmem_to_hbm [thread:$0]  (%p7593_p0), %s7513_s18, 1024, %s7518_s20, %s4868_s28, %s6487_s9, %s6487_s9, %s6488_s11  }
 0x501 PF: > { %s4896_s22 = sand.u32 1, %s6463_s24   ;;  %p7594_p7 = scmp.ne.s32.totalorder %s7574_s8, 0 }
 0x502   : > { %p7595_p9 = scmp.ge.s32.totalorder %s6475_s27, 2  ;;  %s4897_s10 = scalar_lea.sflag [#allocation6], %s4896_s22 }
 0x504   : > { %p6085_p12 = pnand %p7595_p9, %p7594_p7 }
 0x506   : > { %6458 = dma.done.wait (!%p6085_p12), %s4897_s10, 1024  }
 0x507   : > { %6460 = vsyncadd (!%p6085_p12), %s4897_s10, 4294966272  ;;  %p21_p2 = scmp.ge.s32.totalorder %s6639_s13, 4   ;;  %s7596_s24 = smov %s6467_s25 }
 0x508   : > { %s7597_s25 = smov %s6471_s26  ;;  %s7598_s26 = smov %s6655_s17 }
 0x509   : > { %s7599_s27 = smov %s6639_s13  ;;  %23 = sbr.rel (!%p21_p2) target bundleno = 6 (0x6), region = 107 }
 0x510   :  { %4902 = vsyncpa [#allocation5], 1 }
 0x511   :  { %4904 = vsyncpa [#allocation5 + $0x1], 1 }
 0x512   :  { %4905 = vsyncpa [#allocation8], 1 }
 0x513   :  { %4906 = vsyncpa [#allocation6], 1 }
 0x514   :  { %4908 = vsyncpa [#allocation6 + $0x1], 1 }

</bundles_post_ra>
